<compile_context>
chip_gen: v5e
topology: v5e:2x2
jax: 0.10.0
libtpu: 0.0.40
codegen_flags: <defaults>
</compile_context>

<pallas_src>
import jax
import jax.numpy as jnp
from jax.experimental import pallas as pl
from jax.experimental.pallas import tpu as pltpu


_VMEM_LIMIT = 32 * 1024 * 1024   # safe on every gen (v5e/v6e 128 MiB, v7x 64 MiB physical)

# Space-to-depth geometry for the fused conv kernel.
_Q = 15            # conv1 output is 30x30 -> 15x15 per 2x2 phase
_KP = 192          # 3 * 8 * 8  (ci, hh, ww) superblock patch length
_S2D_W = 272       # >= 15*15 + 16 + 31 : padded lane width of the s2d activation
_OUT_W = 256       # lane-dense conv2 output width (valid flat positions < 209)
_TAP_OFFS = (0, 1, 15, 16)   # (eh, ew) -> eh*15 + ew lane shift per conv2 tap pair


# ---------------------------------------------------------------------------
# Kernel A: fused conv1 -> relu -> conv2 -> relu, one sample per grid step.
# ---------------------------------------------------------------------------
def _fused_conv_kernel(p2_ref, w1e_ref, b1e_ref, w2e_ref, b2e_ref, o_ref):
    # p2_ref : (1, 192, 272) bf16   8x8-superblock im2col of x (zero lane-pad)
    # w1e_ref: (64, 192)     bf16   conv1 weights expanded over the 2x2 phases
    # b1e_ref: (64, 272)     f32    conv1 bias, pre-broadcast to lane width
    # w2e_ref: (4, 32, 64)   bf16   conv2 taps regrouped over phase channels
    # b2e_ref: (32, 256)     f32    conv2 bias, pre-broadcast
    # o_ref  : (1, 32, 256)  bf16   conv2 output, flat (qh*15+qw) lane layout
    p2 = p2_ref[0]                                                    # (192, 272)

    # conv1 (space-to-depth form): one MXU matmul + VPU bias/relu.
    s2d = jnp.dot(w1e_ref[...], p2, preferred_element_type=jnp.float32)
    s2d = jnp.maximum(s2d + b1e_ref[...], 0.0).astype(jnp.bfloat16)   # (64, 272)

    # conv2: 4 shifted taps of a 2x2-kernel / stride-1 conv over the 64
    # phase channels.  Static lane-offset slices of the padded row replace
    # any strided slicing / im2col.
    acc = b2e_ref[...]                                                # (32, 256) f32
    for t, off in enumerate(_TAP_OFFS):
        rhs = s2d[:, off:off + _OUT_W]                                # (64, 256)
        acc = acc + jnp.dot(w2e_ref[t], rhs,
                            preferred_element_type=jnp.float32)
    o_ref[0] = jnp.maximum(acc, 0.0).astype(o_ref.dtype)


def fused_convs(p2, w1e, b1e, w2e, b2e, *, out_dtype=jnp.bfloat16):
    """p2: (n, 192, 272) bf16 -> (n, 32, 256) out_dtype (padded conv2 output)."""
    n = p2.shape[0]
    return pl.pallas_call(
        _fused_conv_kernel,
        out_shape=jax.ShapeDtypeStruct((n, 32, _OUT_W), out_dtype),
        grid=(n,),
        in_specs=[
            pl.BlockSpec((1, _KP, _S2D_W), lambda i: (i, 0, 0)),   # per-sample patches
            pl.BlockSpec((64, _KP), lambda i: (0, 0)),             # resident weights
            pl.BlockSpec((64, _S2D_W), lambda i: (0, 0)),
            pl.BlockSpec((4, 32, 64), lambda i: (0, 0, 0)),
            pl.BlockSpec((32, _OUT_W), lambda i: (0, 0)),
        ],
        out_specs=pl.BlockSpec((1, 32, _OUT_W), lambda i: (i, 0, 0)),
        compiler_params=pltpu.CompilerParams(
            dimension_semantics=("parallel",),
            vmem_limit_bytes=_VMEM_LIMIT),
    )(p2, w1e, b1e, w2e, b2e)


# ---------------------------------------------------------------------------
# Kernel B: final Linear — relu(x @ w + b), N-parallel x K-sequential grid.
# ---------------------------------------------------------------------------
def _dense_kernel(x_ref, w_ref, b_ref, o_ref):
    kstep = pl.program_id(1)
    part = jnp.dot(x_ref[...], w_ref[...], preferred_element_type=jnp.float32)

    @pl.when(kstep == 0)
    def _():
        o_ref[...] = b_ref[...] + part

    @pl.when(kstep > 0)
    def _():
        o_ref[...] = o_ref[...] + part

    @pl.when(kstep == pl.num_programs(1) - 1)
    def _():
        o_ref[...] = jnp.maximum(o_ref[...], 0.0)


def dense_bias_relu(x, w, b, *, max_weight_slab_bytes=8 << 20):
    """relu(x @ w + b): x (M,K) bf16, w (K,N) bf16, b (1,N) f32 -> (M,N) f32.

    Small M / small N (the demo case): grid (1, 1) — the whole bf16 weight is
    one resident slab, no K-pipelining overhead (the layer is pure weight DMA).
    Large N: split into >=128-lane column stripes ("parallel" -> v7x megacore).
    Large M: K-tile so the MXU overlaps the weight stream.
    """
    m, k = x.shape
    k2, d = w.shape
    assert k == k2, (k, k2)

    n_tile = d
    if d % 256 == 0:
        while n_tile % 256 == 0 and k * n_tile * w.dtype.itemsize > max_weight_slab_bytes:
            n_tile //= 2

    k_tile = k
    if m >= 256:                       # only pipeline K when compute can hide DMA
        for cand in (2048, 1024, 512, 256, 128):
            if k % cand == 0:
                k_tile = cand
                break

    grid = (d // n_tile, k // k_tile)
    return pl.pallas_call(
        _dense_kernel,
        out_shape=jax.ShapeDtypeStruct((m, d), jnp.float32),
        grid=grid,
        in_specs=[
            pl.BlockSpec((m, k_tile), lambda j, kk: (0, kk)),
            pl.BlockSpec((k_tile, n_tile), lambda j, kk: (kk, j)),
            pl.BlockSpec((1, n_tile), lambda j, kk: (0, j)),
        ],
        out_specs=pl.BlockSpec((m, n_tile), lambda j, kk: (0, j)),  # resident acc over K
        compiler_params=pltpu.CompilerParams(
            dimension_semantics=("parallel", "arbitrary"),
            vmem_limit_bytes=_VMEM_LIMIT),
    )(x, w, b)


# ---------------------------------------------------------------------------
# Parameter init (PyTorch-shaped) and one-time matmul-layout prep.
# ---------------------------------------------------------------------------
def init_params(key, d):
    k1, k2, k3, k4, k5, k6 = jax.random.split(key, 6)
    scale = 0.05
    return dict(
        w1=jax.random.normal(k1, (16, 3, 4, 4), jnp.float32) * scale,    # OIHW
        b1=jax.random.normal(k2, (16,), jnp.float32) * scale,
        w2=jax.random.normal(k3, (32, 16, 4, 4), jnp.float32) * scale,   # OIHW
        b2=jax.random.normal(k4, (32,), jnp.float32) * scale,
        w3=jax.random.normal(k5, (d, 32 * 14 * 14), jnp.float32) * scale,
        b3=jax.random.normal(k6, (d,), jnp.float32) * scale,
    )


def prepare_params(params):
    """One-time: expand/permute weights into the fused-kernel layouts, cast bf16."""
    w1, b1 = params["w1"], params["b1"]
    w2, b2 = params["w2"], params["b2"]
    w3, b3 = params["w3"], params["b3"]
    d = w3.shape[0]

    # conv1 expanded weight: row (dh,dw,co) applied to 8x8 superblock patches
    # (ci,hh,ww) computes conv1 output at phase (dh,dw) -> 2x2 space-to-depth.
    w1e = jnp.zeros((2, 2, 16, 3, 8, 8), jnp.float32)
    for dh in range(2):
        for dw in range(2):
            w1e = w1e.at[dh, dw, :, :, 4 * dh:4 * dh + 4, 4 * dw:4 * dw + 4].set(w1)
    w1e = w1e.reshape(64, _KP).astype(jnp.bfloat16)
    b1e = jnp.broadcast_to(jnp.tile(b1, 4)[:, None], (64, _S2D_W)).astype(jnp.float32)

    # conv2 taps regrouped over the phase channels: kh=2*eh+dh, kw=2*ew+dw.
    w2r = w2.reshape(32, 16, 2, 2, 2, 2)                    # (co2, co1, eh, dh, ew, dw)
    w2e = jnp.transpose(w2r, (2, 4, 0, 3, 5, 1)).reshape(4, 32, 64).astype(jnp.bfloat16)
    b2e = jnp.broadcast_to(b2[:, None], (32, _OUT_W)).astype(jnp.float32)

    # Final Linear weight, rows permuted to the kernel's (c, qh*15+qw) flat
    # layout and zero-filled at the padded / invalid lanes (so the garbage
    # lanes of the conv output contribute exactly 0).
    w3t = jnp.transpose(w3, (1, 0)).reshape(32, 14, 14, d)
    w3e = jnp.zeros((32, _Q, _Q, d), jnp.float32).at[:, :14, :14, :].set(w3t)
    w3e = jnp.pad(w3e.reshape(32, _Q * _Q, d), ((0, 0), (0, _OUT_W - _Q * _Q), (0, 0)))
    w3e = w3e.reshape(32 * _OUT_W, d).astype(jnp.bfloat16)

    return dict(w1e=w1e, b1e=b1e, w2e=w2e, b2e=b2e,
                w3e=w3e, b3=b3.reshape(1, d).astype(jnp.float32))


# ---------------------------------------------------------------------------
# Forward pass (two Pallas calls; only a single fused im2col pass stays in XLA).
# ---------------------------------------------------------------------------
@jax.jit
def perception_forward(prepped, x):
    """x: (N, 3, 120, 120) float32 (NCHW, like PyTorch) -> (N, d) float32."""
    n = x.shape[0]
    assert x.shape[1:] == (3, 120, 120), x.shape

    # 8x8 / stride-8 superblock im2col of x -> (n, 192, 272) bf16.
    # TODO(synk): this cast+reshape+transpose+pad stays as one fused XLA pass;
    # folding the 6-D transpose into the Pallas kernel is a lowering risk.
    xb = x.astype(jnp.bfloat16)
    p2 = xb.reshape(n, 3, _Q, 8, _Q, 8)                  # (n, ci, qh, hh, qw, ww)
    p2 = jnp.transpose(p2, (0, 1, 3, 5, 2, 4)).reshape(n, _KP, _Q * _Q)
    p2 = jnp.pad(p2, ((0, 0), (0, 0), (0, _S2D_W - _Q * _Q)))

    # Fused conv1 -> relu -> conv2 -> relu (one kernel, grid over batch).
    a2 = fused_convs(p2, prepped["w1e"], prepped["b1e"],
                     prepped["w2e"], prepped["b2e"])      # (n, 32, 256) bf16

    # Flatten is a contiguous (free) reshape; the row permutation / padding is
    # already baked into w3e, so no XLA transpose is needed here.
    flat = a2.reshape(n, 32 * _OUT_W)
    # TODO(synk): the final Linear stays a separate pallas_call; fusing it into
    # the conv kernel would need an in-kernel (32,256)->(1,8192) relayout.
    return dense_bias_relu(flat, prepped["w3e"], prepped["b3"])        # (n, d) f32


# ---------------------------------------------------------------------------
# Pure-JAX reference (lax.conv, f32) for correctness checking.
# ---------------------------------------------------------------------------
def perception_reference(params, x):
    a1 = jax.lax.conv_general_dilated(
        x, params["w1"], window_strides=(4, 4), padding="VALID",
        dimension_numbers=("NCHW", "OIHW", "NCHW"))
    a1 = jax.nn.relu(a1 + params["b1"][None, :, None, None])
    a2 = jax.lax.conv_general_dilated(
        a1, params["w2"], window_strides=(2, 2), padding="VALID",
        dimension_numbers=("NCHW", "OIHW", "NCHW"))
    a2 = jax.nn.relu(a2 + params["b2"][None, :, None, None])
    flat = a2.reshape(x.shape[0], -1)
    return jax.nn.relu(flat @ params["w3"].T + params["b3"])


if __name__ == "__main__":
    key = jax.random.PRNGKey(0)
    kx, kp = jax.random.split(key)

    d = 128
    batch = 2
    # Linear(32*14*14, d) in the module fixes the input spatial size at 120x120.
    x = jax.random.normal(kx, (batch, 3, 120, 120), jnp.float32)
    params = init_params(kp, d)
    prepped = prepare_params(params)           # one-time weight layout/cast prep

    out = perception_forward(prepped, x)
    out = jax.block_until_ready(out)
    assert out.shape == (batch, d), out.shape
    assert bool(jnp.all(jnp.isfinite(out)))

    ref = perception_reference(params, x)
    max_err = float(jnp.max(jnp.abs(out - ref)))
    # bf16 operands / f32 accumulation vs pure-f32 reference -> loosened tolerance.
    assert bool(jnp.allclose(out, ref, rtol=5e-2, atol=5e-2)), max_err

    print("KERNEL_OK")
</pallas_src>

<mosaic_0001>
module attributes {stable_mosaic.version = 11 : i64} {
  func.func @_fused_conv_kernel(%arg0: i32, %arg1: memref<1x192x272xbf16, #tpu.memory_space<vmem>>, %arg2: memref<64x192xbf16, #tpu.memory_space<vmem>>, %arg3: memref<64x272xf32, #tpu.memory_space<vmem>>, %arg4: memref<4x32x64xbf16, #tpu.memory_space<vmem>>, %arg5: memref<32x256xf32, #tpu.memory_space<vmem>>, %arg6: memref<1x32x256xbf16, #tpu.memory_space<vmem>>) attributes {dimension_semantics = [#tpu.dimension_semantics<parallel>], iteration_bounds = array<i64: 2>, scalar_prefetch = 0 : i64, scratch_operands = 0 : i64, tpu.core_type = #tpu.core_type<tc>, window_params = [{transform_indices = @transform_0, window_bounds = array<i64: 1, 192, 272>}, {pipeline_mode = #tpu.pipeline_mode<synchronous>, transform_indices = @transform_1, window_bounds = array<i64: 64, 192>}, {pipeline_mode = #tpu.pipeline_mode<synchronous>, transform_indices = @transform_2, window_bounds = array<i64: 64, 272>}, {pipeline_mode = #tpu.pipeline_mode<synchronous>, transform_indices = @transform_3, window_bounds = array<i64: 4, 32, 64>}, {pipeline_mode = #tpu.pipeline_mode<synchronous>, transform_indices = @transform_4, window_bounds = array<i64: 32, 256>}, {transform_indices = @transform_5, window_bounds = array<i64: 1, 32, 256>}]} {
    %c0 = arith.constant 0 : index
    %c0_0 = arith.constant 0 : index
    %c0_1 = arith.constant 0 : index
    %0 = vector.load %arg1[%c0, %c0_0, %c0_1] : memref<1x192x272xbf16, #tpu.memory_space<vmem>>, vector<1x192x272xbf16>
    %1 = vector.shape_cast %0 : vector<1x192x272xbf16> to vector<192x272xbf16>
    %c0_2 = arith.constant 0 : index
    %c0_3 = arith.constant 0 : index
    %2 = vector.load %arg2[%c0_2, %c0_3] : memref<64x192xbf16, #tpu.memory_space<vmem>>, vector<64x192xbf16>
    %cst = arith.constant dense<0.000000e+00> : vector<64x272xf32>
    %3 = tpu.matmul %2, %1, %cst {dimension_numbers = #tpu.dot_dimension_numbers<[1], [0], [0], [1], [0, 0, 1, 1], [], []>} : vector<64x192xbf16>, vector<192x272xbf16>, vector<64x272xf32> -> vector<64x272xf32>
    %c0_4 = arith.constant 0 : index
    %c0_5 = arith.constant 0 : index
    %4 = vector.load %arg3[%c0_4, %c0_5] : memref<64x272xf32, #tpu.memory_space<vmem>>, vector<64x272xf32>
    %5 = arith.addf %3, %4 : vector<64x272xf32>
    %cst_6 = arith.constant 0.000000e+00 : f32
    %6 = vector.broadcast %cst_6 : f32 to vector<64x272xf32>
    %7 = arith.maximumf %5, %6 : vector<64x272xf32>
    %8 = arith.truncf %7 : vector<64x272xf32> to vector<64x272xbf16>
    %c0_7 = arith.constant 0 : index
    %c0_8 = arith.constant 0 : index
    %9 = vector.load %arg5[%c0_7, %c0_8] : memref<32x256xf32, #tpu.memory_space<vmem>>, vector<32x256xf32>
    %10 = vector.extract_strided_slice %8 {offsets = [0, 0], sizes = [64, 256], strides = [1, 1]} : vector<64x272xbf16> to vector<64x256xbf16>
    %c0_9 = arith.constant 0 : index
    %c0_10 = arith.constant 0 : index
    %c0_11 = arith.constant 0 : index
    %11 = vector.load %arg4[%c0_9, %c0_10, %c0_11] : memref<4x32x64xbf16, #tpu.memory_space<vmem>>, vector<1x32x64xbf16>
    %12 = vector.shape_cast %11 : vector<1x32x64xbf16> to vector<32x64xbf16>
    %cst_12 = arith.constant dense<0.000000e+00> : vector<32x256xf32>
    %13 = tpu.matmul %12, %10, %cst_12 {dimension_numbers = #tpu.dot_dimension_numbers<[1], [0], [0], [1], [0, 0, 1, 1], [], []>} : vector<32x64xbf16>, vector<64x256xbf16>, vector<32x256xf32> -> vector<32x256xf32>
    %14 = arith.addf %9, %13 : vector<32x256xf32>
    %15 = vector.extract_strided_slice %8 {offsets = [0, 1], sizes = [64, 256], strides = [1, 1]} : vector<64x272xbf16> to vector<64x256xbf16>
    %c1 = arith.constant 1 : index
    %c0_13 = arith.constant 0 : index
    %c0_14 = arith.constant 0 : index
    %16 = vector.load %arg4[%c1, %c0_13, %c0_14] : memref<4x32x64xbf16, #tpu.memory_space<vmem>>, vector<1x32x64xbf16>
    %17 = vector.shape_cast %16 : vector<1x32x64xbf16> to vector<32x64xbf16>
    %cst_15 = arith.constant dense<0.000000e+00> : vector<32x256xf32>
    %18 = tpu.matmul %17, %15, %cst_15 {dimension_numbers = #tpu.dot_dimension_numbers<[1], [0], [0], [1], [0, 0, 1, 1], [], []>} : vector<32x64xbf16>, vector<64x256xbf16>, vector<32x256xf32> -> vector<32x256xf32>
    %19 = arith.addf %14, %18 : vector<32x256xf32>
    %20 = vector.extract_strided_slice %8 {offsets = [0, 15], sizes = [64, 256], strides = [1, 1]} : vector<64x272xbf16> to vector<64x256xbf16>
    %c2 = arith.constant 2 : index
    %c0_16 = arith.constant 0 : index
    %c0_17 = arith.constant 0 : index
    %21 = vector.load %arg4[%c2, %c0_16, %c0_17] : memref<4x32x64xbf16, #tpu.memory_space<vmem>>, vector<1x32x64xbf16>
    %22 = vector.shape_cast %21 : vector<1x32x64xbf16> to vector<32x64xbf16>
    %cst_18 = arith.constant dense<0.000000e+00> : vector<32x256xf32>
    %23 = tpu.matmul %22, %20, %cst_18 {dimension_numbers = #tpu.dot_dimension_numbers<[1], [0], [0], [1], [0, 0, 1, 1], [], []>} : vector<32x64xbf16>, vector<64x256xbf16>, vector<32x256xf32> -> vector<32x256xf32>
    %24 = arith.addf %19, %23 : vector<32x256xf32>
    %25 = vector.extract_strided_slice %8 {offsets = [0, 16], sizes = [64, 256], strides = [1, 1]} : vector<64x272xbf16> to vector<64x256xbf16>
    %c3 = arith.constant 3 : index
    %c0_19 = arith.constant 0 : index
    %c0_20 = arith.constant 0 : index
    %26 = vector.load %arg4[%c3, %c0_19, %c0_20] : memref<4x32x64xbf16, #tpu.memory_space<vmem>>, vector<1x32x64xbf16>
    %27 = vector.shape_cast %26 : vector<1x32x64xbf16> to vector<32x64xbf16>
    %cst_21 = arith.constant dense<0.000000e+00> : vector<32x256xf32>
    %28 = tpu.matmul %27, %25, %cst_21 {dimension_numbers = #tpu.dot_dimension_numbers<[1], [0], [0], [1], [0, 0, 1, 1], [], []>} : vector<32x64xbf16>, vector<64x256xbf16>, vector<32x256xf32> -> vector<32x256xf32>
    %29 = arith.addf %24, %28 : vector<32x256xf32>
    %cst_22 = arith.constant 0.000000e+00 : f32
    %30 = vector.broadcast %cst_22 : f32 to vector<32x256xf32>
    %31 = arith.maximumf %29, %30 : vector<32x256xf32>
    %32 = arith.truncf %31 : vector<32x256xf32> to vector<32x256xbf16>
    %c0_23 = arith.constant 0 : index
    %c0_24 = arith.constant 0 : index
    %c0_25 = arith.constant 0 : index
    %33 = vector.load %arg6[%c0_23, %c0_24, %c0_25] : memref<1x32x256xbf16, #tpu.memory_space<vmem>>, vector<1x32x256xbf16>
    %34 = vector.shape_cast %33 : vector<1x32x256xbf16> to vector<32x256xbf16>
    %35 = vector.shape_cast %32 : vector<32x256xbf16> to vector<1x32x256xbf16>
    tpu.vector_store %arg6[%c0_23, %c0_24, %c0_25], %35 {strides = array<i32>} : memref<1x32x256xbf16, #tpu.memory_space<vmem>>, vector<1x32x256xbf16>,
    return
  }
  func.func @transform_0(%arg0: i32) -> (i32, i32, i32) {
    %c0_i32 = arith.constant 0 : i32
    %c0_i32_0 = arith.constant 0 : i32
    %c0_i32_1 = arith.constant 0 : i32
    return %arg0, %c0_i32, %c0_i32_0 : i32, i32, i32
  }
  func.func @transform_1(%arg0: i32) -> (i32, i32) {
    %c0_i32 = arith.constant 0 : i32
    %c0_i32_0 = arith.constant 0 : i32
    %c0_i32_1 = arith.constant 0 : i32
    return %c0_i32, %c0_i32_0 : i32, i32
  }
  func.func @transform_2(%arg0: i32) -> (i32, i32) {
    %c0_i32 = arith.constant 0 : i32
    %c0_i32_0 = arith.constant 0 : i32
    %c0_i32_1 = arith.constant 0 : i32
    return %c0_i32, %c0_i32_0 : i32, i32
  }
  func.func @transform_3(%arg0: i32) -> (i32, i32, i32) {
    %c0_i32 = arith.constant 0 : i32
    %c0_i32_0 = arith.constant 0 : i32
    %c0_i32_1 = arith.constant 0 : i32
    %c0_i32_2 = arith.constant 0 : i32
    return %c0_i32, %c0_i32_0, %c0_i32_1 : i32, i32, i32
  }
  func.func @transform_4(%arg0: i32) -> (i32, i32) {
    %c0_i32 = arith.constant 0 : i32
    %c0_i32_0 = arith.constant 0 : i32
    %c0_i32_1 = arith.constant 0 : i32
    return %c0_i32, %c0_i32_0 : i32, i32
  }
  func.func @transform_5(%arg0: i32) -> (i32, i32, i32) {
    %c0_i32 = arith.constant 0 : i32
    %c0_i32_0 = arith.constant 0 : i32
    %c0_i32_1 = arith.constant 0 : i32
    return %arg0, %c0_i32, %c0_i32_0 : i32, i32, i32
  }
}

module attributes {stable_mosaic.version = 11 : i64} {
  func.func @_dense_kernel(%arg0: i32, %arg1: i32, %arg2: memref<2x8192xbf16, #tpu.memory_space<vmem>>, %arg3: memref<8192x128xbf16, #tpu.memory_space<vmem>>, %arg4: memref<1x128xf32, #tpu.memory_space<vmem>>, %arg5: memref<2x128xf32, #tpu.memory_space<vmem>>) attributes {dimension_semantics = [#tpu.dimension_semantics<parallel>, #tpu.dimension_semantics<arbitrary>], iteration_bounds = array<i64: 1, 1>, scalar_prefetch = 0 : i64, scratch_operands = 0 : i64, tpu.core_type = #tpu.core_type<tc>, window_params = [{transform_indices = @transform_0, window_bounds = array<i64: 2, 8192>}, {transform_indices = @transform_1, window_bounds = array<i64: 8192, 128>}, {transform_indices = @transform_2, window_bounds = array<i64: 1, 128>}, {transform_indices = @transform_3, window_bounds = array<i64: 2, 128>}]} {
    %c0 = arith.constant 0 : index
    %c0_0 = arith.constant 0 : index
    %0 = vector.load %arg2[%c0, %c0_0] : memref<2x8192xbf16, #tpu.memory_space<vmem>>, vector<2x8192xbf16>
    %c0_1 = arith.constant 0 : index
    %c0_2 = arith.constant 0 : index
    %1 = vector.load %arg3[%c0_1, %c0_2] : memref<8192x128xbf16, #tpu.memory_space<vmem>>, vector<8192x128xbf16>
    %cst = arith.constant dense<0.000000e+00> : vector<2x128xf32>
    %2 = tpu.matmul %0, %1, %cst {dimension_numbers = #tpu.dot_dimension_numbers<[1], [0], [0], [1], [0, 0, 1, 1], [], []>} : vector<2x8192xbf16>, vector<8192x128xbf16>, vector<2x128xf32> -> vector<2x128xf32>
    %c0_i32 = arith.constant 0 : i32
    %3 = arith.cmpi eq, %arg1, %c0_i32 : i32
    %4 = arith.extui %3 : i1 to i32
    %c0_i32_3 = arith.constant 0 : i32
    %5 = arith.cmpi ne, %4, %c0_i32_3 : i32
    scf.if %5 {
      %c0_8 = arith.constant 0 : index
      %c0_9 = arith.constant 0 : index
      %12 = vector.load %arg4[%c0_8, %c0_9] : memref<1x128xf32, #tpu.memory_space<vmem>>, vector<1x128xf32>
      %13 = vector.broadcast %12 : vector<1x128xf32> to vector<2x128xf32>
      %14 = arith.addf %13, %2 : vector<2x128xf32>
      %c0_10 = arith.constant 0 : index
      %c0_11 = arith.constant 0 : index
      %15 = vector.load %arg5[%c0_10, %c0_11] : memref<2x128xf32, #tpu.memory_space<vmem>>, vector<2x128xf32>
      tpu.vector_store %arg5[%c0_10, %c0_11], %14 {strides = array<i32>} : memref<2x128xf32, #tpu.memory_space<vmem>>, vector<2x128xf32>,
    } else {
    }
    %c0_i32_4 = arith.constant 0 : i32
    %6 = arith.cmpi sgt, %arg1, %c0_i32_4 : i32
    %7 = arith.extui %6 : i1 to i32
    %c0_i32_5 = arith.constant 0 : i32
    %8 = arith.cmpi ne, %7, %c0_i32_5 : i32
    scf.if %8 {
      %c0_8 = arith.constant 0 : index
      %c0_9 = arith.constant 0 : index
      %12 = vector.load %arg5[%c0_8, %c0_9] : memref<2x128xf32, #tpu.memory_space<vmem>>, vector<2x128xf32>
      %13 = arith.addf %12, %2 : vector<2x128xf32>
      %c0_10 = arith.constant 0 : index
      %c0_11 = arith.constant 0 : index
      %14 = vector.load %arg5[%c0_10, %c0_11] : memref<2x128xf32, #tpu.memory_space<vmem>>, vector<2x128xf32>
      tpu.vector_store %arg5[%c0_10, %c0_11], %13 {strides = array<i32>} : memref<2x128xf32, #tpu.memory_space<vmem>>, vector<2x128xf32>,
    } else {
    }
    %c0_i32_6 = arith.constant 0 : i32
    %9 = arith.cmpi eq, %arg1, %c0_i32_6 : i32
    %10 = arith.extui %9 : i1 to i32
    %c0_i32_7 = arith.constant 0 : i32
    %11 = arith.cmpi ne, %10, %c0_i32_7 : i32
    scf.if %11 {
      %c0_8 = arith.constant 0 : index
      %c0_9 = arith.constant 0 : index
      %12 = vector.load %arg5[%c0_8, %c0_9] : memref<2x128xf32, #tpu.memory_space<vmem>>, vector<2x128xf32>
      %cst_10 = arith.constant 0.000000e+00 : f32
      %13 = vector.broadcast %cst_10 : f32 to vector<2x128xf32>
      %14 = arith.maximumf %12, %13 : vector<2x128xf32>
      %c0_11 = arith.constant 0 : index
      %c0_12 = arith.constant 0 : index
      %15 = vector.load %arg5[%c0_11, %c0_12] : memref<2x128xf32, #tpu.memory_space<vmem>>, vector<2x128xf32>
      tpu.vector_store %arg5[%c0_11, %c0_12], %14 {strides = array<i32>} : memref<2x128xf32, #tpu.memory_space<vmem>>, vector<2x128xf32>,
    } else {
    }
    return
  }
  func.func @transform_0(%arg0: i32, %arg1: i32) -> (i32, i32) {
    %c0_i32 = arith.constant 0 : i32
    %c0_i32_0 = arith.constant 0 : i32
    return %c0_i32, %arg1 : i32, i32
  }
  func.func @transform_1(%arg0: i32, %arg1: i32) -> (i32, i32) {
    %c0_i32 = arith.constant 0 : i32
    return %arg1, %arg0 : i32, i32
  }
  func.func @transform_2(%arg0: i32, %arg1: i32) -> (i32, i32) {
    %c0_i32 = arith.constant 0 : i32
    %c0_i32_0 = arith.constant 0 : i32
    return %c0_i32, %arg0 : i32, i32
  }
  func.func @transform_3(%arg0: i32, %arg1: i32) -> (i32, i32) {
    %c0_i32 = arith.constant 0 : i32
    %c0_i32_0 = arith.constant 0 : i32
    return %c0_i32, %arg0 : i32, i32
  }
}

</mosaic_0001>

<bundles_post_ra>
// kernel: perception_forward.2
= control target key start
LH: loop header
LB: loop body
LE: loop exit
PB: predicated region body
PF: predicated region fallthrough
CT: control target
= control target key end

     0   :  { %s1654_s18 = smov 0   ;;  %s2074_s0 = inlined_call_operand.vmem [shape: bf16[2,192,272], index: 0, kind: input, shape index: {}]   ;;  %s2075_s1 = inlined_call_operand.vmem [shape: bf16[64,192], index: 1, kind: input, shape index: {}]   ;;  %s2076_s2 = inlined_call_operand.vmem [shape: f32[64,272], index: 2, kind: input, shape index: {}]   ;;  %s2077_s3 = inlined_call_operand.vmem [shape: bf16[4,32,64], index: 3, kind: input, shape index: {}]   ;;  %s2078_s4 = inlined_call_operand.vmem [shape: f32[32,256], index: 4, kind: input, shape index: {}]   ;;  %s2079_s5 = inlined_call_operand.vmem [shape: bf16[2,32,256], index: 5, kind: output, shape index: {}]  }
   0x1 LB: > { %s1290_s19 = sadd.s32 4294967295, %s1619_s18   ;;  %p1294_p0 = scmp.ge.s32.totalorder %s1619_s18, 1  ;;  %s1619_s18 = sphi %s1654_s18, %s15_s18  }
   0x2   : > { %p187_p1 = scmp.lt.s32.totalorder %s1619_s18, 3 }
   0x4   : > { %p188_p2 = pnand %p1294_p0, %p187_p1 }
   0x5   : > { %p215_p3 = scmp.lt.s32.totalorder (!%p188_p2), %s1290_s19, 1  ;;  %s1621_s24 = smov (!%p188_p2), 127  }
   0x6   : > { %191 = sbr.rel (%p188_p2) target bundleno = 625 (0x271), region = 40  ;;  %s1622_s25 = smov (!%p188_p2), 113  }
   0x7   : > { %s1623_s7 = smov (!%p188_p2), 112  }
   0xb   : > { %s2081_s19 = smov (!%p215_p3, %s1290_s19), 1  ;;  %v1585_v45 = vld [vmem:[%s2075_s1 + $0x4] sm:$0xf]  ;;  %v1302_v48 = vld [vmem:[%s2075_s1 + $0x8] sm:$0xf0]  ;;  %vm534_vm0 = vcmask 523264  }
   0xc   : > { %s1601_s20 = smul.u32 288, %s2081_s19  ;;  %v1712_v54 = vor.u32 %v1585_v45, %v1302_v48  ;;  %vm934_vm1 = vcmask 1039360   ;;  %vm1042_vm2 = vcmask 924672   ;;  %vm1150_vm3 = vcmask 916480   ;;  %s1548_s14 = sshll.u32 %s2081_s19, 5 }
   0xd   : > { %s2051_s17 = scalar_lea.vmem %s2079_s5, %s1548_s14 }
   0xe   : > { %s1668_s23 = scalar_lea.vmem %s2074_s0, %s1601_s20 }
   0xf   : > { %v1416_v0 = vld [vmem:[%s1668_s23 + $0xa8] sm:$0xf]  ;;  %v1571_v1 = vld [vmem:[%s1668_s23 + $0xb0] sm:$0xf0]  ;;  %v1570_v5 = vld [vmem:[%s1668_s23 + $0xac] sm:$0xf] }
  0x10   : > { %v1464_v2 = vld [vmem:[%s1668_s23 + $0x108] sm:$0xf]  ;;  %v1417_v3 = vor.u32 %v1571_v1, %v1416_v0  ;;  %v1583_v4 = vld [vmem:[%s1668_s23 + $0x110] sm:$0xf0]  ;;  %v1418_v6 = vld [vmem:[%s1668_s23 + $0xb4] sm:$0xf0] }
  0x11   : > { %v1465_v7 = vor.u32 %v1583_v4, %v1464_v2  ;;  %v1421_v8 = vor.u32 %v1570_v5, %v1418_v6  ;;  %v1582_v9 = vld [vmem:[%s1668_s23 + $0x10c] sm:$0xf]  ;;  %v1466_v10 = vld [vmem:[%s1668_s23 + $0x114] sm:$0xf0]  ;;  %v1404_v11 = vld [vmem:[%s1668_s23 + $0x90] sm:$0xf] }
  0x12   : > { %547 = vmatpush.bf16.msra.mxu0 %v1417_v3  ;;  %v1469_v12 = vor.u32 %v1582_v9, %v1466_v10  ;;  %v1568_v13 = vld [vmem:[%s1668_s23 + $0x98] sm:$0xf0]  ;;  %v1452_v14 = vld [vmem:[%s1668_s23 + $0xf0] sm:$0xf]  ;;  %v1567_v18 = vld [vmem:[%s1668_s23 + $0x94] sm:$0xf] }
  0x13   : > { %v1580_v15 = vld [vmem:[%s1668_s23 + $0xf8] sm:$0xf0]  ;;  %580 = vmatpush.bf16.msra.mxu1 %v1465_v7  ;;  %605 = vmatpush.bf16.msra.mxu2 %v1421_v8  ;;  %v1405_v16 = vor.u32 %v1568_v13, %v1404_v11  ;;  %v1406_v19 = vld [vmem:[%s1668_s23 + $0x9c] sm:$0xf0]  ;;  %v1579_v20 = vld [vmem:[%s1668_s23 + $0xf4] sm:$0xf] }
  0x14   : > { %v1453_v17 = vor.u32 %v1580_v15, %v1452_v14  ;;  %638 = vmatpush.bf16.msra.mxu3 %v1469_v12  ;;  %v1409_v21 = vor.u32 %v1567_v18, %v1406_v19  ;;  %v1454_v22 = vld [vmem:[%s1668_s23 + $0xfc] sm:$0xf0]  ;;  %v1392_v23 = vld [vmem:[%s1668_s23 + $0x78] sm:$0xf]  ;;  %v1565_v24 = vld [vmem:[%s1668_s23 + $0x80] sm:$0xf0] }
  0x15   : > { %v1457_v25 = vor.u32 %v1579_v20, %v1454_v22  ;;  %v1440_v26 = vld [vmem:[%s1668_s23 + $0xd8] sm:$0xf]  ;;  %v1577_v27 = vld [vmem:[%s1668_s23 + $0xe0] sm:$0xf0]  ;;  %v1564_v28 = vld [vmem:[%s1668_s23 + $0x7c] sm:$0xf]  ;;  %v1393_v29 = vor.u32 %v1565_v24, %v1392_v23 }
  0x16   : > { %548 = vmatpush.bf16.msra.mxu0 %v1405_v16  ;;  %v1394_v30 = vld [vmem:[%s1668_s23 + $0x84] sm:$0xf0]  ;;  %v1576_v31 = vld [vmem:[%s1668_s23 + $0xdc] sm:$0xf]  ;;  %v1441_v33 = vor.u32 %v1577_v27, %v1440_v26  ;;  %v1380_v35 = vld [vmem:[%s1668_s23 + $0x60] sm:$0xf] }
  0x17   : > { %v1442_v32 = vld [vmem:[%s1668_s23 + $0xe4] sm:$0xf0]  ;;  %581 = vmatpush.bf16.msra.mxu1 %v1453_v17  ;;  %606 = vmatpush.bf16.msra.mxu2 %v1409_v21  ;;  %v1397_v34 = vor.u32 %v1564_v28, %v1394_v30  ;;  %v1562_v36 = vld [vmem:[%s1668_s23 + $0x68] sm:$0xf0]  ;;  %v1428_v37 = vld [vmem:[%s1668_s23 + $0xc0] sm:$0xf] }
  0x18   : > { %639 = vmatpush.bf16.msra.mxu3 %v1457_v25  ;;  %v1445_v38 = vor.u32 %v1576_v31, %v1442_v32  ;;  %v1574_v39 = vld [vmem:[%s1668_s23 + $0xc8] sm:$0xf0]  ;;  %v1561_v40 = vld [vmem:[%s1668_s23 + $0x64] sm:$0xf]  ;;  %v1382_v41 = vld [vmem:[%s1668_s23 + $0x6c] sm:$0xf0]  ;;  %v1381_v44 = vor.u32 %v1562_v36, %v1380_v35 }
  0x19   : > { %v1573_v42 = vld [vmem:[%s1668_s23 + $0xc4] sm:$0xf]  ;;  %v1430_v43 = vld [vmem:[%s1668_s23 + $0xcc] sm:$0xf0]  ;;  %v1429_v46 = vor.u32 %v1574_v39, %v1428_v37  ;;  %v1385_v47 = vor.u32 %v1561_v40, %v1382_v41  ;;  %v1368_v49 = vld [vmem:[%s1668_s23 + $0x48] sm:$0xf] }
  0x1a   : > { %549 = vmatpush.bf16.msra.mxu0 %v1393_v29  ;;  %v1559_v50 = vld [vmem:[%s1668_s23 + $0x50] sm:$0xf0]  ;;  %v1433_v51 = vor.u32 %v1573_v42, %v1430_v43  ;;  %v1558_v52 = vld [vmem:[%s1668_s23 + $0x4c] sm:$0xf]  ;;  %v1370_v53 = vld [vmem:[%s1668_s23 + $0x54] sm:$0xf0] }
  0x1b   : > { %582 = vmatpush.bf16.msra.mxu1 %v1441_v33  ;;  %607 = vmatpush.bf16.msra.mxu2 %v1397_v34  ;;  %v1369_v55 = vor.u32 %v1559_v50, %v1368_v49  ;;  %v1373_v56 = vor.u32 %v1558_v52, %v1370_v53  ;;  %v1356_v57 = vld [vmem:[%s1668_s23 + $0x30] sm:$0xf]  ;;  %v1556_v58 = vld [vmem:[%s1668_s23 + $0x38] sm:$0xf0]  ;;  %v1555_v59 = vld [vmem:[%s1668_s23 + $0x34] sm:$0xf] }
  0x1c   : > { %640 = vmatpush.bf16.msra.mxu3 %v1445_v38  ;;  %v1358_v60 = vld [vmem:[%s1668_s23 + $0x3c] sm:$0xf0]  ;;  %v1472_v61 = vld [vmem:[%s1668_s23 + $0x110] sm:$0xf]  ;;  %v1584_v62 = vld [vmem:[%s1668_s23 + $0x118] sm:$0xf0]  ;;  %v1357_v2 = vor.u32 %v1556_v58, %v1356_v57 }
  0x1d   : > { %v1473_v63 = vor.u32 %v1584_v62, %v1472_v61  ;;  %v1424_v0 = vld [vmem:[%s1668_s23 + $0xb0] sm:$0xf]  ;;  %v1572_v1 = vld [vmem:[%s1668_s23 + $0xb8] sm:$0xf0]  ;;  %v1344_v3 = vld [vmem:[%s1668_s23 + $0x18] sm:$0xf]  ;;  %v1361_v6 = vor.u32 %v1555_v59, %v1358_v60 }
  0x1e   : > { %550 = vmatpush.bf16.msra.mxu0 %v1381_v44  ;;  %v1553_v4 = vld [vmem:[%s1668_s23 + $0x20] sm:$0xf0]  ;;  %v1425_v5 = vor.u32 %v1572_v1, %v1424_v0  ;;  %v1552_v7 = vld [vmem:[%s1668_s23 + $0x1c] sm:$0xf]  ;;  %v1412_v8 = vld [vmem:[%s1668_s23 + $0x98] sm:$0xf] }
  0x1f   : > { %583 = vmatpush.bf16.msra.mxu1 %v1429_v46  ;;  %608 = vmatpush.bf16.msra.mxu2 %v1385_v47  ;;  %v1569_v9 = vld [vmem:[%s1668_s23 + $0xa0] sm:$0xf0]  ;;  %v1346_v10 = vld [vmem:[%s1668_s23 + $0x24] sm:$0xf0]  ;;  %v1460_v12 = vld [vmem:[%s1668_s23 + $0xf8] sm:$0xf]  ;;  %v1345_v17 = vor.u32 %v1553_v4, %v1344_v3 }
  0x20   : > { %641 = vmatpush.bf16.msra.mxu3 %v1433_v51  ;;  %v1413_v11 = vor.u32 %v1569_v9, %v1412_v8  ;;  %v1581_v13 = vld [vmem:[%s1668_s23 + $0x100] sm:$0xf0]  ;;  %v1400_v14 = vld [vmem:[%s1668_s23 + $0x80] sm:$0xf]  ;;  %v1566_v15 = vld [vmem:[%s1668_s23 + $0x88] sm:$0xf0]  ;;  %v1349_v18 = vor.u32 %v1552_v7, %v1346_v10 }
  0x21   : > { %v1461_v16 = vor.u32 %v1581_v13, %v1460_v12  ;;  %v1332_v19 = vld [vmem:[%s1668_s23] sm:$0xf]  ;;  %v1550_v20 = vld [vmem:[%s1668_s23 + $0x8] sm:$0xf0]  ;;  %v1549_v21 = vld [vmem:[%s1668_s23 + $0x4] sm:$0xf]  ;;  %v1401_v23 = vor.u32 %v1566_v15, %v1400_v14 }
  0x22   : > { %1474 = vmatmul.msk.bf16.vlgmr.msra.gmra.mxu1 %vm534_vm0, %v1712_v54  ;;  %551 = vmatpush.bf16.msra.mxu0 %v1369_v55  ;;  %v1334_v22 = vld [vmem:[%s1668_s23 + $0xc] sm:$0xf0]  ;;  %v1388_v24 = vld [vmem:[%s1668_s23 + $0x68] sm:$0xf]  ;;  %v1563_v25 = vld [vmem:[%s1668_s23 + $0x70] sm:$0xf0]  ;;  %v1333_v26 = vor.u32 %v1550_v20, %v1332_v19 }
  0x23   : > { %1478 = vmatmul.msk.bf16.vlgmr.msra.gmra.mxu3 %vm534_vm0, %v1712_v54  ;;  %609 = vmatpush.bf16.msra.mxu2 %v1373_v56  ;;  %v1300_v27 = vld [vmem:[%s2075_s1] sm:$0xf]  ;;  %v1586_v28 = vld [vmem:[%s2075_s1 + $0x4] sm:$0xf0]  ;;  %v1337_v29 = vor.u32 %v1549_v21, %v1334_v22  ;;  %v1587_v30 = vld [vmem:[%s2075_s1 + $0x14] sm:$0xf]  ;;  %v1389_v32 = vor.u32 %v1563_v25, %v1388_v24 }
  0x24   : > { %696 = vmatpush.bf16.msrb.mxu3 %v1473_v63  ;;  %663 = vmatpush.bf16.msrb.mxu1 %v1425_v5  ;;  %v1310_v31 = vld [vmem:[%s2075_s1 + $0x18] sm:$0xf0]  ;;  %v1301_v33 = vor.u32 %v1586_v28, %v1300_v27  ;;  %v1376_v35 = vld [vmem:[%s1668_s23 + $0x50] sm:$0xf]  ;;  %v1364_v38 = vld [vmem:[%s1668_s23 + $0x38] sm:$0xf] }
  0x25   : > { %v1313_v34 = vor.u32 %v1587_v30, %v1310_v31  ;;  %v1560_v36 = vld [vmem:[%s1668_s23 + $0x58] sm:$0xf0]  ;;  %v1557_v39 = vld [vmem:[%s1668_s23 + $0x40] sm:$0xf0]  ;;  %v1448_v41 = vld [vmem:[%s1668_s23 + $0xe0] sm:$0xf] }
  0x26   : > { %552 = vmatpush.bf16.msra.mxu0 %v1357_v2  ;;  %v1377_v37 = vor.u32 %v1560_v36, %v1376_v35  ;;  %v1365_v40 = vor.u32 %v1557_v39, %v1364_v38  ;;  %v1578_v42 = vld [vmem:[%s1668_s23 + $0xe8] sm:$0xf0]  ;;  %v1352_v43 = vld [vmem:[%s1668_s23 + $0x20] sm:$0xf]  ;;  %v1436_v46 = vld [vmem:[%s1668_s23 + $0xc8] sm:$0xf] }
  0x27   : > { %610 = vmatpush.bf16.msra.mxu2 %v1361_v6  ;;  %v1554_v44 = vld [vmem:[%s1668_s23 + $0x28] sm:$0xf0]  ;;  %v1449_v45 = vor.u32 %v1578_v42, %v1448_v41  ;;  %v1575_v47 = vld [vmem:[%s1668_s23 + $0xd0] sm:$0xf0]  ;;  %v1340_v50 = vld [vmem:[%s1668_s23 + $0x8] sm:$0xf] }
  0x28   : > { %664 = vmatpush.bf16.msrb.mxu1 %v1413_v11  ;;  %697 = vmatpush.bf16.msrb.mxu3 %v1461_v16  ;;  %v1437_v48 = vor.u32 %v1575_v47, %v1436_v46  ;;  %v1353_v49 = vor.u32 %v1554_v44, %v1352_v43  ;;  %v1551_v51 = vld [vmem:[%s1668_s23 + $0x10] sm:$0xf0]  ;;  %v1308_v52 = vld [vmem:[%s2075_s1 + $0x10] sm:$0xf]  ;;  %v1588_v53 = vld [vmem:[%s2075_s1 + $0x14] sm:$0xf0] }
  0x29   : > { %v1589_v55 = vld [vmem:[%s2075_s1 + $0x24] sm:$0xf]  ;;  %v1318_v56 = vld [vmem:[%s2075_s1 + $0x28] sm:$0xf0]  ;;  %v1341_v57 = vor.u32 %v1551_v51, %v1340_v50  ;;  %v1309_v58 = vor.u32 %v1588_v53, %v1308_v52  ;;  %v1316_v60 = vld [vmem:[%s2075_s1 + $0x20] sm:$0xf] }
  0x2a   : > { %553 = vmatpush.bf16.msra.mxu0 %v1345_v17  ;;  %v1321_v59 = vor.u32 %v1589_v55, %v1318_v56  ;;  %v1590_v61 = vld [vmem:[%s2075_s1 + $0x24] sm:$0xf0]  ;;  %v1591_v62 = vld [vmem:[%s2075_s1 + $0x34] sm:$0xf]  ;;  %v1326_v63 = vld [vmem:[%s2075_s1 + $0x38] sm:$0xf0] }
  0x2b   : > { %611 = vmatpush.bf16.msra.mxu2 %v1349_v18  ;;  %v1317_v0 = vor.u32 %v1590_v61, %v1316_v60  ;;  %v1329_v1 = vor.u32 %v1591_v62, %v1326_v63  ;;  %v1324_v2 = vld [vmem:[%s2075_s1 + $0x30] sm:$0xf]  ;;  %v1592_v3 = vld [vmem:[%s2075_s1 + $0x34] sm:$0xf0]  ;;  %v283_v11 = vld [vmem:[%s2076_s2 + $0x8] sm:$0xff] }
  0x2c   : > { %665 = vmatpush.bf16.msrb.mxu1 %v1401_v23  ;;  %698 = vmatpush.bf16.msrb.mxu3 %v1449_v45  ;;  %v1325_v4 = vor.u32 %v1592_v3, %v1324_v2  ;;  %v285_v16 = vld [vmem:[%s2076_s2 + $0x18] sm:$0xff]  ;;  %v286_v21 = vld [vmem:[%s2076_s2 + $0x20] sm:$0xff]  ;;  %v291_v45 = vld [vmem:[%s2076_s2 + $0x48] sm:$0xff] }
  0x2d   : > { %v289_v35 = vld [vmem:[%s2076_s2 + $0x38] sm:$0xff]  ;;  %v292_v51 = vld [vmem:[%s2076_s2 + $0x50] sm:$0xff] }
  0x2e   : > { %554 = vmatpush.bf16.msra.mxu0 %v1333_v26 }
  0x2f   : > { %612 = vmatpush.bf16.msra.mxu2 %v1337_v29 }
  0x30   : > { %666 = vmatpush.bf16.msrb.mxu1 %v1389_v32  ;;  %699 = vmatpush.bf16.msrb.mxu3 %v1437_v48 }
  0x31   : > { %555 = vmatmul.bf16.vlgmr.msra.gmra.mxu0 %v1301_v33 }
  0x32   : > { %1475 = vmatmul.msk.bf16.gmra.mxu1 %vm534_vm0, %v1313_v34  ;;  %613 = vmatmul.bf16.vlgmr.msra.gmra.mxu2 %v1301_v33 }
  0x33   : > { %1479 = vmatmul.msk.bf16.gmra.mxu3 %vm534_vm0, %v1313_v34 }
  0x34   : > { %667 = vmatpush.bf16.msrb.mxu1 %v1377_v37  ;;  %v288_v37 = vld [vmem:[%s2076_s2 + $0x30] sm:$0xff] }
  0x38   : > { %668 = vmatpush.bf16.msrb.mxu1 %v1365_v40 }
  0x3c   : > { %669 = vmatpush.bf16.msrb.mxu1 %v1353_v49 }
  0x40   : > { %670 = vmatpush.bf16.msrb.mxu1 %v1341_v57 }
  0x41   : > { %560 = vmatmul.bf16.gmra.mxu0 %v1309_v58 }
  0x42   : > { %1476 = vmatmul.msk.bf16.gmra.mxu1 %vm534_vm0, %v1321_v59  ;;  %618 = vmatmul.bf16.gmra.mxu2 %v1309_v58 }
  0x43   : > { %1480 = vmatmul.msk.bf16.gmra.mxu3 %vm534_vm0, %v1321_v59 }
  0x51   : > { %565 = vmatmul.bf16.gmra.mxu0 %v1317_v0 }
  0x52   : > { %1477 = vmatmul.msk.bf16.gmra.mxu1 %vm534_vm0, %v1329_v1  ;;  %623 = vmatmul.bf16.gmra.mxu2 %v1317_v0 }
  0x53   : > { %1481 = vmatmul.msk.bf16.gmra.mxu3 %vm534_vm0, %v1329_v1 }
  0x61   : > { %570 = vmatmul.bf16.gmra.mxu0 %v1325_v4 }
  0x62   : > { %628 = vmatmul.bf16.gmra.mxu2 %v1325_v4  ;;  %671 = vmatmul.bf16.vlgmr.msrb.gmra.mxu1 %v1301_v33 }
  0x63   : > { %1482 = vmatmul.msk.bf16.vlgmr.msrb.gmra.mxu3 %vm534_vm0, %v1712_v54  ;;  %v282_v54 = vld [vmem:[%s2076_s2] sm:$0xff] }
  0x72   : > { %676 = vmatmul.bf16.gmra.mxu1 %v1309_v58 }
  0x73   : > { %1483 = vmatmul.msk.bf16.gmra.mxu3 %vm534_vm0, %v1313_v34 }
  0x82   : > { %681 = vmatmul.bf16.gmra.mxu1 %v1317_v0 }
  0x83   : > { %1484 = vmatmul.msk.bf16.gmra.mxu3 %vm534_vm0, %v1321_v59 }
  0x92   : > { %686 = vmatmul.bf16.gmra.mxu1 %v1325_v4  ;;  %v295_v4 = vld [vmem:[%s2076_s2 + $0x68] sm:$0xff] }
  0x93   : > { %1485 = vmatmul.msk.bf16.gmra.mxu3 %vm534_vm0, %v1329_v1 }
  0x9f   : > { %v585_v5 = vpop.f32.mrf.mxu1 }
  0xa6   : > { %v643_v6 = vpop.f32.mrf.mxu3 }
  0xa7   : > { %v587_v7 = vpop.f32.mrf.mxu1 }
  0xae   : > { %v645_v8 = vpop.f32.mrf.mxu3  ;;  %v556_v9 = vpop.f32.mrf.mxu0 }
  0xaf   : > { %v590_v10 = vpop.f32.mrf.mxu1  ;;  %v557_v18 = vadd.f32 %v556_v9, %v282_v54 }
  0xb1   : > { %v586_v22 = vadd.f32 %v585_v5, %v557_v18 }
  0xb3   : > { %v721_v30 = vmax.f32 %v586_v22, 0.0 }
  0xb5   : > { %v614_v12 = vpop.f32.mrf.mxu2 }
  0xb6   : > { %v615_v13 = vadd.f32 %v614_v12, %v283_v11  ;;  %v648_v14 = vpop.f32.mrf.mxu3  ;;  %v558_v15 = vpop.f32.mrf.mxu0 }
  0xb7   : > { %v592_v17 = vpop.f32.mrf.mxu1  ;;  %v559_v20 = vadd.f32 %v558_v15, %v285_v16 }
  0xb8   : > { %v644_v19 = vadd.f32 %v643_v6, %v615_v13 }
  0xb9   : > { %v588_v25 = vadd.f32 %v587_v7, %v559_v20  ;;  %v294_v7 = vld [vmem:[%s2076_s2 + $0x60] sm:$0xff] }
  0xba   : > { %v722_v24 = vmax.f32 %v644_v19, 0.0 }
  0xbb   : > { %v724_v33 = vmax.f32 %v588_v25, 0.0 }
  0xbc   : > { %v745_v32 = vpack.c.bf16 %v722_v24, %v721_v30 }
  0xbd   : > { %v616_v23 = vpop.f32.mrf.mxu2 }
  0xbe   : > { %v617_v26 = vadd.f32 %v616_v23, %v286_v21  ;;  %v650_v27 = vpop.f32.mrf.mxu3  ;;  %v561_v28 = vpop.f32.mrf.mxu0  ;;  %v792_v39 = vunpack.c.h.b16 %v745_v32  ;;  %v791_v56 = vunpack.c.l.b16 %v745_v32  ;;  %v298_v21 = vld [vmem:[%s2076_s2 + $0x80] sm:$0xff] }
  0xbf   : > { %v595_v29 = vpop.f32.mrf.mxu1  ;;  %v562_v44 = vadd.f32 %v561_v28, %v288_v37 }
  0xc0   : > { %v646_v31 = vadd.f32 %v645_v8, %v617_v26 }
  0xc1   : > { %v591_v50 = vadd.f32 %v590_v10, %v562_v44 }
  0xc2   : > { %v725_v34 = vmax.f32 %v646_v31, 0.0 }
  0xc3   : > { %v727_v61 = vmax.f32 %v591_v50, 0.0 }
  0xc4   : > { %v747_v36 = vpack.c.bf16 %v725_v34, %v724_v33 }
  0xc5   : > { %v619_v38 = vpop.f32.mrf.mxu2 }
  0xc6   : > { %v794_v40 = vunpack.c.h.b16 %v747_v36  ;;  %v620_v41 = vadd.f32 %v619_v38, %v289_v35  ;;  %v653_v42 = vpop.f32.mrf.mxu3  ;;  %v563_v43 = vpop.f32.mrf.mxu0  ;;  %v793_v52 = vunpack.c.l.b16 %v747_v36  ;;  %v284_v36 = vld [vmem:[%s2076_s2 + $0x10] sm:$0xff] }
  0xc7   : > { %v597_v46 = vpop.f32.mrf.mxu1  ;;  %v564_v49 = vadd.f32 %v563_v43, %v291_v45  ;;  %v300_v38 = vld [vmem:[%s2076_s2 + $0x90] sm:$0xff]  ;;  %v303_v45 = vld [vmem:[%s2076_s2 + $0xa8] sm:$0xff] }
  0xc8   : > { %v1828_v47 = vpack.c.b16 %v794_v40, %v792_v39  ;;  %v649_v48 = vadd.f32 %v648_v14, %v620_v41  ;;  %v1837_v0 = vpack.c.b16 %v793_v52, %v791_v56  ;;  %v297_v14 = vld [vmem:[%s2076_s2 + $0x78] sm:$0xff]  ;;  %v304_v56 = vld [vmem:[%s2076_s2 + $0xb0] sm:$0xff] }
  0xc9   : > { %v593_v57 = vadd.f32 %v592_v17, %v564_v49 }
  0xca   : > { %912 = vrot.lane.b32.xlu2 %v1828_v47, %s1621_s24  ;;  %v728_v53 = vmax.f32 %v649_v48, 0.0 }
  0xcb   : > { %v730_v2 = vmax.f32 %v593_v57, 0.0 }
  0xcc   : > { %v749_v1 = vpack.c.bf16 %v728_v53, %v727_v61 }
  0xcd   : > { %v621_v55 = vpop.f32.mrf.mxu2 }
  0xce   : > { %v622_v58 = vadd.f32 %v621_v55, %v292_v51  ;;  %v655_v59 = vpop.f32.mrf.mxu3  ;;  %v566_v60 = vpop.f32.mrf.mxu0  ;;  %v795_v6 = vunpack.c.l.b16 %v749_v1  ;;  %v796_v9 = vunpack.c.h.b16 %v749_v1  ;;  %v287_v55 = vld [vmem:[%s2076_s2 + $0x28] sm:$0xff] }
  0xcf   : > { %v1835_v62 = vpop.f32.mrf.mxu1  ;;  %v567_v16 = vadd.f32 %v566_v60, %v294_v7 }
  0xd0   : > { %v651_v63 = vadd.f32 %v650_v27, %v622_v58 }
  0xd1   : > { %v596_v22 = vadd.f32 %v595_v29, %v567_v16  ;;  %v301_v29 = vld [vmem:[%s2076_s2 + $0x98] sm:$0xff] }
  0xd2   : > { %v731_v3 = vmax.f32 %v651_v63, 0.0  ;;  %910 = vrot.lane.b32.xlu2 %v1837_v0, %s1621_s24 }
  0xd3   : > { %v733_v31 = vmax.f32 %v596_v22, 0.0 }
  0xd4   : > { %v751_v5 = vpack.c.bf16 %v731_v3, %v730_v2 }
  0xd5   : > { %v624_v8 = vpop.f32.mrf.mxu2 }
  0xd6   : > { %v797_v10 = vunpack.c.l.b16 %v751_v5  ;;  %v798_v11 = vunpack.c.h.b16 %v751_v5  ;;  %v625_v54 = vadd.f32 %v624_v8, %v295_v4  ;;  %v658_v12 = vpop.f32.mrf.mxu3  ;;  %v568_v13 = vpop.f32.mrf.mxu0 }
  0xd7   : > { %v602_v15 = vpop.f32.mrf.mxu1  ;;  %v569_v20 = vadd.f32 %v568_v13, %v297_v14 }
  0xd8   : > { %v1850_v17 = vpack.c.b16 %v797_v10, %v795_v6  ;;  %v1852_v18 = vpack.c.b16 %v798_v11, %v796_v9  ;;  %v654_v19 = vadd.f32 %v653_v42, %v625_v54 }
  0xd9   : > { %v598_v25 = vadd.f32 %v597_v46, %v569_v20 }
  0xda   : > { %916 = vrot.lane.b32.xlu1 %v1850_v17, %s1621_s24  ;;  %918 = vrot.lane.b32.xlu2 %v1852_v18, %s1621_s24  ;;  %v734_v24 = vmax.f32 %v654_v19, 0.0 }
  0xdb   : > { %v736_v34 = vmax.f32 %v598_v25, 0.0 }
  0xdc   : > { %v753_v33 = vpack.c.bf16 %v734_v24, %v733_v31  ;;  %v290_v31 = vld [vmem:[%s2076_s2 + $0x40] sm:$0xff] }
  0xdd   : > { %v626_v23 = vpop.f32.mrf.mxu2 }
  0xde   : > { %v627_v26 = vadd.f32 %v626_v23, %v298_v21  ;;  %v660_v27 = vpop.f32.mrf.mxu3  ;;  %v571_v28 = vpop.f32.mrf.mxu0  ;;  %v800_v41 = vunpack.c.h.b16 %v753_v33  ;;  %v799_v63 = vunpack.c.l.b16 %v753_v33  ;;  %v296_v33 = vld [vmem:[%s2076_s2 + $0x70] sm:$0xff] }
  0xdf   : > { %v672_v30 = vpop.f32.mrf.mxu1  ;;  %v572_v49 = vadd.f32 %v571_v28, %v300_v38 }
  0xe0   : > { %v656_v32 = vadd.f32 %v655_v59, %v627_v26  ;;  %v673_v39 = vadd.f32 %v672_v30, %v284_v36 }
  0xe1   : > { %v601_v58 = vadd.f32 %v1835_v62, %v572_v49 }
  0xe2   : > { %v737_v35 = vmax.f32 %v656_v32, 0.0  ;;  %v293_v32 = vld [vmem:[%s2076_s2 + $0x58] sm:$0xff] }
  0xe3   : > { %v739_v7 = vmax.f32 %v601_v58, 0.0 }
  0xe4   : > { %v755_v37 = vpack.c.bf16 %v737_v35, %v736_v34 }
  0xe5   : > { %v629_v40 = vpop.f32.mrf.mxu2 }
  0xe6   : > { %v802_v42 = vunpack.c.h.b16 %v755_v37  ;;  %v630_v43 = vadd.f32 %v629_v40, %v301_v29  ;;  %v701_v44 = vpop.f32.mrf.mxu3  ;;  %v573_v46 = vpop.f32.mrf.mxu0  ;;  %v801_v57 = vunpack.c.l.b16 %v755_v37 }
  0xe7   : > { %v674_v48 = vpop.f32.mrf.mxu1  ;;  %v702_v51 = vadd.f32 %v701_v44, %v673_v39  ;;  %v574_v53 = vadd.f32 %v573_v46, %v303_v45 }
  0xe8   : > { %v812_v50 = vpack.c.b16 %v802_v42, %v800_v41  ;;  %v659_v52 = vadd.f32 %v658_v12, %v630_v43  ;;  %v675_v60 = vadd.f32 %v674_v48, %v287_v55  ;;  %v1881_v9 = vpack.c.b16 %v801_v57, %v799_v63  ;;  %v299_v41 = vld [vmem:[%s2076_s2 + $0x88] sm:$0xff]  ;;  %v302_v55 = vld [vmem:[%s2076_s2 + $0xa0] sm:$0xff] }
  0xe9   : > { %v723_v59 = vmax.f32 %v702_v51, 0.0  ;;  %v603_v2 = vadd.f32 %v602_v15, %v574_v53 }
  0xea   : > { %924 = vrot.lane.b32.xlu1 %v812_v50, %s1621_s24  ;;  %v740_v1 = vmax.f32 %v659_v52, 0.0 }
  0xeb   : > { %v746_v10 = vpack.c.bf16 %v723_v59, %v723_v59  ;;  %v742_v12 = vmax.f32 %v603_v2, 0.0 }
  0xec   : > { %v757_v54 = vpack.c.bf16 %v740_v1, %v739_v7 }
  0xed   : > { %v631_v61 = vpop.f32.mrf.mxu2  ;;  %v898_v16 = vunpack.c.l.b16 %v746_v10 }
  0xee   : > { %v632_v3 = vadd.f32 %v631_v61, %v304_v56  ;;  %v703_v4 = vpop.f32.mrf.mxu3  ;;  %v803_v19 = vunpack.c.l.b16 %v757_v54  ;;  %v804_v20 = vunpack.c.h.b16 %v757_v54 }
  0xef   : > { %v704_v5 = vadd.f32 %v703_v4, %v675_v60  ;;  %v677_v6 = vpop.f32.mrf.mxu1  ;;  %v305_v4 = vld [vmem:[%s2076_s2 + $0xb8] sm:$0xff] }
  0xf0   : > { %v661_v8 = vadd.f32 %v660_v27, %v632_v3  ;;  %v678_v34 = vadd.f32 %v677_v6, %v290_v31 }
  0xf1   : > { %v726_v11 = vmax.f32 %v704_v5, 0.0 }
  0xf2   : > { %v743_v13 = vmax.f32 %v661_v8, 0.0  ;;  %922 = vrot.lane.b32.xlu1 %v1881_v9, %s1621_s24 }
  0xf3   : > { %v748_v62 = vpack.c.bf16 %v726_v11, %v726_v11 }
  0xf4   : > { %v759_v14 = vpack.c.bf16 %v743_v13, %v742_v12 }
  0xf5   : > { %v899_v15 = vunpack.c.l.b16 %v748_v62 }
  0xf6   : > { %v805_v21 = vunpack.c.l.b16 %v759_v14  ;;  %v806_v22 = vunpack.c.h.b16 %v759_v14  ;;  %v706_v23 = vpop.f32.mrf.mxu3 }
  0xf7   : > { %v679_v24 = vpop.f32.mrf.mxu1  ;;  %v1885_v25 = vpack.c.b16 %v899_v15, %v898_v16  ;;  %v707_v39 = vadd.f32 %v706_v23, %v678_v34 }
  0xf8   : > { %v1887_v26 = vpack.c.b16 %v805_v21, %v803_v19  ;;  %v814_v27 = vpack.c.b16 %v806_v22, %v804_v20  ;;  %v680_v35 = vadd.f32 %v679_v24, %v293_v32 }
  0xf9   : > { %914 = vrot.lane.b32.xlu0 %v1885_v25, %s1621_s24  ;;  %v729_v43 = vmax.f32 %v707_v39, 0.0 }
  0xfa   : > { %833 = vmatpush.bf16.msrb.mxu0 %v1887_v26  ;;  %852 = vmatpush.bf16.msrb.mxu2 %v814_v27 }
  0xfb   : > { %1032 = vrot.lane.b32.xlu1 %v812_v50, %s1622_s25  ;;  %928 = vrot.lane.b32.xlu2 %v1887_v26, %s1621_s24  ;;  %v750_v51 = vpack.c.bf16 %v729_v43, %v729_v43 }
  0xfd   : > { %v900_v58 = vunpack.c.l.b16 %v750_v51 }
  0xfe   : > { %v708_v28 = vpop.f32.mrf.mxu3  ;;  %834 = vmatpush.bf16.msrb.mxu0 %v1881_v9  ;;  %853 = vmatpush.bf16.msrb.mxu2 %v812_v50 }
  0xff   : > { %v682_v30 = vpop.f32.mrf.mxu1  ;;  %v709_v37 = vadd.f32 %v708_v28, %v680_v35 }
 0x100   : > { %v683_v36 = vadd.f32 %v682_v30, %v296_v33  ;;  %v1595_v33 = vld [vmem:[%s2077_s3 + $0x10] sm:$0xff] }
 0x101   : > { %930 = vrot.lane.b32.xlu0 %v814_v27, %s1621_s24  ;;  %v732_v42 = vmax.f32 %v709_v37, 0.0 }
 0x102   : > { %854 = vmatpush.bf16.msrb.mxu2 %v1852_v18  ;;  %835 = vmatpush.bf16.msrb.mxu0 %v1850_v17 }
 0x103   : > { %1140 = vrot.lane.b32.xlu1 %v812_v50, %s1623_s7  ;;  %1146 = vrot.lane.b32.xlu2 %v814_v27, %s1623_s7  ;;  %v752_v48 = vpack.c.bf16 %v732_v42, %v732_v42 }
 0x105   : > { %v901_v56 = vunpack.c.l.b16 %v752_v48 }
 0x106   : > { %v711_v29 = vpop.f32.mrf.mxu3  ;;  %836 = vmatpush.bf16.msrb.mxu0 %v1837_v0  ;;  %855 = vmatpush.bf16.msrb.mxu2 %v1828_v47 }
 0x107   : > { %v684_v38 = vpop.f32.mrf.mxu1  ;;  %v712_v40 = vadd.f32 %v711_v29, %v683_v36  ;;  %v907_v1 = vpack.c.b16 %v901_v56, %v900_v58 }
 0x108   : > { %v685_v45 = vadd.f32 %v684_v38, %v299_v41 }
 0x109   : > { %1038 = vrot.lane.b32.xlu0 %v814_v27, %s1622_s25  ;;  %v735_v44 = vmax.f32 %v712_v40, 0.0  ;;  %v1596_v40 = vld [vmem:[%s2077_s3 + $0x18] sm:$0xff] }
 0x10b   : > { %v754_v52 = vpack.c.bf16 %v735_v44, %v735_v44 }
 0x10d   : > { %v902_v59 = vunpack.c.l.b16 %v754_v52 }
 0x10e   : > { %v713_v46 = vpop.f32.mrf.mxu3 }
 0x10f   : > { %v714_v49 = vadd.f32 %v713_v46, %v685_v45  ;;  %v687_v50 = vpop.f32.mrf.mxu1 }
 0x110   : > { %v688_v61 = vadd.f32 %v687_v50, %v302_v55 }
 0x111   : > { %v738_v53 = vmax.f32 %v714_v49, 0.0  ;;  %1036 = vrot.lane.b32.xlu0 %v1887_v26, %s1622_s25 }
 0x113   : > { %v756_v57 = vpack.c.bf16 %v738_v53, %v738_v53 }
 0x115   : > { %v903_v60 = vunpack.c.l.b16 %v756_v57 }
 0x116   : > { %v716_v63 = vpop.f32.mrf.mxu3 }
 0x117   : > { %v908_v2 = vpack.c.b16 %v903_v60, %v902_v59  ;;  %v717_v3 = vadd.f32 %v716_v63, %v688_v61  ;;  %v689_v5 = vpop.f32.mrf.mxu1 }
 0x118   : > { %v690_v7 = vadd.f32 %v689_v5, %v305_v4 }
 0x119   : > { %920 = vrot.lane.b32.xlu0 %v907_v1, %s1621_s24  ;;  %926 = vrot.lane.b32.xlu1 %v908_v2, %s1621_s24  ;;  %v741_v6 = vmax.f32 %v717_v3, 0.0 }
 0x11a   : > { %1034 = vrot.lane.b32.xlu2 %v908_v2, %s1622_s25 }
 0x11b   : > { %v758_v11 = vpack.c.bf16 %v741_v6, %v741_v6 }
 0x11d   : > { %v904_v13 = vunpack.c.l.b16 %v758_v11 }
 0x11e   : > { %v718_v8 = vpop.f32.mrf.mxu3 }
 0x11f   : > { %v719_v10 = vadd.f32 %v718_v8, %v690_v7 }
 0x121   : > { %v744_v54 = vmax.f32 %v719_v10, 0.0  ;;  %1028 = vrot.lane.b32.xlu1 %v907_v1, %s1622_s25  ;;  %v1598_v10 = vld [vmem:[%s2077_s3 + $0x28] sm:$0xff] }
 0x122   : > { %1142 = vrot.lane.b32.xlu2 %v908_v2, %s1623_s7 }
 0x123   : > { %v760_v12 = vpack.c.bf16 %v744_v54, %v744_v54 }
 0x125   : > { %v905_v62 = vunpack.c.l.b16 %v760_v12 }
 0x127   : > { %v909_v14 = vpack.c.b16 %v905_v62, %v904_v13  ;;  %v1599_v62 = vld [vmem:[%s2077_s3 + $0x30] sm:$0xff] }
 0x129   : > { %932 = vrot.lane.b32.xlu0 %v909_v14, %s1621_s24  ;;  %1134 = vrot.lane.b32.xlu1 %v1852_v18, %s1623_s7 }
 0x12a   : > { %1144 = vrot.lane.b32.xlu2 %v1887_v26, %s1623_s7 }
 0x131   : > { %1026 = vrot.lane.b32.xlu0 %v1852_v18, %s1622_s25  ;;  %1040 = vrot.lane.b32.xlu1 %v909_v14, %s1622_s25  ;;  %v1950_v18 = vpop.permute.xlu2 %912 }
 0x132   : > { %1136 = vrot.lane.b32.xlu2 %v907_v1, %s1623_s7  ;;  %v1597_v1 = vld [vmem:[%s2077_s3 + $0x20] sm:$0xff] }
 0x139   : > { %1030 = vrot.lane.b32.xlu0 %v1881_v9, %s1622_s25  ;;  %1022 = vrot.lane.b32.xlu1 %v1885_v25, %s1622_s25 }
 0x13a   : > { %1138 = vrot.lane.b32.xlu2 %v1881_v9, %s1623_s7  ;;  %v1593_v9 = vld [vmem:[%s2077_s3] sm:$0xff] }
 0x13b   : > { %1494 = vmatmul.msk.bf16.vlgmr.msrb.gmra.mxu0 %vm534_vm0, %v1593_v9  ;;  %1496 = vmatmul.msk.bf16.vlgmr.msrb.gmra.mxu2 %vm534_vm0, %v1593_v9 }
 0x141   : > { %1128 = vrot.lane.b32.xlu1 %v1828_v47, %s1623_s7  ;;  %1020 = vrot.lane.b32.xlu0 %v1828_v47, %s1622_s25  ;;  %v911_v47 = vpop.permute.xlu2 %910 }
 0x142   : > { %1130 = vrot.lane.b32.xlu2 %v1885_v25, %s1623_s7  ;;  %v935_v32 = vsel %vm934_vm1, %v911_v47, %v1950_v18 }
 0x149   : > { %1148 = vrot.lane.b32.xlu0 %v909_v14, %s1623_s7  ;;  %1018 = vrot.lane.b32.xlu1 %v1837_v0, %s1622_s25  ;;  %v919_v16 = vpop.permute.xlu2 %918 }
 0x14a   : > { %1126 = vrot.lane.b32.xlu2 %v1837_v0, %s1623_s7  ;;  %v1594_v0 = vld [vmem:[%s2077_s3 + $0x8] sm:$0xff] }
 0x14b   : > { %1495 = vmatmul.msk.bf16.gmra.mxu0 %vm534_vm0, %v1594_v0  ;;  %1497 = vmatmul.msk.bf16.gmra.mxu2 %vm534_vm0, %v1594_v0 }
 0x14c   : > { %v917_v15 = vpop.permute.xlu1 %916 }
 0x14d   : > { %v937_v31 = vsel %vm934_vm1, %v917_v15, %v919_v16 }
 0x151   : > { %1024 = vrot.lane.b32.xlu0 %v1850_v17, %s1622_s25 }
 0x155   : > { %v929_v19 = vpop.permute.xlu2 %928 }
 0x159   : > { %1132 = vrot.lane.b32.xlu0 %v1850_v17, %s1623_s7 }
 0x15c   : > { %v925_v20 = vpop.permute.xlu1 %924 }
 0x15d   : > { %v1971_v22 = vpop.permute.xlu2 %1146 }
 0x164   : > { %v923_v23 = vpop.permute.xlu1 %922 }
 0x165   : > { %v939_v26 = vsel %vm934_vm1, %v923_v23, %v925_v20 }
 0x16b   : > { %v915_v21 = vpop.permute.xlu0 %914 }
 0x16c   : > { %v936_v55 = vsel %vm934_vm1, %v1950_v18, %v915_v21 }
 0x16d   : > { %v1033_v27 = vpop.permute.xlu1 %1032 }
 0x173   : > { %v931_v24 = vpop.permute.xlu0 %930 }
 0x174   : > { %v941_v17 = vsel %vm934_vm1, %v929_v19, %v931_v24  ;;  %v1035_v25 = vpop.permute.xlu2 %1034 }
 0x175   : > { %961 = vmatpush.bf16.msra.mxu0 %v941_v17  ;;  %v1141_v34 = vpop.permute.xlu1 %1140  ;;  %v1048_v56 = vsel %vm1042_vm2, %v1033_v27, %v1035_v25 }
 0x179   : > { %962 = vmatpush.bf16.msra.mxu0 %v939_v26 }
 0x17b   : > { %v1039_v28 = vpop.permute.xlu0 %1038 }
 0x17c   : > { %v1143_v30 = vpop.permute.xlu2 %1142 }
 0x17d   : > { %963 = vmatpush.bf16.msra.mxu0 %v937_v31  ;;  %v1156_v5 = vsel %vm1150_vm3, %v1141_v34, %v1143_v30 }
 0x181   : > { %964 = vmatpush.bf16.msra.mxu0 %v935_v32  ;;  %v761_v32 = vld [vmem:[%s2078_s4] sm:$0xff] }
 0x183   : > { %v1037_v35 = vpop.permute.xlu0 %1036 }
 0x184   : > { %v1049_v36 = vsel %vm1042_vm2, %v1037_v35, %v1039_v28  ;;  %v1145_v29 = vpop.permute.xlu2 %1144  ;;  %1510 = vmatmul.msk.bf16.vlgmr.msra.gmra.mxu0 %vm534_vm0, %v1595_v33 }
 0x185   : > { %v1157_v37 = vsel %vm1150_vm3, %v1145_v29, %v1971_v22  ;;  %1069 = vmatpush.bf16.msra.mxu1 %v1049_v36 }
 0x186   : > { %1177 = vmatpush.bf16.msrb.mxu0 %v1157_v37 }
 0x18b   : > { %v927_v38 = vpop.permute.xlu1 %926  ;;  %v921_v41 = vpop.permute.xlu0 %920 }
 0x18c   : > { %v1137_v39 = vpop.permute.xlu2 %1136  ;;  %v940_v49 = vsel %vm934_vm1, %v925_v20, %v927_v38  ;;  %v938_v53 = vsel %vm934_vm1, %v919_v16, %v921_v41  ;;  %v1600_v16 = vld [vmem:[%s2077_s3 + $0x38] sm:$0xff]  ;;  %v763_v41 = vld [vmem:[%s2078_s4 + $0x10] sm:$0xff] }
 0x193   : > { %v1029_v42 = vpop.permute.xlu1 %1028 }
 0x194   : > { %v1139_v43 = vpop.permute.xlu2 %1138  ;;  %1511 = vmatmul.msk.bf16.gmra.mxu0 %vm534_vm0, %v1596_v40 }
 0x195   : > { %v1155_v44 = vsel %vm1150_vm3, %v1139_v43, %v1141_v34 }
 0x196   : > { %1178 = vmatpush.bf16.msrb.mxu0 %v1155_v44 }
 0x19b   : > { %v933_v45 = vpop.permute.xlu0 %932  ;;  %v1135_v46 = vpop.permute.xlu1 %1134 }
 0x19c   : > { %v942_v48 = vsel %vm934_vm1, %v931_v24, %v933_v45  ;;  %v1154_v8 = vsel %vm1150_vm3, %v1135_v46, %v1137_v39  ;;  %v1131_v11 = vpop.permute.xlu2 %1130 }
 0x19d   : > { %980 = vmatpush.bf16.msra.mxu2 %v942_v48 }
 0x1a1   : > { %981 = vmatpush.bf16.msra.mxu2 %v940_v49 }
 0x1a3   : > { %v1027_v50 = vpop.permute.xlu0 %1026  ;;  %v1041_v51 = vpop.permute.xlu1 %1040 }
 0x1a4   : > { %v1050_v52 = vsel %vm1042_vm2, %v1039_v28, %v1041_v51  ;;  %v1046_v59 = vsel %vm1042_vm2, %v1027_v50, %v1029_v42  ;;  %v1127_v9 = vpop.permute.xlu2 %1126  ;;  %v764_v42 = vld [vmem:[%s2078_s4 + $0x18] sm:$0xff] }
 0x1a5   : > { %982 = vmatpush.bf16.msra.mxu2 %v938_v53  ;;  %1088 = vmatpush.bf16.msra.mxu3 %v1050_v52 }
 0x1a9   : > { %983 = vmatpush.bf16.msra.mxu2 %v936_v55  ;;  %1089 = vmatpush.bf16.msra.mxu3 %v1048_v56 }
 0x1ab   : > { %v1031_v57 = vpop.permute.xlu0 %1030  ;;  %v1023_v60 = vpop.permute.xlu1 %1022 }
 0x1ac   : > { %1512 = vmatmul.msk.bf16.vlgmr.msra.gmra.mxu2 %vm534_vm0, %v1595_v33  ;;  %v1047_v58 = vsel %vm1042_vm2, %v1031_v57, %v1033_v27  ;;  %v762_v33 = vld [vmem:[%s2078_s4 + $0x8] sm:$0xff] }
 0x1ad   : > { %1070 = vmatpush.bf16.msra.mxu1 %v1047_v58  ;;  %1090 = vmatpush.bf16.msra.mxu3 %v1046_v59 }
 0x1b3   : > { %v1021_v61 = vpop.permute.xlu0 %1020  ;;  %v1129_v2 = vpop.permute.xlu1 %1128 }
 0x1b4   : > { %v1044_v63 = vsel %vm1042_vm2, %v1021_v61, %v1023_v60  ;;  %v1152_v13 = vsel %vm1150_vm3, %v1129_v2, %v1131_v11  ;;  %v1151_v47 = vsel %vm1150_vm3, %v1127_v9, %v1129_v2  ;;  %v765_v60 = vld [vmem:[%s2078_s4 + $0x20] sm:$0xff] }
 0x1b5   : > { %1091 = vmatpush.bf16.msra.mxu3 %v1044_v63 }
 0x1b8   : > { %1528 = vmatmul.msk.bf16.vlgmr.msra.gmra.mxu3 %vm534_vm0, %v1597_v1  ;;  %v838_v15 = vpop.f32.mrf.mxu0 }
 0x1b9   : > { %v867_v29 = vadd.f32 %v838_v15, %v761_v32 }
 0x1bb   : > { %v1149_v3 = vpop.permute.xlu0 %1148  ;;  %v1019_v54 = vpop.permute.xlu1 %1018 }
 0x1bc   : > { %v1158_v4 = vsel %vm1150_vm3, %v1971_v22, %v1149_v3  ;;  %1513 = vmatmul.msk.bf16.gmra.mxu2 %vm534_vm0, %v1596_v40  ;;  %v1043_v12 = vsel %vm1042_vm2, %v1019_v54, %v1021_v61  ;;  %v766_v61 = vld [vmem:[%s2078_s4 + $0x28] sm:$0xff] }
 0x1bd   : > { %1196 = vmatpush.bf16.msrb.mxu2 %v1158_v4 }
 0x1be   : > { %v857_v0 = vpop.f32.mrf.mxu2 }
 0x1bf   : > { %v868_v37 = vadd.f32 %v857_v0, %v762_v33 }
 0x1c0   : > { %v840_v19 = vpop.f32.mrf.mxu0 }
 0x1c1   : > { %1197 = vmatpush.bf16.msrb.mxu2 %v1156_v5 }
 0x1c3   : > { %v1025_v6 = vpop.permute.xlu0 %1024 }
 0x1c4   : > { %v1045_v7 = vsel %vm1042_vm2, %v1025_v6, %v1027_v50  ;;  %v869_v50 = vadd.f32 %v840_v19, %v763_v41 }
 0x1c5   : > { %1071 = vmatpush.bf16.msra.mxu1 %v1045_v7  ;;  %1198 = vmatpush.bf16.msrb.mxu2 %v1154_v8 }
 0x1c6   : > { %v859_v20 = vpop.f32.mrf.mxu2 }
 0x1c7   : > { %v870_v51 = vadd.f32 %v859_v20, %v764_v42 }
 0x1c8   : > { %1529 = vmatmul.msk.bf16.gmra.mxu3 %vm534_vm0, %v1598_v10  ;;  %v843_v21 = vpop.f32.mrf.mxu0 }
 0x1c9   : > { %1072 = vmatpush.bf16.msra.mxu1 %v1043_v12  ;;  %1199 = vmatpush.bf16.msrb.mxu2 %v1152_v13  ;;  %v871_v5 = vadd.f32 %v843_v21, %v765_v60 }
 0x1cb   : > { %v1133_v14 = vpop.permute.xlu0 %1132 }
 0x1cc   : > { %1526 = vmatmul.msk.bf16.vlgmr.msra.gmra.mxu1 %vm534_vm0, %v1597_v1  ;;  %1544 = vmatmul.msk.bf16.vlgmr.msrb.gmra.mxu2 %vm534_vm0, %v1599_v62  ;;  %v1153_v18 = vsel %vm1150_vm3, %v1133_v14, %v1135_v46  ;;  %v767_v14 = vld [vmem:[%s2078_s4 + $0x30] sm:$0xff] }
 0x1cd   : > { %1179 = vmatpush.bf16.msrb.mxu0 %v1153_v18  ;;  %v768_v18 = vld [vmem:[%s2078_s4 + $0x38] sm:$0xff] }
 0x1ce   : > { %v862_v22 = vpop.f32.mrf.mxu2 }
 0x1cf   : > { %v872_v6 = vadd.f32 %v862_v22, %v766_v61 }
 0x1d0   : > { %v2031_v23 = vpop.f32.mrf.mxu0 }
 0x1d1   : > { %1180 = vmatpush.bf16.msrb.mxu0 %v1151_v47  ;;  %v873_v0 = vadd.f32 %v2031_v23, %v767_v14 }
 0x1d4   : > { %1542 = vmatmul.msk.bf16.vlgmr.msrb.gmra.mxu0 %vm534_vm0, %v1599_v62 }
 0x1d6   : > { %v2033_v24 = vpop.f32.mrf.mxu2 }
 0x1d7   : > { %v874_v19 = vadd.f32 %v2033_v24, %v768_v18 }
 0x1dc   : > { %1527 = vmatmul.msk.bf16.gmra.mxu1 %vm534_vm0, %v1598_v10  ;;  %1545 = vmatmul.msk.bf16.gmra.mxu2 %vm534_vm0, %v1600_v16 }
 0x1e4   : > { %1543 = vmatmul.msk.bf16.gmra.mxu0 %vm534_vm0, %v1600_v16 }
 0x201   : > { %v966_v17 = vpop.f32.mrf.mxu0 }
 0x202   : > { %v995_v39 = vadd.f32 %v966_v17, %v867_v29 }
 0x209   : > { %v968_v26 = vpop.f32.mrf.mxu0 }
 0x20a   : > { %v997_v57 = vadd.f32 %v968_v26, %v869_v50 }
 0x211   : > { %v971_v28 = vpop.f32.mrf.mxu0 }
 0x212   : > { %v999_v12 = vadd.f32 %v971_v28, %v871_v5 }
 0x219   : > { %v973_v35 = vpop.f32.mrf.mxu0 }
 0x22f   : > { %v985_v25 = vpop.f32.mrf.mxu2 }
 0x230   : > { %v996_v38 = vadd.f32 %v985_v25, %v868_v37 }
 0x237   : > { %v987_v27 = vpop.f32.mrf.mxu2 }
 0x238   : > { %v998_v53 = vadd.f32 %v987_v27, %v870_v51  ;;  %v1001_v27 = vadd.f32 %v973_v35, %v873_v0 }
 0x23b   : > { %v1093_v31 = vpop.f32.mrf.mxu3 }
 0x23c   : > { %v1104_v40 = vadd.f32 %v1093_v31, %v996_v38 }
 0x23f   : > { %v990_v30 = vpop.f32.mrf.mxu2 }
 0x240   : > { %v1000_v10 = vadd.f32 %v990_v30, %v872_v6 }
 0x243   : > { %v1095_v43 = vpop.f32.mrf.mxu3 }
 0x244   : > { %v1106_v58 = vadd.f32 %v1095_v43, %v998_v53 }
 0x247   : > { %v992_v34 = vpop.f32.mrf.mxu2 }
 0x248   : > { %v1002_v22 = vadd.f32 %v992_v34, %v874_v19 }
 0x249   : > { %v1074_v36 = vpop.f32.mrf.mxu1 }
 0x24a   : > { %v1103_v45 = vadd.f32 %v1074_v36, %v995_v39 }
 0x24b   : > { %v1098_v3 = vpop.f32.mrf.mxu3 }
 0x24c   : > { %v1108_v13 = vadd.f32 %v1098_v3, %v1000_v10 }
 0x24f   : > { %v1201_v44 = vpop.f32.mrf.mxu2 }
 0x250   : > { %v1212_v46 = vadd.f32 %v1201_v44, %v1104_v40 }
 0x251   : > { %v1076_v48 = vpop.f32.mrf.mxu1  ;;  %v1182_v49 = vpop.f32.mrf.mxu0 }
 0x252   : > { %v1211_v52 = vadd.f32 %v1182_v49, %v1103_v45  ;;  %v1220_v55 = vmax.f32 %v1212_v46, 0.0  ;;  %v1105_v1 = vadd.f32 %v1076_v48, %v997_v57 }
 0x253   : > { %v1100_v21 = vpop.f32.mrf.mxu3 }
 0x254   : > { %v1219_v56 = vmax.f32 %v1211_v52, 0.0  ;;  %v1110_v28 = vadd.f32 %v1100_v21, %v1002_v22 }
 0x256   : > { %v1227_v59 = vpack.c.bf16 %v1220_v55, %v1219_v56 }
 0x257   : > { %v1203_v63 = vpop.f32.mrf.mxu2 }
 0x258   : > { %1231 = vst [vmem:[%s2051_s17] sm:$0xff] %v1227_v59  ;;  %v1214_v2 = vadd.f32 %v1203_v63, %v1106_v58 }
 0x259   : > { %v1184_v4 = vpop.f32.mrf.mxu0  ;;  %v1079_v8 = vpop.f32.mrf.mxu1 }
 0x25a   : > { %v1213_v7 = vadd.f32 %v1184_v4, %v1105_v1  ;;  %v1222_v11 = vmax.f32 %v1214_v2, 0.0  ;;  %v1107_v47 = vadd.f32 %v1079_v8, %v999_v12 }
 0x25c   : > { %v1221_v54 = vmax.f32 %v1213_v7, 0.0 }
 0x25e   : > { %v1228_v62 = vpack.c.bf16 %v1222_v11, %v1221_v54 }
 0x25f   : > { %v1206_v9 = vpop.f32.mrf.mxu2 }
 0x260   : > { %1232 = vst [vmem:[%s2051_s17 + $0x8] sm:$0xff] %v1228_v62  ;;  %v1216_v16 = vadd.f32 %v1206_v9, %v1108_v13 }
 0x261   : > { %v1187_v15 = vpop.f32.mrf.mxu0  ;;  %v1081_v26 = vpop.f32.mrf.mxu1 }
 0x262   : > { %v1215_v20 = vadd.f32 %v1187_v15, %v1107_v47  ;;  %v1224_v17 = vmax.f32 %v1216_v16, 0.0  ;;  %v1109_v32 = vadd.f32 %v1081_v26, %v1001_v27 }
 0x264   : > { %v1223_v25 = vmax.f32 %v1215_v20, 0.0 }
 0x266   : > { %v1229_v30 = vpack.c.bf16 %v1224_v17, %v1223_v25 }
 0x267   : > { %v1208_v31 = vpop.f32.mrf.mxu2 }
 0x268   : > { %1233 = vst [vmem:[%s2051_s17 + $0x10] sm:$0xff] %v1229_v30  ;;  %v1218_v33 = vadd.f32 %v1208_v31, %v1110_v28 }
 0x269   : > { %v1189_v36 = vpop.f32.mrf.mxu0 }
 0x26a   : > { %v1217_v29 = vadd.f32 %v1189_v36, %v1109_v32  ;;  %v1226_v37 = vmax.f32 %v1218_v33, 0.0 }
 0x26c   : > { %v1225_v23 = vmax.f32 %v1217_v29, 0.0 }
 0x26e   : > { %v1230_v38 = vpack.c.bf16 %v1226_v37, %v1225_v23 }
 0x270   : > { %1234 = vst [vmem:[%s2051_s17 + $0x18] sm:$0xff] %v1230_v38 }
 0x271 PF: > { %s15_s18 = sadd.s32 1, %s1619_s18  }
 0x272   : > { %p12_p4 = scmp.ge.s32.totalorder %s15_s18, 4  }
 0x274   :  { %14 = sbr.rel (!%p12_p4) target bundleno = 1 (0x1), region = 73 }

// kernel: perception_forward.3
= control target key start
LH: loop header
LB: loop body
LE: loop exit
PB: predicated region body
PF: predicated region fallthrough
CT: control target
= control target key end

     0   :  { %s9324_s0 = inlined_call_operand.vmem [shape: bf16[2,8192], index: 0, kind: input, shape index: {}]   ;;  %s9325_s1 = inlined_call_operand.vmem [shape: bf16[8192,128], index: 1, kind: input, shape index: {}]   ;;  %s9326_s2 = inlined_call_operand.vmem [shape: f32[1,128], index: 2, kind: input, shape index: {}]   ;;  %s9327_s3 = inlined_call_operand.hbm [shape: f32[2,128], index: 3, kind: output, shape index: {}]  }
   0x1   :  { %v7189_v0 = vld [vmem:[%s9325_s1 + $0x38] sm:$0xff]  ;;  %v7188_v4 = vld [vmem:[%s9325_s1 + $0x30] sm:$0xff]  ;;  %v7187_v8 = vld [vmem:[%s9325_s1 + $0x28] sm:$0xff] }
   0x2   :  { %v7197_v1 = vld [vmem:[%s9325_s1 + $0x78] sm:$0xff]  ;;  %4263 = vmatpush.bf16.msra.mxu0 %v7189_v0  ;;  %v7196_v5 = vld [vmem:[%s9325_s1 + $0x70] sm:$0xff]  ;;  %v7195_v9 = vld [vmem:[%s9325_s1 + $0x68] sm:$0xff] }
   0x3   :  { %v7205_v2 = vld [vmem:[%s9325_s1 + $0xb8] sm:$0xff]  ;;  %4276 = vmatpush.bf16.msra.mxu1 %v7197_v1  ;;  %v7204_v6 = vld [vmem:[%s9325_s1 + $0xb0] sm:$0xff]  ;;  %v7203_v10 = vld [vmem:[%s9325_s1 + $0xa8] sm:$0xff] }
   0x4   :  { %v7213_v3 = vld [vmem:[%s9325_s1 + $0xf8] sm:$0xff]  ;;  %4289 = vmatpush.bf16.msra.mxu2 %v7205_v2  ;;  %v7212_v7 = vld [vmem:[%s9325_s1 + $0xf0] sm:$0xff]  ;;  %v7211_v11 = vld [vmem:[%s9325_s1 + $0xe8] sm:$0xff] }
   0x5   :  { %4302 = vmatpush.bf16.msra.mxu3 %v7213_v3  ;;  %v7186_v12 = vld [vmem:[%s9325_s1 + $0x20] sm:$0xff]  ;;  %v7185_v16 = vld [vmem:[%s9325_s1 + $0x18] sm:$0xff]  ;;  %v7184_v20 = vld [vmem:[%s9325_s1 + $0x10] sm:$0xff] }
   0x6   :  { %4264 = vmatpush.bf16.msra.mxu0 %v7188_v4  ;;  %v7194_v13 = vld [vmem:[%s9325_s1 + $0x60] sm:$0xff]  ;;  %v7193_v17 = vld [vmem:[%s9325_s1 + $0x58] sm:$0xff]  ;;  %v7192_v21 = vld [vmem:[%s9325_s1 + $0x50] sm:$0xff] }
   0x7   :  { %4277 = vmatpush.bf16.msra.mxu1 %v7196_v5  ;;  %v7202_v14 = vld [vmem:[%s9325_s1 + $0xa0] sm:$0xff]  ;;  %v7201_v18 = vld [vmem:[%s9325_s1 + $0x98] sm:$0xff] }
   0x8   :  { %4290 = vmatpush.bf16.msra.mxu2 %v7204_v6  ;;  %v7210_v15 = vld [vmem:[%s9325_s1 + $0xe0] sm:$0xff]  ;;  %v7209_v19 = vld [vmem:[%s9325_s1 + $0xd8] sm:$0xff] }
   0x9   :  { %4303 = vmatpush.bf16.msra.mxu3 %v7212_v7  ;;  %v15_v22 = vld [vmem:[%s9324_s0] sm:$0xff] }
   0xa   :  { %4265 = vmatpush.bf16.msra.mxu0 %v7187_v8  ;;  %1048 = vst [vmem:[#allocation1] ss:$9 sm:$0xff] %v15_v22 }
   0xb   :  { %4278 = vmatpush.bf16.msra.mxu1 %v7195_v9 }
   0xc   :  { %4291 = vmatpush.bf16.msra.mxu2 %v7203_v10 }
   0xd   :  { %4304 = vmatpush.bf16.msra.mxu3 %v7211_v11 }
   0xe   :  { %4266 = vmatpush.bf16.msra.mxu0 %v7186_v12 }
   0xf   :  { %4279 = vmatpush.bf16.msra.mxu1 %v7194_v13 }
  0x10   :  { %4292 = vmatpush.bf16.msra.mxu2 %v7202_v14 }
  0x11   :  { %4305 = vmatpush.bf16.msra.mxu3 %v7210_v15 }
  0x12   :  { %4267 = vmatpush.bf16.msra.mxu0 %v7185_v16 }
  0x13   :  { %4280 = vmatpush.bf16.msra.mxu1 %v7193_v17 }
  0x14   :  { %8 = vsyncpa [#allocation3], 0  ;;  %4293 = vmatpush.bf16.msra.mxu2 %v7201_v18  ;;  %v7200_v23 = vld [vmem:[%s9325_s1 + $0x90] sm:$0xff]  ;;  %v7183_v25 = vld [vmem:[%s9325_s1 + $0x8] sm:$0xff]  ;;  %s7722_s22 = smov [#allocation2]   ;;  %s5125_s26 = sshll.u32 %s9327_s3, 4  ;;  %s5126_s26 = int_to_ptr.hbm [resolvable:$true] %s5125_s26 }
  0x15   :  { %4306 = vmatpush.bf16.msra.mxu3 %v7209_v19  ;;  %v7208_v24 = vld [vmem:[%s9325_s1 + $0xd0] sm:$0xff]  ;;  %v7191_v26 = vld [vmem:[%s9325_s1 + $0x48] sm:$0xff]  ;;  %v7182_v29 = vld [vmem:[%s9325_s1] sm:$0xff]  ;;  %s5123_s23 = sshll.u32 %s7722_s22, 4  ;;  %s5124_s23 = int_to_ptr.vmem [resolvable:$true] %s5123_s23 }
  0x16   :  { %4268 = vmatpush.bf16.msra.mxu0 %v7184_v20  ;;  %v7199_v27 = vld [vmem:[%s9325_s1 + $0x88] sm:$0xff]  ;;  %v7190_v30 = vld [vmem:[%s9325_s1 + $0x40] sm:$0xff]  ;;  %v7221_v33 = vld [vmem:[%s9325_s1 + $0x138] sm:$0xff] }
  0x17   :  { %4281 = vmatpush.bf16.msra.mxu1 %v7192_v21  ;;  %v7207_v28 = vld [vmem:[%s9325_s1 + $0xc8] sm:$0xff]  ;;  %v7198_v31 = vld [vmem:[%s9325_s1 + $0x80] sm:$0xff]  ;;  %v7229_v34 = vld [vmem:[%s9325_s1 + $0x178] sm:$0xff] }
  0x18   :  { %4294 = vmatpush.bf16.msra.mxu2 %v7200_v23  ;;  %v7206_v32 = vld [vmem:[%s9325_s1 + $0xc0] sm:$0xff]  ;;  %v7237_v35 = vld [vmem:[%s9325_s1 + $0x1b8] sm:$0xff]  ;;  %v7220_v37 = vld [vmem:[%s9325_s1 + $0x130] sm:$0xff] }
  0x19   :  { %4307 = vmatpush.bf16.msra.mxu3 %v7208_v24  ;;  %v7245_v36 = vld [vmem:[%s9325_s1 + $0x1f8] sm:$0xff]  ;;  %v1049_v39 = vld [vmem:[#allocation1] sm:$0xff]  ;;  %v7228_v40 = vld [vmem:[%s9325_s1 + $0x170] sm:$0xff] }
  0x1a   :  { %4269 = vmatpush.bf16.msra.mxu0 %v7183_v25  ;;  %v1051_v38 = vld [vmem:[#allocation1 + $0x12] sm:$0xff]  ;;  %v1052_v41 = vld [vmem:[#allocation1 + $0x1b] sm:$0xff]  ;;  %v1050_v42 = vld [vmem:[#allocation1 + $0x9] sm:$0xff] }
  0x1b   :  { %4282 = vmatpush.bf16.msra.mxu1 %v7191_v26  ;;  %v7236_v43 = vld [vmem:[%s9325_s1 + $0x1b0] sm:$0xff]  ;;  %v7219_v45 = vld [vmem:[%s9325_s1 + $0x128] sm:$0xff]  ;;  %v1056_v51 = vld [vmem:[#allocation1 + $0x3f] sm:$0xff] }
  0x1c   :  { %4295 = vmatpush.bf16.msra.mxu2 %v7199_v27  ;;  %v7244_v44 = vld [vmem:[%s9325_s1 + $0x1f0] sm:$0xff]  ;;  %v7227_v46 = vld [vmem:[%s9325_s1 + $0x168] sm:$0xff]  ;;  %v7218_v54 = vld [vmem:[%s9325_s1 + $0x120] sm:$0xff] }
  0x1d   :  { %4308 = vmatpush.bf16.msra.mxu3 %v7207_v28  ;;  %v7235_v47 = vld [vmem:[%s9325_s1 + $0x1a8] sm:$0xff]  ;;  %v1055_v49 = vld [vmem:[#allocation1 + $0x36] sm:$0xff]  ;;  %v7226_v55 = vld [vmem:[%s9325_s1 + $0x160] sm:$0xff] }
  0x1e   :  { %4270 = vmatpush.bf16.msra.mxu0 %v7182_v29  ;;  %v7243_v48 = vld [vmem:[%s9325_s1 + $0x1e8] sm:$0xff]  ;;  %v7234_v56 = vld [vmem:[%s9325_s1 + $0x1a0] sm:$0xff]  ;;  %v7217_v58 = vld [vmem:[%s9325_s1 + $0x118] sm:$0xff] }
  0x1f   :  { %4283 = vmatpush.bf16.msra.mxu1 %v7190_v30  ;;  %v1053_v50 = vld [vmem:[#allocation1 + $0x24] sm:$0xff]  ;;  %v1054_v53 = vld [vmem:[#allocation1 + $0x2d] sm:$0xff]  ;;  %v7225_v59 = vld [vmem:[%s9325_s1 + $0x158] sm:$0xff] }
  0x20   :  { %4296 = vmatpush.bf16.msra.mxu2 %v7198_v31  ;;  %v16_v52 = vld [vmem:[%s9324_s0 + $0x8] sm:$0xff]  ;;  %v7242_v57 = vld [vmem:[%s9325_s1 + $0x1e0] sm:$0xff]  ;;  %v7233_v60 = vld [vmem:[%s9325_s1 + $0x198] sm:$0xff] }
  0x21   :  { %4309 = vmatpush.bf16.msra.mxu3 %v7206_v32  ;;  %4271 = vmatmul.bf16.vlgmr.msra.gmra.mxu0 %v1049_v39  ;;  %1058 = vst [vmem:[#allocation1] ss:$9 sm:$0xff] %v16_v52  ;;  %v7241_v61 = vld [vmem:[%s9325_s1 + $0x1d8] sm:$0xff]  ;;  %v7216_v62 = vld [vmem:[%s9325_s1 + $0x110] sm:$0xff]  ;;  %v7215_v2 = vld [vmem:[%s9325_s1 + $0x108] sm:$0xff] }
  0x22   :  { %4315 = vmatpush.bf16.msrb.mxu0 %v7221_v33  ;;  %4284 = vmatmul.bf16.vlgmr.msra.gmra.mxu1 %v1050_v42  ;;  %v7224_v63 = vld [vmem:[%s9325_s1 + $0x150] sm:$0xff]  ;;  %v7223_v3 = vld [vmem:[%s9325_s1 + $0x148] sm:$0xff]  ;;  %v7214_v6 = vld [vmem:[%s9325_s1 + $0x100] sm:$0xff] }
  0x23   :  { %4328 = vmatpush.bf16.msrb.mxu1 %v7229_v34  ;;  %4297 = vmatmul.bf16.vlgmr.msra.gmra.mxu2 %v1051_v38  ;;  %v7232_v0 = vld [vmem:[%s9325_s1 + $0x190] sm:$0xff]  ;;  %v7231_v4 = vld [vmem:[%s9325_s1 + $0x188] sm:$0xff]  ;;  %v7222_v7 = vld [vmem:[%s9325_s1 + $0x140] sm:$0xff] }
  0x24   :  { %4341 = vmatpush.bf16.msrb.mxu2 %v7237_v35  ;;  %4310 = vmatmul.bf16.vlgmr.msra.gmra.mxu3 %v1052_v41  ;;  %v7240_v1 = vld [vmem:[%s9325_s1 + $0x1d0] sm:$0xff]  ;;  %v7239_v5 = vld [vmem:[%s9325_s1 + $0x1c8] sm:$0xff]  ;;  %v7230_v8 = vld [vmem:[%s9325_s1 + $0x180] sm:$0xff] }
  0x25   :  { %4354 = vmatpush.bf16.msrb.mxu3 %v7245_v36  ;;  %v7238_v9 = vld [vmem:[%s9325_s1 + $0x1c0] sm:$0xff]  ;;  %v7253_v10 = vld [vmem:[%s9325_s1 + $0x238] sm:$0xff]  ;;  %v7252_v14 = vld [vmem:[%s9325_s1 + $0x230] sm:$0xff] }
  0x26   :  { %4316 = vmatpush.bf16.msrb.mxu0 %v7220_v37  ;;  %v7261_v11 = vld [vmem:[%s9325_s1 + $0x278] sm:$0xff]  ;;  %v7260_v15 = vld [vmem:[%s9325_s1 + $0x270] sm:$0xff]  ;;  %v7251_v18 = vld [vmem:[%s9325_s1 + $0x228] sm:$0xff] }
  0x27   :  { %4329 = vmatpush.bf16.msrb.mxu1 %v7228_v40  ;;  %v7269_v12 = vld [vmem:[%s9325_s1 + $0x2b8] sm:$0xff]  ;;  %v7268_v16 = vld [vmem:[%s9325_s1 + $0x2b0] sm:$0xff]  ;;  %v7259_v19 = vld [vmem:[%s9325_s1 + $0x268] sm:$0xff] }
  0x28   :  { %4342 = vmatpush.bf16.msrb.mxu2 %v7236_v43  ;;  %v7277_v13 = vld [vmem:[%s9325_s1 + $0x2f8] sm:$0xff]  ;;  %v7276_v17 = vld [vmem:[%s9325_s1 + $0x2f0] sm:$0xff]  ;;  %v7267_v20 = vld [vmem:[%s9325_s1 + $0x2a8] sm:$0xff] }
  0x29   :  { %4355 = vmatpush.bf16.msrb.mxu3 %v7244_v44  ;;  %v7275_v21 = vld [vmem:[%s9325_s1 + $0x2e8] sm:$0xff]  ;;  %v7250_v22 = vld [vmem:[%s9325_s1 + $0x220] sm:$0xff]  ;;  %v7249_v26 = vld [vmem:[%s9325_s1 + $0x218] sm:$0xff] }
  0x2a   :  { %4317 = vmatpush.bf16.msrb.mxu0 %v7219_v45  ;;  %v7258_v23 = vld [vmem:[%s9325_s1 + $0x260] sm:$0xff]  ;;  %v7257_v27 = vld [vmem:[%s9325_s1 + $0x258] sm:$0xff]  ;;  %v7248_v30 = vld [vmem:[%s9325_s1 + $0x210] sm:$0xff] }
  0x2b   :  { %4330 = vmatpush.bf16.msrb.mxu1 %v7227_v46  ;;  %v7266_v24 = vld [vmem:[%s9325_s1 + $0x2a0] sm:$0xff]  ;;  %v7265_v28 = vld [vmem:[%s9325_s1 + $0x298] sm:$0xff]  ;;  %v7256_v31 = vld [vmem:[%s9325_s1 + $0x250] sm:$0xff] }
  0x2c   :  { %4343 = vmatpush.bf16.msrb.mxu2 %v7235_v47  ;;  %v7274_v25 = vld [vmem:[%s9325_s1 + $0x2e0] sm:$0xff]  ;;  %v7273_v29 = vld [vmem:[%s9325_s1 + $0x2d8] sm:$0xff]  ;;  %v7264_v32 = vld [vmem:[%s9325_s1 + $0x290] sm:$0xff] }
  0x2d   :  { %4356 = vmatpush.bf16.msrb.mxu3 %v7243_v48  ;;  %v7272_v33 = vld [vmem:[%s9325_s1 + $0x2d0] sm:$0xff]  ;;  %v7247_v34 = vld [vmem:[%s9325_s1 + $0x208] sm:$0xff]  ;;  %v7246_v38 = vld [vmem:[%s9325_s1 + $0x200] sm:$0xff] }
  0x2e   :  { %4318 = vmatpush.bf16.msrb.mxu0 %v7218_v54  ;;  %v7255_v35 = vld [vmem:[%s9325_s1 + $0x248] sm:$0xff]  ;;  %v7254_v39 = vld [vmem:[%s9325_s1 + $0x240] sm:$0xff]  ;;  %v7285_v42 = vld [vmem:[%s9325_s1 + $0x338] sm:$0xff] }
  0x2f   :  { %4331 = vmatpush.bf16.msrb.mxu1 %v7226_v55  ;;  %v7263_v36 = vld [vmem:[%s9325_s1 + $0x288] sm:$0xff]  ;;  %v7262_v40 = vld [vmem:[%s9325_s1 + $0x280] sm:$0xff]  ;;  %v7293_v43 = vld [vmem:[%s9325_s1 + $0x378] sm:$0xff] }
  0x30   :  { %4344 = vmatpush.bf16.msrb.mxu2 %v7234_v56  ;;  %v7271_v37 = vld [vmem:[%s9325_s1 + $0x2c8] sm:$0xff]  ;;  %v7270_v41 = vld [vmem:[%s9325_s1 + $0x2c0] sm:$0xff]  ;;  %v7301_v44 = vld [vmem:[%s9325_s1 + $0x3b8] sm:$0xff] }
  0x31   :  { %4357 = vmatpush.bf16.msrb.mxu3 %v7242_v57  ;;  %v7309_v45 = vld [vmem:[%s9325_s1 + $0x3f8] sm:$0xff]  ;;  %v1059_v46 = vld [vmem:[#allocation1] sm:$0xff]  ;;  %v1060_v48 = vld [vmem:[#allocation1 + $0x9] sm:$0xff] }
  0x32   :  { %4319 = vmatpush.bf16.msrb.mxu0 %v7217_v58  ;;  %v1061_v47 = vld [vmem:[#allocation1 + $0x12] sm:$0xff]  ;;  %v7283_v54 = vld [vmem:[%s9325_s1 + $0x328] sm:$0xff]  ;;  %v7282_v58 = vld [vmem:[%s9325_s1 + $0x320] sm:$0xff] }
  0x33   :  { %4332 = vmatpush.bf16.msrb.mxu1 %v7225_v59  ;;  %v7300_v52 = vld [vmem:[%s9325_s1 + $0x3b0] sm:$0xff]  ;;  %v7291_v55 = vld [vmem:[%s9325_s1 + $0x368] sm:$0xff]  ;;  %v7290_v59 = vld [vmem:[%s9325_s1 + $0x360] sm:$0xff] }
  0x34   :  { %4345 = vmatpush.bf16.msrb.mxu2 %v7233_v60  ;;  %v7299_v56 = vld [vmem:[%s9325_s1 + $0x3a8] sm:$0xff]  ;;  %v7298_v60 = vld [vmem:[%s9325_s1 + $0x3a0] sm:$0xff] }
  0x35   :  { %4358 = vmatpush.bf16.msrb.mxu3 %v7241_v61  ;;  %v7307_v57 = vld [vmem:[%s9325_s1 + $0x3e8] sm:$0xff]  ;;  %v7306_v61 = vld [vmem:[%s9325_s1 + $0x3e0] sm:$0xff] }
  0x36   :  { %4320 = vmatpush.bf16.msrb.mxu0 %v7216_v62  ;;  %v7281_v62 = vld [vmem:[%s9325_s1 + $0x318] sm:$0xff] }
  0x37   :  { %4333 = vmatpush.bf16.msrb.mxu1 %v7224_v63  ;;  %v7289_v63 = vld [vmem:[%s9325_s1 + $0x358] sm:$0xff] }
  0x38   :  { %4346 = vmatpush.bf16.msrb.mxu2 %v7232_v0  ;;  %v7297_v0 = vld [vmem:[%s9325_s1 + $0x398] sm:$0xff] }
  0x39   :  { %4359 = vmatpush.bf16.msrb.mxu3 %v7240_v1  ;;  %v7305_v1 = vld [vmem:[%s9325_s1 + $0x3d8] sm:$0xff] }
  0x3a   :  { %4321 = vmatpush.bf16.msrb.mxu0 %v7215_v2  ;;  %v7280_v2 = vld [vmem:[%s9325_s1 + $0x310] sm:$0xff] }
  0x3b   :  { %4334 = vmatpush.bf16.msrb.mxu1 %v7223_v3  ;;  %v7288_v3 = vld [vmem:[%s9325_s1 + $0x350] sm:$0xff] }
  0x3c   :  { %4347 = vmatpush.bf16.msrb.mxu2 %v7231_v4  ;;  %v7296_v4 = vld [vmem:[%s9325_s1 + $0x390] sm:$0xff] }
  0x3d   :  { %4360 = vmatpush.bf16.msrb.mxu3 %v7239_v5  ;;  %v7304_v5 = vld [vmem:[%s9325_s1 + $0x3d0] sm:$0xff] }
  0x3e   :  { %4322 = vmatpush.bf16.msrb.mxu0 %v7214_v6  ;;  %v7279_v6 = vld [vmem:[%s9325_s1 + $0x308] sm:$0xff] }
  0x3f   :  { %4335 = vmatpush.bf16.msrb.mxu1 %v7222_v7  ;;  %v7287_v7 = vld [vmem:[%s9325_s1 + $0x348] sm:$0xff] }
  0x40   :  { %4348 = vmatpush.bf16.msrb.mxu2 %v7230_v8  ;;  %v7295_v8 = vld [vmem:[%s9325_s1 + $0x388] sm:$0xff] }
  0x41   :  { %4361 = vmatpush.bf16.msrb.mxu3 %v7238_v9  ;;  %4323 = vmatmul.bf16.vlgmr.msrb.gmra.mxu0 %v1053_v50  ;;  %v7284_v50 = vld [vmem:[%s9325_s1 + $0x330] sm:$0xff]  ;;  %v7303_v9 = vld [vmem:[%s9325_s1 + $0x3c8] sm:$0xff] }
  0x42   :  { %4367 = vmatpush.bf16.msra.mxu0 %v7253_v10  ;;  %4336 = vmatmul.bf16.vlgmr.msrb.gmra.mxu1 %v1054_v53  ;;  %v7308_v53 = vld [vmem:[%s9325_s1 + $0x3f0] sm:$0xff]  ;;  %v1063_v10 = vld [vmem:[#allocation1 + $0x24] sm:$0xff] }
  0x43   :  { %4380 = vmatpush.bf16.msra.mxu1 %v7261_v11  ;;  %4349 = vmatmul.bf16.vlgmr.msrb.gmra.mxu2 %v1055_v49  ;;  %v1062_v49 = vld [vmem:[#allocation1 + $0x1b] sm:$0xff] }
  0x44   :  { %4393 = vmatpush.bf16.msra.mxu2 %v7269_v12  ;;  %4362 = vmatmul.bf16.vlgmr.msrb.gmra.mxu3 %v1056_v51  ;;  %v7292_v51 = vld [vmem:[%s9325_s1 + $0x370] sm:$0xff] }
  0x45   :  { %4406 = vmatpush.bf16.msra.mxu3 %v7277_v13  ;;  %v1065_v11 = vld [vmem:[#allocation1 + $0x36] sm:$0xff]  ;;  %v1064_v12 = vld [vmem:[#allocation1 + $0x2d] sm:$0xff]  ;;  %v1066_v13 = vld [vmem:[#allocation1 + $0x3f] sm:$0xff] }
  0x46   :  { %4368 = vmatpush.bf16.msra.mxu0 %v7252_v14  ;;  %v17_v14 = vld [vmem:[%s9324_s0 + $0x10] sm:$0xff] }
  0x47   :  { %4381 = vmatpush.bf16.msra.mxu1 %v7260_v15  ;;  %1068 = vst [vmem:[#allocation1] ss:$9 sm:$0xff] %v17_v14  ;;  %v7278_v15 = vld [vmem:[%s9325_s1 + $0x300] sm:$0xff] }
  0x48   :  { %4394 = vmatpush.bf16.msra.mxu2 %v7268_v16  ;;  %v7286_v16 = vld [vmem:[%s9325_s1 + $0x340] sm:$0xff] }
  0x49   :  { %4407 = vmatpush.bf16.msra.mxu3 %v7276_v17  ;;  %v7294_v17 = vld [vmem:[%s9325_s1 + $0x380] sm:$0xff] }
  0x4a   :  { %4369 = vmatpush.bf16.msra.mxu0 %v7251_v18  ;;  %v7302_v18 = vld [vmem:[%s9325_s1 + $0x3c0] sm:$0xff] }
  0x4b   :  { %4382 = vmatpush.bf16.msra.mxu1 %v7259_v19  ;;  %v7317_v19 = vld [vmem:[%s9325_s1 + $0x438] sm:$0xff] }
  0x4c   :  { %4395 = vmatpush.bf16.msra.mxu2 %v7267_v20  ;;  %v7325_v20 = vld [vmem:[%s9325_s1 + $0x478] sm:$0xff] }
  0x4d   :  { %4408 = vmatpush.bf16.msra.mxu3 %v7275_v21  ;;  %v7333_v21 = vld [vmem:[%s9325_s1 + $0x4b8] sm:$0xff] }
  0x4e   :  { %4370 = vmatpush.bf16.msra.mxu0 %v7250_v22  ;;  %v7341_v22 = vld [vmem:[%s9325_s1 + $0x4f8] sm:$0xff] }
  0x4f   :  { %4383 = vmatpush.bf16.msra.mxu1 %v7258_v23  ;;  %v7316_v23 = vld [vmem:[%s9325_s1 + $0x430] sm:$0xff] }
  0x50   :  { %4396 = vmatpush.bf16.msra.mxu2 %v7266_v24  ;;  %v7324_v24 = vld [vmem:[%s9325_s1 + $0x470] sm:$0xff] }
  0x51   :  { %4409 = vmatpush.bf16.msra.mxu3 %v7274_v25  ;;  %v7332_v25 = vld [vmem:[%s9325_s1 + $0x4b0] sm:$0xff] }
  0x52   :  { %4371 = vmatpush.bf16.msra.mxu0 %v7249_v26  ;;  %v7340_v26 = vld [vmem:[%s9325_s1 + $0x4f0] sm:$0xff] }
  0x53   :  { %4384 = vmatpush.bf16.msra.mxu1 %v7257_v27  ;;  %v7315_v27 = vld [vmem:[%s9325_s1 + $0x428] sm:$0xff] }
  0x54   :  { %4397 = vmatpush.bf16.msra.mxu2 %v7265_v28  ;;  %v7323_v28 = vld [vmem:[%s9325_s1 + $0x468] sm:$0xff] }
  0x55   :  { %4410 = vmatpush.bf16.msra.mxu3 %v7273_v29  ;;  %v7331_v29 = vld [vmem:[%s9325_s1 + $0x4a8] sm:$0xff] }
  0x56   :  { %4372 = vmatpush.bf16.msra.mxu0 %v7248_v30  ;;  %v7339_v30 = vld [vmem:[%s9325_s1 + $0x4e8] sm:$0xff] }
  0x57   :  { %4385 = vmatpush.bf16.msra.mxu1 %v7256_v31  ;;  %v7314_v31 = vld [vmem:[%s9325_s1 + $0x420] sm:$0xff] }
  0x58   :  { %4398 = vmatpush.bf16.msra.mxu2 %v7264_v32  ;;  %v7322_v32 = vld [vmem:[%s9325_s1 + $0x460] sm:$0xff] }
  0x59   :  { %4411 = vmatpush.bf16.msra.mxu3 %v7272_v33  ;;  %v7330_v33 = vld [vmem:[%s9325_s1 + $0x4a0] sm:$0xff] }
  0x5a   :  { %4373 = vmatpush.bf16.msra.mxu0 %v7247_v34  ;;  %v7338_v34 = vld [vmem:[%s9325_s1 + $0x4e0] sm:$0xff] }
  0x5b   :  { %4386 = vmatpush.bf16.msra.mxu1 %v7255_v35  ;;  %v7313_v35 = vld [vmem:[%s9325_s1 + $0x418] sm:$0xff] }
  0x5c   :  { %4399 = vmatpush.bf16.msra.mxu2 %v7263_v36  ;;  %v7321_v36 = vld [vmem:[%s9325_s1 + $0x458] sm:$0xff] }
  0x5d   :  { %4412 = vmatpush.bf16.msra.mxu3 %v7271_v37  ;;  %v7329_v37 = vld [vmem:[%s9325_s1 + $0x498] sm:$0xff] }
  0x5e   :  { %4374 = vmatpush.bf16.msra.mxu0 %v7246_v38  ;;  %v7337_v38 = vld [vmem:[%s9325_s1 + $0x4d8] sm:$0xff] }
  0x5f   :  { %4387 = vmatpush.bf16.msra.mxu1 %v7254_v39  ;;  %v7312_v39 = vld [vmem:[%s9325_s1 + $0x410] sm:$0xff] }
  0x60   :  { %4400 = vmatpush.bf16.msra.mxu2 %v7262_v40  ;;  %v7320_v40 = vld [vmem:[%s9325_s1 + $0x450] sm:$0xff] }
  0x61   :  { %4413 = vmatpush.bf16.msra.mxu3 %v7270_v41  ;;  %4375 = vmatmul.bf16.vlgmr.msra.gmra.mxu0 %v1059_v46  ;;  %v7328_v41 = vld [vmem:[%s9325_s1 + $0x490] sm:$0xff]  ;;  %v7335_v46 = vld [vmem:[%s9325_s1 + $0x4c8] sm:$0xff] }
  0x62   :  { %4419 = vmatpush.bf16.msrb.mxu0 %v7285_v42  ;;  %4388 = vmatmul.bf16.vlgmr.msra.gmra.mxu1 %v1060_v48  ;;  %v7336_v42 = vld [vmem:[%s9325_s1 + $0x4d0] sm:$0xff]  ;;  %v7318_v48 = vld [vmem:[%s9325_s1 + $0x440] sm:$0xff] }
  0x63   :  { %4432 = vmatpush.bf16.msrb.mxu1 %v7293_v43  ;;  %4401 = vmatmul.bf16.vlgmr.msra.gmra.mxu2 %v1061_v47  ;;  %v7311_v43 = vld [vmem:[%s9325_s1 + $0x408] sm:$0xff]  ;;  %v7310_v47 = vld [vmem:[%s9325_s1 + $0x400] sm:$0xff] }
  0x64   :  { %4445 = vmatpush.bf16.msrb.mxu2 %v7301_v44  ;;  %4414 = vmatmul.bf16.vlgmr.msra.gmra.mxu3 %v1062_v49  ;;  %v7319_v44 = vld [vmem:[%s9325_s1 + $0x448] sm:$0xff]  ;;  %v7326_v49 = vld [vmem:[%s9325_s1 + $0x480] sm:$0xff] }
  0x65   :  { %4458 = vmatpush.bf16.msrb.mxu3 %v7309_v45  ;;  %v7327_v45 = vld [vmem:[%s9325_s1 + $0x488] sm:$0xff] }
  0x66   :  { %4420 = vmatpush.bf16.msrb.mxu0 %v7284_v50  ;;  %v7334_v50 = vld [vmem:[%s9325_s1 + $0x4c0] sm:$0xff] }
  0x67   :  { %4433 = vmatpush.bf16.msrb.mxu1 %v7292_v51  ;;  %v7349_v51 = vld [vmem:[%s9325_s1 + $0x538] sm:$0xff] }
  0x68   :  { %4446 = vmatpush.bf16.msrb.mxu2 %v7300_v52  ;;  %v7357_v52 = vld [vmem:[%s9325_s1 + $0x578] sm:$0xff] }
  0x69   :  { %4459 = vmatpush.bf16.msrb.mxu3 %v7308_v53  ;;  %v7365_v53 = vld [vmem:[%s9325_s1 + $0x5b8] sm:$0xff] }
  0x6a   :  { %4421 = vmatpush.bf16.msrb.mxu0 %v7283_v54  ;;  %v7373_v54 = vld [vmem:[%s9325_s1 + $0x5f8] sm:$0xff] }
  0x6b   :  { %4434 = vmatpush.bf16.msrb.mxu1 %v7291_v55  ;;  %v1069_v55 = vld [vmem:[#allocation1] sm:$0xff] }
  0x6c   :  { %4447 = vmatpush.bf16.msrb.mxu2 %v7299_v56  ;;  %v1071_v56 = vld [vmem:[#allocation1 + $0x12] sm:$0xff] }
  0x6d   :  { %4460 = vmatpush.bf16.msrb.mxu3 %v7307_v57  ;;  %v1070_v57 = vld [vmem:[#allocation1 + $0x9] sm:$0xff] }
  0x6e   :  { %4422 = vmatpush.bf16.msrb.mxu0 %v7282_v58  ;;  %v1072_v58 = vld [vmem:[#allocation1 + $0x1b] sm:$0xff] }
  0x6f   :  { %4435 = vmatpush.bf16.msrb.mxu1 %v7290_v59  ;;  %v7348_v59 = vld [vmem:[%s9325_s1 + $0x530] sm:$0xff] }
  0x70   :  { %4448 = vmatpush.bf16.msrb.mxu2 %v7298_v60  ;;  %v7356_v60 = vld [vmem:[%s9325_s1 + $0x570] sm:$0xff] }
  0x71   :  { %4461 = vmatpush.bf16.msrb.mxu3 %v7306_v61  ;;  %v7364_v61 = vld [vmem:[%s9325_s1 + $0x5b0] sm:$0xff] }
  0x72   :  { %4423 = vmatpush.bf16.msrb.mxu0 %v7281_v62  ;;  %v7372_v62 = vld [vmem:[%s9325_s1 + $0x5f0] sm:$0xff] }
  0x73   :  { %4436 = vmatpush.bf16.msrb.mxu1 %v7289_v63  ;;  %v7347_v63 = vld [vmem:[%s9325_s1 + $0x528] sm:$0xff] }
  0x74   :  { %4449 = vmatpush.bf16.msrb.mxu2 %v7297_v0  ;;  %v7355_v0 = vld [vmem:[%s9325_s1 + $0x568] sm:$0xff] }
  0x75   :  { %4462 = vmatpush.bf16.msrb.mxu3 %v7305_v1  ;;  %v7363_v1 = vld [vmem:[%s9325_s1 + $0x5a8] sm:$0xff] }
  0x76   :  { %4424 = vmatpush.bf16.msrb.mxu0 %v7280_v2  ;;  %v7371_v2 = vld [vmem:[%s9325_s1 + $0x5e8] sm:$0xff] }
  0x77   :  { %4437 = vmatpush.bf16.msrb.mxu1 %v7288_v3 }
  0x78   :  { %4450 = vmatpush.bf16.msrb.mxu2 %v7296_v4  ;;  %v7346_v4 = vld [vmem:[%s9325_s1 + $0x520] sm:$0xff] }
  0x79   :  { %4463 = vmatpush.bf16.msrb.mxu3 %v7304_v5  ;;  %v7354_v5 = vld [vmem:[%s9325_s1 + $0x560] sm:$0xff] }
  0x7a   :  { %4425 = vmatpush.bf16.msrb.mxu0 %v7279_v6 }
  0x7b   :  { %4438 = vmatpush.bf16.msrb.mxu1 %v7287_v7  ;;  %v7362_v7 = vld [vmem:[%s9325_s1 + $0x5a0] sm:$0xff] }
  0x7c   :  { %4451 = vmatpush.bf16.msrb.mxu2 %v7295_v8  ;;  %v7370_v8 = vld [vmem:[%s9325_s1 + $0x5e0] sm:$0xff] }
  0x7d   :  { %4464 = vmatpush.bf16.msrb.mxu3 %v7303_v9 }
  0x7e   :  { %4426 = vmatpush.bf16.msrb.mxu0 %v7278_v15 }
  0x7f   :  { %4439 = vmatpush.bf16.msrb.mxu1 %v7286_v16 }
  0x80   :  { %4452 = vmatpush.bf16.msrb.mxu2 %v7294_v17 }
  0x81   :  { %4465 = vmatpush.bf16.msrb.mxu3 %v7302_v18  ;;  %4427 = vmatmul.bf16.vlgmr.msrb.gmra.mxu0 %v1063_v10  ;;  %v7345_v10 = vld [vmem:[%s9325_s1 + $0x518] sm:$0xff]  ;;  %v7344_v18 = vld [vmem:[%s9325_s1 + $0x510] sm:$0xff] }
  0x82   :  { %4471 = vmatpush.bf16.msra.mxu0 %v7317_v19  ;;  %4440 = vmatmul.bf16.vlgmr.msrb.gmra.mxu1 %v1064_v12  ;;  %v7361_v12 = vld [vmem:[%s9325_s1 + $0x598] sm:$0xff]  ;;  %v7352_v19 = vld [vmem:[%s9325_s1 + $0x550] sm:$0xff] }
  0x83   :  { %4484 = vmatpush.bf16.msra.mxu1 %v7325_v20  ;;  %4453 = vmatmul.bf16.vlgmr.msrb.gmra.mxu2 %v1065_v11  ;;  %v7353_v11 = vld [vmem:[%s9325_s1 + $0x558] sm:$0xff] }
  0x84   :  { %4497 = vmatpush.bf16.msra.mxu2 %v7333_v21  ;;  %4466 = vmatmul.bf16.vlgmr.msrb.gmra.mxu3 %v1066_v13  ;;  %v7369_v13 = vld [vmem:[%s9325_s1 + $0x5d8] sm:$0xff] }
  0x85   :  { %4510 = vmatpush.bf16.msra.mxu3 %v7341_v22  ;;  %v7360_v22 = vld [vmem:[%s9325_s1 + $0x590] sm:$0xff] }
  0x86   :  { %4472 = vmatpush.bf16.msra.mxu0 %v7316_v23  ;;  %v7368_v23 = vld [vmem:[%s9325_s1 + $0x5d0] sm:$0xff] }
  0x87   :  { %4485 = vmatpush.bf16.msra.mxu1 %v7324_v24  ;;  %v7343_v24 = vld [vmem:[%s9325_s1 + $0x508] sm:$0xff] }
  0x88   :  { %4498 = vmatpush.bf16.msra.mxu2 %v7332_v25  ;;  %v7351_v25 = vld [vmem:[%s9325_s1 + $0x548] sm:$0xff] }
  0x89   :  { %4511 = vmatpush.bf16.msra.mxu3 %v7340_v26  ;;  %v7359_v26 = vld [vmem:[%s9325_s1 + $0x588] sm:$0xff] }
  0x8a   :  { %4473 = vmatpush.bf16.msra.mxu0 %v7315_v27  ;;  %v7367_v27 = vld [vmem:[%s9325_s1 + $0x5c8] sm:$0xff] }
  0x8b   :  { %4486 = vmatpush.bf16.msra.mxu1 %v7323_v28  ;;  %v1073_v28 = vld [vmem:[#allocation1 + $0x24] sm:$0xff] }
  0x8c   :  { %4499 = vmatpush.bf16.msra.mxu2 %v7331_v29  ;;  %v1075_v29 = vld [vmem:[#allocation1 + $0x36] sm:$0xff] }
  0x8d   :  { %4512 = vmatpush.bf16.msra.mxu3 %v7339_v30 }
  0x8e   :  { %4474 = vmatpush.bf16.msra.mxu0 %v7314_v31  ;;  %v1074_v31 = vld [vmem:[#allocation1 + $0x2d] sm:$0xff] }
  0x8f   :  { %4487 = vmatpush.bf16.msra.mxu1 %v7322_v32  ;;  %v1076_v32 = vld [vmem:[#allocation1 + $0x3f] sm:$0xff] }
  0x90   :  { %4500 = vmatpush.bf16.msra.mxu2 %v7330_v33 }
  0x91   :  { %4513 = vmatpush.bf16.msra.mxu3 %v7338_v34  ;;  %v18_v34 = vld [vmem:[%s9324_s0 + $0x18] sm:$0xff] }
  0x92   :  { %4475 = vmatpush.bf16.msra.mxu0 %v7313_v35  ;;  %1078 = vst [vmem:[#allocation1] ss:$9 sm:$0xff] %v18_v34  ;;  %v7342_v35 = vld [vmem:[%s9325_s1 + $0x500] sm:$0xff]  ;;  %v7435_v34 = vld [vmem:[%s9325_s1 + $0x7e8] sm:$0xff] }
  0x93   :  { %4488 = vmatpush.bf16.msra.mxu1 %v7321_v36  ;;  %v7350_v36 = vld [vmem:[%s9325_s1 + $0x540] sm:$0xff] }
  0x94   :  { %4501 = vmatpush.bf16.msra.mxu2 %v7329_v37  ;;  %v7358_v37 = vld [vmem:[%s9325_s1 + $0x580] sm:$0xff] }
  0x95   :  { %4514 = vmatpush.bf16.msra.mxu3 %v7337_v38  ;;  %v7366_v38 = vld [vmem:[%s9325_s1 + $0x5c0] sm:$0xff] }
  0x96   :  { %4476 = vmatpush.bf16.msra.mxu0 %v7312_v39  ;;  %v7381_v39 = vld [vmem:[%s9325_s1 + $0x638] sm:$0xff] }
  0x97   :  { %4489 = vmatpush.bf16.msra.mxu1 %v7320_v40  ;;  %v7389_v40 = vld [vmem:[%s9325_s1 + $0x678] sm:$0xff] }
  0x98   :  { %4502 = vmatpush.bf16.msra.mxu2 %v7328_v41  ;;  %v7397_v41 = vld [vmem:[%s9325_s1 + $0x6b8] sm:$0xff] }
  0x99   :  { %4515 = vmatpush.bf16.msra.mxu3 %v7336_v42  ;;  %v7405_v42 = vld [vmem:[%s9325_s1 + $0x6f8] sm:$0xff] }
  0x9a   :  { %4477 = vmatpush.bf16.msra.mxu0 %v7311_v43  ;;  %v7380_v43 = vld [vmem:[%s9325_s1 + $0x630] sm:$0xff] }
  0x9b   :  { %4490 = vmatpush.bf16.msra.mxu1 %v7319_v44  ;;  %v7388_v44 = vld [vmem:[%s9325_s1 + $0x670] sm:$0xff] }
  0x9c   :  { %4503 = vmatpush.bf16.msra.mxu2 %v7327_v45  ;;  %v7396_v45 = vld [vmem:[%s9325_s1 + $0x6b0] sm:$0xff] }
  0x9d   :  { %4516 = vmatpush.bf16.msra.mxu3 %v7335_v46  ;;  %v7404_v46 = vld [vmem:[%s9325_s1 + $0x6f0] sm:$0xff] }
  0x9e   :  { %4478 = vmatpush.bf16.msra.mxu0 %v7310_v47  ;;  %v4272_v3 = vpop.f32.mrf.mxu0  ;;  %v7379_v47 = vld [vmem:[%s9325_s1 + $0x628] sm:$0xff] }
  0x9f   :  { %4491 = vmatpush.bf16.msra.mxu1 %v7318_v48  ;;  %v4285_v6 = vpop.f32.mrf.mxu1  ;;  %v7387_v48 = vld [vmem:[%s9325_s1 + $0x668] sm:$0xff] }
  0xa0   :  { %4504 = vmatpush.bf16.msra.mxu2 %v7326_v49  ;;  %v4286_v9 = vadd.f32 %v4285_v6, %v4272_v3  ;;  %v7395_v49 = vld [vmem:[%s9325_s1 + $0x6a8] sm:$0xff]  ;;  %v7376_v3 = vld [vmem:[%s9325_s1 + $0x610] sm:$0xff] }
  0xa1   :  { %4517 = vmatpush.bf16.msra.mxu3 %v7334_v50  ;;  %4479 = vmatmul.bf16.vlgmr.msra.gmra.mxu0 %v1069_v55  ;;  %v7403_v50 = vld [vmem:[%s9325_s1 + $0x6e8] sm:$0xff] }
  0xa2   :  { %4523 = vmatpush.bf16.msrb.mxu0 %v7349_v51  ;;  %4492 = vmatmul.bf16.vlgmr.msra.gmra.mxu1 %v1070_v57  ;;  %v7402_v57 = vld [vmem:[%s9325_s1 + $0x6e0] sm:$0xff] }
  0xa3   :  { %4536 = vmatpush.bf16.msrb.mxu1 %v7357_v52  ;;  %4505 = vmatmul.bf16.vlgmr.msra.gmra.mxu2 %v1071_v56  ;;  %v7378_v52 = vld [vmem:[%s9325_s1 + $0x620] sm:$0xff] }
  0xa4   :  { %4549 = vmatpush.bf16.msrb.mxu2 %v7365_v53  ;;  %4518 = vmatmul.bf16.vlgmr.msra.gmra.mxu3 %v1072_v58  ;;  %v7386_v53 = vld [vmem:[%s9325_s1 + $0x660] sm:$0xff] }
  0xa5   :  { %4562 = vmatpush.bf16.msrb.mxu3 %v7373_v54  ;;  %v7394_v56 = vld [vmem:[%s9325_s1 + $0x6a0] sm:$0xff] }
  0xa6   :  { %4524 = vmatpush.bf16.msrb.mxu0 %v7348_v59  ;;  %v4298_v14 = vpop.f32.mrf.mxu2  ;;  %v4274_v17 = vpop.f32.mrf.mxu0  ;;  %v7377_v59 = vld [vmem:[%s9325_s1 + $0x618] sm:$0xff] }
  0xa7   :  { %4537 = vmatpush.bf16.msrb.mxu1 %v7356_v60  ;;  %v4299_v15 = vadd.f32 %v4298_v14, %v4286_v9  ;;  %v4311_v16 = vpop.f32.mrf.mxu3  ;;  %v4287_v21 = vpop.f32.mrf.mxu1  ;;  %v7385_v60 = vld [vmem:[%s9325_s1 + $0x658] sm:$0xff]  ;;  %v7375_v9 = vld [vmem:[%s9325_s1 + $0x608] sm:$0xff]  ;;  %v7390_v17 = vld [vmem:[%s9325_s1 + $0x680] sm:$0xff] }
  0xa8   :  { %4550 = vmatpush.bf16.msrb.mxu2 %v7364_v61  ;;  %v7393_v61 = vld [vmem:[%s9325_s1 + $0x698] sm:$0xff] }
  0xa9   :  { %4563 = vmatpush.bf16.msrb.mxu3 %v7372_v62  ;;  %v8298_v20 = vadd.f32 %v4311_v16, %v4299_v15  ;;  %v7401_v62 = vld [vmem:[%s9325_s1 + $0x6d8] sm:$0xff]  ;;  %v7374_v15 = vld [vmem:[%s9325_s1 + $0x600] sm:$0xff] }
  0xaa   :  { %4525 = vmatpush.bf16.msrb.mxu0 %v7347_v63  ;;  %v7382_v16 = vld [vmem:[%s9325_s1 + $0x640] sm:$0xff]  ;;  %v7429_v21 = vld [vmem:[%s9325_s1 + $0x7b8] sm:$0xff] }
  0xab   :  { %4538 = vmatpush.bf16.msrb.mxu1 %v7355_v0 }
  0xac   :  { %4551 = vmatpush.bf16.msrb.mxu2 %v7363_v1 }
  0xad   :  { %4564 = vmatpush.bf16.msrb.mxu3 %v7371_v2 }
  0xae   :  { %4526 = vmatpush.bf16.msrb.mxu0 %v7346_v4  ;;  %v4300_v30 = vpop.f32.mrf.mxu2  ;;  %v7384_v4 = vld [vmem:[%s9325_s1 + $0x650] sm:$0xff] }
  0xaf   :  { %4539 = vmatpush.bf16.msrb.mxu1 %v7354_v5  ;;  %v4313_v33 = vpop.f32.mrf.mxu3  ;;  %v7436_v30 = vld [vmem:[%s9325_s1 + $0x7f0] sm:$0xff] }
  0xb0   :  { %4552 = vmatpush.bf16.msrb.mxu2 %v7362_v7  ;;  %v7392_v7 = vld [vmem:[%s9325_s1 + $0x690] sm:$0xff]  ;;  %v7427_v33 = vld [vmem:[%s9325_s1 + $0x7a8] sm:$0xff] }
  0xb1   :  { %4565 = vmatpush.bf16.msrb.mxu3 %v7370_v8  ;;  %v7400_v8 = vld [vmem:[%s9325_s1 + $0x6d0] sm:$0xff] }
  0xb2   :  { %4527 = vmatpush.bf16.msrb.mxu0 %v7345_v10  ;;  %v7383_v10 = vld [vmem:[%s9325_s1 + $0x648] sm:$0xff] }
  0xb3   :  { %4540 = vmatpush.bf16.msrb.mxu1 %v7353_v11  ;;  %v7391_v11 = vld [vmem:[%s9325_s1 + $0x688] sm:$0xff] }
  0xb4   :  { %4553 = vmatpush.bf16.msrb.mxu2 %v7361_v12  ;;  %v7399_v12 = vld [vmem:[%s9325_s1 + $0x6c8] sm:$0xff] }
  0xb5   :  { %4566 = vmatpush.bf16.msrb.mxu3 %v7369_v13 }
  0xb6   :  { %4528 = vmatpush.bf16.msrb.mxu0 %v7344_v18  ;;  %v7398_v18 = vld [vmem:[%s9325_s1 + $0x6c0] sm:$0xff] }
  0xb7   :  { %4541 = vmatpush.bf16.msrb.mxu1 %v7352_v19  ;;  %v7413_v19 = vld [vmem:[%s9325_s1 + $0x738] sm:$0xff] }
  0xb8   :  { %4554 = vmatpush.bf16.msrb.mxu2 %v7360_v22  ;;  %v7437_v22 = vld [vmem:[%s9325_s1 + $0x7f8] sm:$0xff] }
  0xb9   :  { %4567 = vmatpush.bf16.msrb.mxu3 %v7368_v23  ;;  %v1079_v23 = vld [vmem:[#allocation1] sm:$0xff] }
  0xba   :  { %4529 = vmatpush.bf16.msrb.mxu0 %v7343_v24  ;;  %v1081_v24 = vld [vmem:[#allocation1 + $0x12] sm:$0xff] }
  0xbb   :  { %4542 = vmatpush.bf16.msrb.mxu1 %v7351_v25  ;;  %v1080_v25 = vld [vmem:[#allocation1 + $0x9] sm:$0xff] }
  0xbc   :  { %4555 = vmatpush.bf16.msrb.mxu2 %v7359_v26  ;;  %v1082_v26 = vld [vmem:[#allocation1 + $0x1b] sm:$0xff] }
  0xbd   :  { %4568 = vmatpush.bf16.msrb.mxu3 %v7367_v27  ;;  %v7412_v27 = vld [vmem:[%s9325_s1 + $0x730] sm:$0xff] }
  0xbe   :  { %4530 = vmatpush.bf16.msrb.mxu0 %v7342_v35  ;;  %v4324_v51 = vpop.f32.mrf.mxu0 }
  0xbf   :  { %4543 = vmatpush.bf16.msrb.mxu1 %v7350_v36  ;;  %v4325_v54 = vadd.f32 %v4324_v51, %v8298_v20  ;;  %v4337_v55 = vpop.f32.mrf.mxu1  ;;  %v7421_v20 = vld [vmem:[%s9325_s1 + $0x778] sm:$0xff] }
  0xc0   :  { %4556 = vmatpush.bf16.msrb.mxu2 %v7358_v37  ;;  %v7410_v37 = vld [vmem:[%s9325_s1 + $0x720] sm:$0xff] }
  0xc1   :  { %4569 = vmatpush.bf16.msrb.mxu3 %v7366_v38  ;;  %4531 = vmatmul.bf16.vlgmr.msrb.gmra.mxu0 %v1073_v28  ;;  %v4338_v58 = vadd.f32 %v4337_v55, %v4325_v54  ;;  %v7420_v28 = vld [vmem:[%s9325_s1 + $0x770] sm:$0xff]  ;;  %v7418_v38 = vld [vmem:[%s9325_s1 + $0x760] sm:$0xff] }
  0xc2   :  { %4575 = vmatpush.bf16.msra.mxu0 %v7381_v39  ;;  %4544 = vmatmul.bf16.vlgmr.msrb.gmra.mxu1 %v1074_v31  ;;  %v7411_v31 = vld [vmem:[%s9325_s1 + $0x728] sm:$0xff]  ;;  %v7424_v55 = vld [vmem:[%s9325_s1 + $0x790] sm:$0xff] }
  0xc3   :  { %4588 = vmatpush.bf16.msra.mxu1 %v7389_v40  ;;  %4557 = vmatmul.bf16.vlgmr.msrb.gmra.mxu2 %v1075_v29  ;;  %v7428_v29 = vld [vmem:[%s9325_s1 + $0x7b0] sm:$0xff]  ;;  %v7426_v40 = vld [vmem:[%s9325_s1 + $0x7a0] sm:$0xff] }
  0xc4   :  { %4601 = vmatpush.bf16.msra.mxu2 %v7397_v41  ;;  %4570 = vmatmul.bf16.vlgmr.msrb.gmra.mxu3 %v1076_v32  ;;  %v7419_v32 = vld [vmem:[%s9325_s1 + $0x768] sm:$0xff]  ;;  %v7434_v41 = vld [vmem:[%s9325_s1 + $0x7e0] sm:$0xff] }
  0xc5   :  { %4614 = vmatpush.bf16.msra.mxu3 %v7405_v42 }
  0xc6   :  { %4576 = vmatpush.bf16.msra.mxu0 %v7380_v43  ;;  %v4350_v63 = vpop.f32.mrf.mxu2  ;;  %v4326_v2 = vpop.f32.mrf.mxu0  ;;  %v7409_v43 = vld [vmem:[%s9325_s1 + $0x718] sm:$0xff] }
  0xc7   :  { %4589 = vmatpush.bf16.msra.mxu1 %v7388_v44  ;;  %v4351_v0 = vadd.f32 %v4350_v63, %v4338_v58  ;;  %v4363_v1 = vpop.f32.mrf.mxu3  ;;  %v4339_v6 = vpop.f32.mrf.mxu1  ;;  %v7417_v44 = vld [vmem:[%s9325_s1 + $0x758] sm:$0xff]  ;;  %v7415_v58 = vld [vmem:[%s9325_s1 + $0x748] sm:$0xff] }
  0xc8   :  { %4602 = vmatpush.bf16.msra.mxu2 %v7396_v45  ;;  %v7425_v45 = vld [vmem:[%s9325_s1 + $0x798] sm:$0xff]  ;;  %v7422_v6 = vld [vmem:[%s9325_s1 + $0x780] sm:$0xff] }
  0xc9   :  { %4615 = vmatpush.bf16.msra.mxu3 %v7404_v46  ;;  %v4364_v5 = vadd.f32 %v4363_v1, %v4351_v0  ;;  %v7433_v46 = vld [vmem:[%s9325_s1 + $0x7d8] sm:$0xff]  ;;  %v1084_v0 = vld [vmem:[#allocation1 + $0x2d] sm:$0xff] }
  0xca   :  { %4577 = vmatpush.bf16.msra.mxu0 %v7379_v47  ;;  %v1086_v1 = vld [vmem:[#allocation1 + $0x3f] sm:$0xff] }
  0xcb   :  { %4590 = vmatpush.bf16.msra.mxu1 %v7387_v48 }
  0xcc   :  { %4603 = vmatpush.bf16.msra.mxu2 %v7395_v49 }
  0xcd   :  { %4616 = vmatpush.bf16.msra.mxu3 %v7403_v50 }
  0xce   :  { %4578 = vmatpush.bf16.msra.mxu0 %v7378_v52  ;;  %v4352_v13 = vpop.f32.mrf.mxu2  ;;  %v7408_v52 = vld [vmem:[%s9325_s1 + $0x710] sm:$0xff] }
  0xcf   :  { %4591 = vmatpush.bf16.msra.mxu1 %v7386_v53  ;;  %v4365_v14 = vpop.f32.mrf.mxu3  ;;  %v7416_v53 = vld [vmem:[%s9325_s1 + $0x750] sm:$0xff] }
  0xd0   :  { %4604 = vmatpush.bf16.msra.mxu2 %v7394_v56  ;;  %v7432_v56 = vld [vmem:[%s9325_s1 + $0x7d0] sm:$0xff] }
  0xd1   :  { %4617 = vmatpush.bf16.msra.mxu3 %v7402_v57  ;;  %v7407_v57 = vld [vmem:[%s9325_s1 + $0x708] sm:$0xff]  ;;  %v7452_v13 = vld [vmem:[%s9325_s1 + $0x870] sm:$0xff] }
  0xd2   :  { %4579 = vmatpush.bf16.msra.mxu0 %v7377_v59  ;;  %v7423_v59 = vld [vmem:[%s9325_s1 + $0x788] sm:$0xff]  ;;  %v7460_v14 = vld [vmem:[%s9325_s1 + $0x8b0] sm:$0xff] }
  0xd3   :  { %4592 = vmatpush.bf16.msra.mxu1 %v7385_v60  ;;  %v7431_v60 = vld [vmem:[%s9325_s1 + $0x7c8] sm:$0xff] }
  0xd4   :  { %4605 = vmatpush.bf16.msra.mxu2 %v7393_v61  ;;  %v1083_v61 = vld [vmem:[#allocation1 + $0x24] sm:$0xff] }
  0xd5   :  { %4618 = vmatpush.bf16.msra.mxu3 %v7401_v62  ;;  %v1085_v62 = vld [vmem:[#allocation1 + $0x36] sm:$0xff] }
  0xd6   :  { %4580 = vmatpush.bf16.msra.mxu0 %v7376_v3  ;;  %v19_v3 = vld [vmem:[%s9324_s0 + $0x20] sm:$0xff] }
  0xd7   :  { %4593 = vmatpush.bf16.msra.mxu1 %v7384_v4  ;;  %1088 = vst [vmem:[#allocation1] ss:$9 sm:$0xff] %v19_v3  ;;  %v7406_v4 = vld [vmem:[%s9325_s1 + $0x700] sm:$0xff]  ;;  %v7499_v3 = vld [vmem:[%s9325_s1 + $0x9e8] sm:$0xff] }
  0xd8   :  { %4606 = vmatpush.bf16.msra.mxu2 %v7392_v7  ;;  %v7430_v7 = vld [vmem:[%s9325_s1 + $0x7c0] sm:$0xff] }
  0xd9   :  { %4619 = vmatpush.bf16.msra.mxu3 %v7400_v8  ;;  %v7445_v8 = vld [vmem:[%s9325_s1 + $0x838] sm:$0xff] }
  0xda   :  { %4581 = vmatpush.bf16.msra.mxu0 %v7375_v9  ;;  %v7453_v9 = vld [vmem:[%s9325_s1 + $0x878] sm:$0xff] }
  0xdb   :  { %4594 = vmatpush.bf16.msra.mxu1 %v7383_v10  ;;  %v7461_v10 = vld [vmem:[%s9325_s1 + $0x8b8] sm:$0xff] }
  0xdc   :  { %4607 = vmatpush.bf16.msra.mxu2 %v7391_v11  ;;  %v7469_v11 = vld [vmem:[%s9325_s1 + $0x8f8] sm:$0xff] }
  0xdd   :  { %4620 = vmatpush.bf16.msra.mxu3 %v7399_v12  ;;  %v7444_v12 = vld [vmem:[%s9325_s1 + $0x830] sm:$0xff] }
  0xde   :  { %4582 = vmatpush.bf16.msra.mxu0 %v7374_v15  ;;  %v4376_v35 = vpop.f32.mrf.mxu0  ;;  %v7468_v15 = vld [vmem:[%s9325_s1 + $0x8f0] sm:$0xff] }
  0xdf   :  { %4595 = vmatpush.bf16.msra.mxu1 %v7382_v16  ;;  %v4377_v36 = vadd.f32 %v4376_v35, %v4364_v5  ;;  %v4389_v39 = vpop.f32.mrf.mxu1  ;;  %v7414_v5 = vld [vmem:[%s9325_s1 + $0x740] sm:$0xff]  ;;  %v7443_v16 = vld [vmem:[%s9325_s1 + $0x828] sm:$0xff] }
  0xe0   :  { %4608 = vmatpush.bf16.msra.mxu2 %v7390_v17  ;;  %v7451_v17 = vld [vmem:[%s9325_s1 + $0x868] sm:$0xff] }
  0xe1   :  { %4621 = vmatpush.bf16.msra.mxu3 %v7398_v18  ;;  %4583 = vmatmul.bf16.vlgmr.msra.gmra.mxu0 %v1079_v23  ;;  %v4390_v42 = vadd.f32 %v4389_v39, %v4377_v36  ;;  %v7459_v18 = vld [vmem:[%s9325_s1 + $0x8a8] sm:$0xff]  ;;  %v7450_v23 = vld [vmem:[%s9325_s1 + $0x860] sm:$0xff] }
  0xe2   :  { %4627 = vmatpush.bf16.msrb.mxu0 %v7413_v19  ;;  %4596 = vmatmul.bf16.vlgmr.msra.gmra.mxu1 %v1080_v25  ;;  %v7467_v19 = vld [vmem:[%s9325_s1 + $0x8e8] sm:$0xff]  ;;  %v7458_v25 = vld [vmem:[%s9325_s1 + $0x8a0] sm:$0xff] }
  0xe3   :  { %4640 = vmatpush.bf16.msrb.mxu1 %v7421_v20  ;;  %4609 = vmatmul.bf16.vlgmr.msra.gmra.mxu2 %v1081_v24 }
  0xe4   :  { %4653 = vmatpush.bf16.msrb.mxu2 %v7429_v21  ;;  %4622 = vmatmul.bf16.vlgmr.msra.gmra.mxu3 %v1082_v26  ;;  %v7466_v26 = vld [vmem:[%s9325_s1 + $0x8e0] sm:$0xff] }
  0xe5   :  { %4666 = vmatpush.bf16.msrb.mxu3 %v7437_v22  ;;  %v7442_v22 = vld [vmem:[%s9325_s1 + $0x820] sm:$0xff] }
  0xe6   :  { %4628 = vmatpush.bf16.msrb.mxu0 %v7412_v27  ;;  %v4402_v47 = vpop.f32.mrf.mxu2  ;;  %v4378_v50 = vpop.f32.mrf.mxu0 }
  0xe7   :  { %4641 = vmatpush.bf16.msrb.mxu1 %v7420_v28  ;;  %v4403_v48 = vadd.f32 %v4402_v47, %v4390_v42  ;;  %v4415_v49 = vpop.f32.mrf.mxu3  ;;  %v4391_v54 = vpop.f32.mrf.mxu1  ;;  %v7441_v28 = vld [vmem:[%s9325_s1 + $0x818] sm:$0xff]  ;;  %v7439_v42 = vld [vmem:[%s9325_s1 + $0x808] sm:$0xff]  ;;  %v7454_v50 = vld [vmem:[%s9325_s1 + $0x880] sm:$0xff] }
  0xe8   :  { %4654 = vmatpush.bf16.msrb.mxu2 %v7428_v29  ;;  %v7449_v29 = vld [vmem:[%s9325_s1 + $0x858] sm:$0xff] }
  0xe9   :  { %4667 = vmatpush.bf16.msrb.mxu3 %v7436_v30  ;;  %v8490_v51 = vadd.f32 %v4415_v49, %v4403_v48  ;;  %v7457_v30 = vld [vmem:[%s9325_s1 + $0x898] sm:$0xff]  ;;  %v7438_v48 = vld [vmem:[%s9325_s1 + $0x800] sm:$0xff] }
  0xea   :  { %4629 = vmatpush.bf16.msrb.mxu0 %v7411_v31  ;;  %v7465_v31 = vld [vmem:[%s9325_s1 + $0x8d8] sm:$0xff]  ;;  %v7446_v49 = vld [vmem:[%s9325_s1 + $0x840] sm:$0xff] }
  0xeb   :  { %4642 = vmatpush.bf16.msrb.mxu1 %v7419_v32  ;;  %v7493_v54 = vld [vmem:[%s9325_s1 + $0x9b8] sm:$0xff] }
  0xec   :  { %4655 = vmatpush.bf16.msrb.mxu2 %v7427_v33 }
  0xed   :  { %4668 = vmatpush.bf16.msrb.mxu3 %v7435_v34 }
  0xee   :  { %4630 = vmatpush.bf16.msrb.mxu0 %v7410_v37  ;;  %v4404_v63 = vpop.f32.mrf.mxu2  ;;  %v7440_v37 = vld [vmem:[%s9325_s1 + $0x810] sm:$0xff] }
  0xef   :  { %4643 = vmatpush.bf16.msrb.mxu1 %v7418_v38  ;;  %v4417_v2 = vpop.f32.mrf.mxu3  ;;  %v7448_v38 = vld [vmem:[%s9325_s1 + $0x850] sm:$0xff] }
  0xf0   :  { %4656 = vmatpush.bf16.msrb.mxu2 %v7426_v40  ;;  %v7456_v40 = vld [vmem:[%s9325_s1 + $0x890] sm:$0xff]  ;;  %v7491_v2 = vld [vmem:[%s9325_s1 + $0x9a8] sm:$0xff] }
  0xf1   :  { %4669 = vmatpush.bf16.msrb.mxu3 %v7434_v41  ;;  %v7464_v41 = vld [vmem:[%s9325_s1 + $0x8d0] sm:$0xff] }
  0xf2   :  { %4631 = vmatpush.bf16.msrb.mxu0 %v7409_v43  ;;  %v7447_v43 = vld [vmem:[%s9325_s1 + $0x848] sm:$0xff]  ;;  %v7500_v63 = vld [vmem:[%s9325_s1 + $0x9f0] sm:$0xff] }
  0xf3   :  { %4644 = vmatpush.bf16.msrb.mxu1 %v7417_v44  ;;  %v7455_v44 = vld [vmem:[%s9325_s1 + $0x888] sm:$0xff] }
  0xf4   :  { %4657 = vmatpush.bf16.msrb.mxu2 %v7425_v45  ;;  %v7463_v45 = vld [vmem:[%s9325_s1 + $0x8c8] sm:$0xff] }
  0xf5   :  { %4670 = vmatpush.bf16.msrb.mxu3 %v7433_v46 }
  0xf6   :  { %4632 = vmatpush.bf16.msrb.mxu0 %v7408_v52  ;;  %v7477_v52 = vld [vmem:[%s9325_s1 + $0x938] sm:$0xff] }
  0xf7   :  { %4645 = vmatpush.bf16.msrb.mxu1 %v7416_v53  ;;  %v7485_v53 = vld [vmem:[%s9325_s1 + $0x978] sm:$0xff] }
  0xf8   :  { %4658 = vmatpush.bf16.msrb.mxu2 %v7424_v55  ;;  %v7501_v55 = vld [vmem:[%s9325_s1 + $0x9f8] sm:$0xff] }
  0xf9   :  { %4671 = vmatpush.bf16.msrb.mxu3 %v7432_v56  ;;  %v1089_v56 = vld [vmem:[#allocation1] sm:$0xff] }
  0xfa   :  { %4633 = vmatpush.bf16.msrb.mxu0 %v7407_v57  ;;  %v1091_v57 = vld [vmem:[#allocation1 + $0x12] sm:$0xff] }
  0xfb   :  { %4646 = vmatpush.bf16.msrb.mxu1 %v7415_v58  ;;  %v1090_v58 = vld [vmem:[#allocation1 + $0x9] sm:$0xff] }
  0xfc   :  { %4659 = vmatpush.bf16.msrb.mxu2 %v7423_v59  ;;  %v1092_v59 = vld [vmem:[#allocation1 + $0x1b] sm:$0xff] }
  0xfd   :  { %4672 = vmatpush.bf16.msrb.mxu3 %v7431_v60  ;;  %v7476_v60 = vld [vmem:[%s9325_s1 + $0x930] sm:$0xff] }
  0xfe   :  { %4634 = vmatpush.bf16.msrb.mxu0 %v7406_v4  ;;  %v4428_v20 = vpop.f32.mrf.mxu0 }
  0xff   :  { %4647 = vmatpush.bf16.msrb.mxu1 %v7414_v5  ;;  %v4429_v21 = vadd.f32 %v4428_v20, %v8490_v51  ;;  %v4441_v24 = vpop.f32.mrf.mxu1  ;;  %v7462_v51 = vld [vmem:[%s9325_s1 + $0x8c0] sm:$0xff] }
 0x100   :  { %4660 = vmatpush.bf16.msrb.mxu2 %v7422_v6  ;;  %v7474_v6 = vld [vmem:[%s9325_s1 + $0x920] sm:$0xff] }
 0x101   :  { %4673 = vmatpush.bf16.msrb.mxu3 %v7430_v7  ;;  %4635 = vmatmul.bf16.vlgmr.msrb.gmra.mxu0 %v1083_v61  ;;  %v4442_v27 = vadd.f32 %v4441_v24, %v4429_v21  ;;  %v7484_v61 = vld [vmem:[%s9325_s1 + $0x970] sm:$0xff]  ;;  %v7482_v7 = vld [vmem:[%s9325_s1 + $0x960] sm:$0xff] }
 0x102   :  { %4679 = vmatpush.bf16.msra.mxu0 %v7445_v8  ;;  %4648 = vmatmul.bf16.vlgmr.msrb.gmra.mxu1 %v1084_v0  ;;  %v7475_v0 = vld [vmem:[%s9325_s1 + $0x928] sm:$0xff]  ;;  %v7472_v21 = vld [vmem:[%s9325_s1 + $0x910] sm:$0xff] }
 0x103   :  { %4692 = vmatpush.bf16.msra.mxu1 %v7453_v9  ;;  %4661 = vmatmul.bf16.vlgmr.msrb.gmra.mxu2 %v1085_v62  ;;  %v7492_v62 = vld [vmem:[%s9325_s1 + $0x9b0] sm:$0xff]  ;;  %v7490_v9 = vld [vmem:[%s9325_s1 + $0x9a0] sm:$0xff] }
 0x104   :  { %4705 = vmatpush.bf16.msra.mxu2 %v7461_v10  ;;  %4674 = vmatmul.bf16.vlgmr.msrb.gmra.mxu3 %v1086_v1  ;;  %v7483_v1 = vld [vmem:[%s9325_s1 + $0x968] sm:$0xff]  ;;  %v7498_v10 = vld [vmem:[%s9325_s1 + $0x9e0] sm:$0xff]  ;;  %v7488_v24 = vld [vmem:[%s9325_s1 + $0x990] sm:$0xff] }
 0x105   :  { %4718 = vmatpush.bf16.msra.mxu3 %v7469_v11 }
 0x106   :  { %4680 = vmatpush.bf16.msra.mxu0 %v7444_v12  ;;  %v4454_v32 = vpop.f32.mrf.mxu2  ;;  %v4430_v35 = vpop.f32.mrf.mxu0  ;;  %v7473_v12 = vld [vmem:[%s9325_s1 + $0x918] sm:$0xff] }
 0x107   :  { %4693 = vmatpush.bf16.msra.mxu1 %v7452_v13  ;;  %v4455_v33 = vadd.f32 %v4454_v32, %v4442_v27  ;;  %v4467_v34 = vpop.f32.mrf.mxu3  ;;  %v4443_v39 = vpop.f32.mrf.mxu1  ;;  %v7481_v13 = vld [vmem:[%s9325_s1 + $0x958] sm:$0xff]  ;;  %v7479_v27 = vld [vmem:[%s9325_s1 + $0x948] sm:$0xff] }
 0x108   :  { %4706 = vmatpush.bf16.msra.mxu2 %v7460_v14  ;;  %v7489_v14 = vld [vmem:[%s9325_s1 + $0x998] sm:$0xff]  ;;  %v7486_v39 = vld [vmem:[%s9325_s1 + $0x980] sm:$0xff] }
 0x109   :  { %4719 = vmatpush.bf16.msra.mxu3 %v7468_v15  ;;  %v4468_v36 = vadd.f32 %v4467_v34, %v4455_v33  ;;  %v7497_v15 = vld [vmem:[%s9325_s1 + $0x9d8] sm:$0xff]  ;;  %v1094_v33 = vld [vmem:[#allocation1 + $0x2d] sm:$0xff] }
 0x10a   :  { %4681 = vmatpush.bf16.msra.mxu0 %v7443_v16  ;;  %v1096_v34 = vld [vmem:[#allocation1 + $0x3f] sm:$0xff] }
 0x10b   :  { %4694 = vmatpush.bf16.msra.mxu1 %v7451_v17 }
 0x10c   :  { %4707 = vmatpush.bf16.msra.mxu2 %v7459_v18 }
 0x10d   :  { %4720 = vmatpush.bf16.msra.mxu3 %v7467_v19 }
 0x10e   :  { %4682 = vmatpush.bf16.msra.mxu0 %v7442_v22  ;;  %v4456_v46 = vpop.f32.mrf.mxu2  ;;  %v7480_v22 = vld [vmem:[%s9325_s1 + $0x950] sm:$0xff] }
 0x10f   :  { %4695 = vmatpush.bf16.msra.mxu1 %v7450_v23  ;;  %v4469_v47 = vpop.f32.mrf.mxu3  ;;  %v7516_v46 = vld [vmem:[%s9325_s1 + $0xa70] sm:$0xff] }
 0x110   :  { %4708 = vmatpush.bf16.msra.mxu2 %v7458_v25  ;;  %v7496_v25 = vld [vmem:[%s9325_s1 + $0x9d0] sm:$0xff] }
 0x111   :  { %4721 = vmatpush.bf16.msra.mxu3 %v7466_v26  ;;  %v7471_v26 = vld [vmem:[%s9325_s1 + $0x908] sm:$0xff]  ;;  %v7524_v47 = vld [vmem:[%s9325_s1 + $0xab0] sm:$0xff] }
 0x112   :  { %4683 = vmatpush.bf16.msra.mxu0 %v7441_v28  ;;  %v7487_v28 = vld [vmem:[%s9325_s1 + $0x988] sm:$0xff] }
 0x113   :  { %4696 = vmatpush.bf16.msra.mxu1 %v7449_v29  ;;  %v7495_v29 = vld [vmem:[%s9325_s1 + $0x9c8] sm:$0xff] }
 0x114   :  { %4709 = vmatpush.bf16.msra.mxu2 %v7457_v30  ;;  %v1093_v30 = vld [vmem:[#allocation1 + $0x24] sm:$0xff] }
 0x115   :  { %4722 = vmatpush.bf16.msra.mxu3 %v7465_v31  ;;  %v1095_v31 = vld [vmem:[#allocation1 + $0x36] sm:$0xff] }
 0x116   :  { %4684 = vmatpush.bf16.msra.mxu0 %v7440_v37  ;;  %v7470_v37 = vld [vmem:[%s9325_s1 + $0x900] sm:$0xff] }
 0x117   :  { %4697 = vmatpush.bf16.msra.mxu1 %v7448_v38  ;;  %v7478_v38 = vld [vmem:[%s9325_s1 + $0x940] sm:$0xff] }
 0x118   :  { %4710 = vmatpush.bf16.msra.mxu2 %v7456_v40  ;;  %v7494_v40 = vld [vmem:[%s9325_s1 + $0x9c0] sm:$0xff] }
 0x119   :  { %4723 = vmatpush.bf16.msra.mxu3 %v7464_v41  ;;  %v7509_v41 = vld [vmem:[%s9325_s1 + $0xa38] sm:$0xff] }
 0x11a   :  { %4685 = vmatpush.bf16.msra.mxu0 %v7439_v42  ;;  %v7517_v42 = vld [vmem:[%s9325_s1 + $0xa78] sm:$0xff] }
 0x11b   :  { %4698 = vmatpush.bf16.msra.mxu1 %v7447_v43  ;;  %v7525_v43 = vld [vmem:[%s9325_s1 + $0xab8] sm:$0xff] }
 0x11c   :  { %4711 = vmatpush.bf16.msra.mxu2 %v7455_v44  ;;  %v7533_v44 = vld [vmem:[%s9325_s1 + $0xaf8] sm:$0xff] }
 0x11d   :  { %4724 = vmatpush.bf16.msra.mxu3 %v7463_v45  ;;  %v7508_v45 = vld [vmem:[%s9325_s1 + $0xa30] sm:$0xff] }
 0x11e   :  { %4686 = vmatpush.bf16.msra.mxu0 %v7438_v48  ;;  %v4480_v4 = vpop.f32.mrf.mxu0  ;;  %v7532_v48 = vld [vmem:[%s9325_s1 + $0xaf0] sm:$0xff] }
 0x11f   :  { %4699 = vmatpush.bf16.msra.mxu1 %v7446_v49  ;;  %v4481_v5 = vadd.f32 %v4480_v4, %v4468_v36  ;;  %v4493_v8 = vpop.f32.mrf.mxu1  ;;  %v20_v36 = vld [vmem:[%s9324_s0 + $0x28] sm:$0xff] }
 0x120   :  { %4712 = vmatpush.bf16.msra.mxu2 %v7454_v50  ;;  %1098 = vst [vmem:[#allocation1] ss:$9 sm:$0xff] %v20_v36  ;;  %v7507_v49 = vld [vmem:[%s9325_s1 + $0xa28] sm:$0xff] }
 0x121   :  { %4725 = vmatpush.bf16.msra.mxu3 %v7462_v51  ;;  %4687 = vmatmul.bf16.vlgmr.msra.gmra.mxu0 %v1089_v56  ;;  %v4494_v11 = vadd.f32 %v4493_v8, %v4481_v5  ;;  %v7515_v50 = vld [vmem:[%s9325_s1 + $0xa68] sm:$0xff]  ;;  %v7514_v56 = vld [vmem:[%s9325_s1 + $0xa60] sm:$0xff] }
 0x122   :  { %4731 = vmatpush.bf16.msrb.mxu0 %v7477_v52  ;;  %4700 = vmatmul.bf16.vlgmr.msra.gmra.mxu1 %v1090_v58  ;;  %v7523_v51 = vld [vmem:[%s9325_s1 + $0xaa8] sm:$0xff]  ;;  %v7522_v58 = vld [vmem:[%s9325_s1 + $0xaa0] sm:$0xff] }
 0x123   :  { %4744 = vmatpush.bf16.msrb.mxu1 %v7485_v53  ;;  %4713 = vmatmul.bf16.vlgmr.msra.gmra.mxu2 %v1091_v57  ;;  %v7531_v52 = vld [vmem:[%s9325_s1 + $0xae8] sm:$0xff] }
 0x124   :  { %4757 = vmatpush.bf16.msrb.mxu2 %v7493_v54  ;;  %4726 = vmatmul.bf16.vlgmr.msra.gmra.mxu3 %v1092_v59  ;;  %v7530_v59 = vld [vmem:[%s9325_s1 + $0xae0] sm:$0xff]  ;;  %v7563_v36 = vld [vmem:[%s9325_s1 + $0xbe8] sm:$0xff] }
 0x125   :  { %4770 = vmatpush.bf16.msrb.mxu3 %v7501_v55  ;;  %v7506_v55 = vld [vmem:[%s9325_s1 + $0xa20] sm:$0xff] }
 0x126   :  { %4732 = vmatpush.bf16.msrb.mxu0 %v7476_v60  ;;  %v4506_v16 = vpop.f32.mrf.mxu2  ;;  %v4482_v19 = vpop.f32.mrf.mxu0 }
 0x127   :  { %4745 = vmatpush.bf16.msrb.mxu1 %v7484_v61  ;;  %v4507_v17 = vadd.f32 %v4506_v16, %v4494_v11  ;;  %v4519_v18 = vpop.f32.mrf.mxu3  ;;  %v4495_v23 = vpop.f32.mrf.mxu1  ;;  %v7505_v61 = vld [vmem:[%s9325_s1 + $0xa18] sm:$0xff]  ;;  %v7503_v11 = vld [vmem:[%s9325_s1 + $0xa08] sm:$0xff]  ;;  %v7518_v19 = vld [vmem:[%s9325_s1 + $0xa80] sm:$0xff] }
 0x128   :  { %4758 = vmatpush.bf16.msrb.mxu2 %v7492_v62  ;;  %v7513_v62 = vld [vmem:[%s9325_s1 + $0xa58] sm:$0xff] }
 0x129   :  { %4771 = vmatpush.bf16.msrb.mxu3 %v7500_v63  ;;  %v8688_v20 = vadd.f32 %v4519_v18, %v4507_v17  ;;  %v7521_v63 = vld [vmem:[%s9325_s1 + $0xa98] sm:$0xff]  ;;  %v7502_v17 = vld [vmem:[%s9325_s1 + $0xa00] sm:$0xff] }
 0x12a   :  { %4733 = vmatpush.bf16.msrb.mxu0 %v7475_v0  ;;  %v7529_v0 = vld [vmem:[%s9325_s1 + $0xad8] sm:$0xff]  ;;  %v7510_v18 = vld [vmem:[%s9325_s1 + $0xa40] sm:$0xff] }
 0x12b   :  { %4746 = vmatpush.bf16.msrb.mxu1 %v7483_v1  ;;  %v7557_v23 = vld [vmem:[%s9325_s1 + $0xbb8] sm:$0xff] }
 0x12c   :  { %4759 = vmatpush.bf16.msrb.mxu2 %v7491_v2 }
 0x12d   :  { %4772 = vmatpush.bf16.msrb.mxu3 %v7499_v3 }
 0x12e   :  { %4734 = vmatpush.bf16.msrb.mxu0 %v7474_v6  ;;  %v4508_v32 = vpop.f32.mrf.mxu2  ;;  %v7504_v6 = vld [vmem:[%s9325_s1 + $0xa10] sm:$0xff] }
 0x12f   :  { %4747 = vmatpush.bf16.msrb.mxu1 %v7482_v7  ;;  %v4521_v35 = vpop.f32.mrf.mxu3  ;;  %v7512_v7 = vld [vmem:[%s9325_s1 + $0xa50] sm:$0xff] }
 0x130   :  { %4760 = vmatpush.bf16.msrb.mxu2 %v7490_v9  ;;  %v7520_v9 = vld [vmem:[%s9325_s1 + $0xa90] sm:$0xff]  ;;  %v7555_v35 = vld [vmem:[%s9325_s1 + $0xba8] sm:$0xff] }
 0x131   :  { %4773 = vmatpush.bf16.msrb.mxu3 %v7498_v10  ;;  %v7528_v10 = vld [vmem:[%s9325_s1 + $0xad0] sm:$0xff] }
 0x132   :  { %4735 = vmatpush.bf16.msrb.mxu0 %v7473_v12  ;;  %v7511_v12 = vld [vmem:[%s9325_s1 + $0xa48] sm:$0xff]  ;;  %v7564_v32 = vld [vmem:[%s9325_s1 + $0xbf0] sm:$0xff] }
 0x133   :  { %4748 = vmatpush.bf16.msrb.mxu1 %v7481_v13  ;;  %v7519_v13 = vld [vmem:[%s9325_s1 + $0xa88] sm:$0xff] }
 0x134   :  { %4761 = vmatpush.bf16.msrb.mxu2 %v7489_v14  ;;  %v7527_v14 = vld [vmem:[%s9325_s1 + $0xac8] sm:$0xff] }
 0x135   :  { %4774 = vmatpush.bf16.msrb.mxu3 %v7497_v15 }
 0x136   :  { %4736 = vmatpush.bf16.msrb.mxu0 %v7472_v21  ;;  %v7541_v21 = vld [vmem:[%s9325_s1 + $0xb38] sm:$0xff] }
 0x137   :  { %4749 = vmatpush.bf16.msrb.mxu1 %v7480_v22  ;;  %v7549_v22 = vld [vmem:[%s9325_s1 + $0xb78] sm:$0xff] }
 0x138   :  { %4762 = vmatpush.bf16.msrb.mxu2 %v7488_v24  ;;  %v7565_v24 = vld [vmem:[%s9325_s1 + $0xbf8] sm:$0xff] }
 0x139   :  { %4775 = vmatpush.bf16.msrb.mxu3 %v7496_v25  ;;  %v1099_v25 = vld [vmem:[#allocation1] sm:$0xff] }
 0x13a   :  { %4737 = vmatpush.bf16.msrb.mxu0 %v7471_v26  ;;  %v1101_v26 = vld [vmem:[#allocation1 + $0x12] sm:$0xff] }
 0x13b   :  { %4750 = vmatpush.bf16.msrb.mxu1 %v7479_v27  ;;  %v1100_v27 = vld [vmem:[#allocation1 + $0x9] sm:$0xff] }
 0x13c   :  { %4763 = vmatpush.bf16.msrb.mxu2 %v7487_v28  ;;  %v1102_v28 = vld [vmem:[#allocation1 + $0x1b] sm:$0xff] }
 0x13d   :  { %4776 = vmatpush.bf16.msrb.mxu3 %v7495_v29  ;;  %v7540_v29 = vld [vmem:[%s9325_s1 + $0xb30] sm:$0xff] }
 0x13e   :  { %4738 = vmatpush.bf16.msrb.mxu0 %v7470_v37  ;;  %v4532_v53 = vpop.f32.mrf.mxu0 }
 0x13f   :  { %4751 = vmatpush.bf16.msrb.mxu1 %v7478_v38  ;;  %v4533_v54 = vadd.f32 %v4532_v53, %v8688_v20  ;;  %v4545_v57 = vpop.f32.mrf.mxu1  ;;  %v7526_v20 = vld [vmem:[%s9325_s1 + $0xac0] sm:$0xff] }
 0x140   :  { %4764 = vmatpush.bf16.msrb.mxu2 %v7486_v39  ;;  %v7538_v39 = vld [vmem:[%s9325_s1 + $0xb20] sm:$0xff] }
 0x141   :  { %4777 = vmatpush.bf16.msrb.mxu3 %v7494_v40  ;;  %4739 = vmatmul.bf16.vlgmr.msrb.gmra.mxu0 %v1093_v30  ;;  %v4546_v60 = vadd.f32 %v4545_v57, %v4533_v54  ;;  %v7548_v30 = vld [vmem:[%s9325_s1 + $0xb70] sm:$0xff]  ;;  %v7546_v40 = vld [vmem:[%s9325_s1 + $0xb60] sm:$0xff] }
 0x142   :  { %4783 = vmatpush.bf16.msra.mxu0 %v7509_v41  ;;  %4752 = vmatmul.bf16.vlgmr.msrb.gmra.mxu1 %v1094_v33  ;;  %v7539_v33 = vld [vmem:[%s9325_s1 + $0xb28] sm:$0xff]  ;;  %v7536_v54 = vld [vmem:[%s9325_s1 + $0xb10] sm:$0xff] }
 0x143   :  { %4796 = vmatpush.bf16.msra.mxu1 %v7517_v42  ;;  %4765 = vmatmul.bf16.vlgmr.msrb.gmra.mxu2 %v1095_v31  ;;  %v7556_v31 = vld [vmem:[%s9325_s1 + $0xbb0] sm:$0xff]  ;;  %v7554_v42 = vld [vmem:[%s9325_s1 + $0xba0] sm:$0xff] }
 0x144   :  { %4809 = vmatpush.bf16.msra.mxu2 %v7525_v43  ;;  %4778 = vmatmul.bf16.vlgmr.msrb.gmra.mxu3 %v1096_v34  ;;  %v7547_v34 = vld [vmem:[%s9325_s1 + $0xb68] sm:$0xff]  ;;  %v7562_v43 = vld [vmem:[%s9325_s1 + $0xbe0] sm:$0xff]  ;;  %v7552_v57 = vld [vmem:[%s9325_s1 + $0xb90] sm:$0xff] }
 0x145   :  { %4822 = vmatpush.bf16.msra.mxu3 %v7533_v44 }
 0x146   :  { %4784 = vmatpush.bf16.msra.mxu0 %v7508_v45  ;;  %v4558_v1 = vpop.f32.mrf.mxu2  ;;  %v4534_v4 = vpop.f32.mrf.mxu0  ;;  %v7537_v45 = vld [vmem:[%s9325_s1 + $0xb18] sm:$0xff] }
 0x147   :  { %4797 = vmatpush.bf16.msra.mxu1 %v7516_v46  ;;  %v4559_v2 = vadd.f32 %v4558_v1, %v4546_v60  ;;  %v4571_v3 = vpop.f32.mrf.mxu3  ;;  %v4547_v8 = vpop.f32.mrf.mxu1  ;;  %v7545_v46 = vld [vmem:[%s9325_s1 + $0xb58] sm:$0xff]  ;;  %v7543_v60 = vld [vmem:[%s9325_s1 + $0xb48] sm:$0xff] }
 0x148   :  { %4810 = vmatpush.bf16.msra.mxu2 %v7524_v47  ;;  %v7553_v47 = vld [vmem:[%s9325_s1 + $0xb98] sm:$0xff]  ;;  %v7550_v8 = vld [vmem:[%s9325_s1 + $0xb80] sm:$0xff] }
 0x149   :  { %4823 = vmatpush.bf16.msra.mxu3 %v7532_v48  ;;  %v4572_v5 = vadd.f32 %v4571_v3, %v4559_v2  ;;  %v7561_v48 = vld [vmem:[%s9325_s1 + $0xbd8] sm:$0xff]  ;;  %v1104_v2 = vld [vmem:[#allocation1 + $0x2d] sm:$0xff] }
 0x14a   :  { %4785 = vmatpush.bf16.msra.mxu0 %v7507_v49  ;;  %v1106_v3 = vld [vmem:[#allocation1 + $0x3f] sm:$0xff] }
 0x14b   :  { %4798 = vmatpush.bf16.msra.mxu1 %v7515_v50 }
 0x14c   :  { %4811 = vmatpush.bf16.msra.mxu2 %v7523_v51 }
 0x14d   :  { %4824 = vmatpush.bf16.msra.mxu3 %v7531_v52 }
 0x14e   :  { %4786 = vmatpush.bf16.msra.mxu0 %v7506_v55  ;;  %v4560_v15 = vpop.f32.mrf.mxu2  ;;  %v7544_v55 = vld [vmem:[%s9325_s1 + $0xb50] sm:$0xff] }
 0x14f   :  { %4799 = vmatpush.bf16.msra.mxu1 %v7514_v56  ;;  %v4573_v16 = vpop.f32.mrf.mxu3  ;;  %v7580_v15 = vld [vmem:[%s9325_s1 + $0xc70] sm:$0xff] }
 0x150   :  { %4812 = vmatpush.bf16.msra.mxu2 %v7522_v58  ;;  %v7560_v58 = vld [vmem:[%s9325_s1 + $0xbd0] sm:$0xff] }
 0x151   :  { %4825 = vmatpush.bf16.msra.mxu3 %v7530_v59  ;;  %v7535_v59 = vld [vmem:[%s9325_s1 + $0xb08] sm:$0xff]  ;;  %v7588_v16 = vld [vmem:[%s9325_s1 + $0xcb0] sm:$0xff] }
 0x152   :  { %4787 = vmatpush.bf16.msra.mxu0 %v7505_v61  ;;  %v7551_v61 = vld [vmem:[%s9325_s1 + $0xb88] sm:$0xff] }
 0x153   :  { %4800 = vmatpush.bf16.msra.mxu1 %v7513_v62  ;;  %v7559_v62 = vld [vmem:[%s9325_s1 + $0xbc8] sm:$0xff] }
 0x154   :  { %4813 = vmatpush.bf16.msra.mxu2 %v7521_v63  ;;  %v1103_v63 = vld [vmem:[#allocation1 + $0x24] sm:$0xff] }
 0x155   :  { %4826 = vmatpush.bf16.msra.mxu3 %v7529_v0  ;;  %v1105_v0 = vld [vmem:[#allocation1 + $0x36] sm:$0xff] }
 0x156   :  { %4788 = vmatpush.bf16.msra.mxu0 %v7504_v6  ;;  %v7534_v6 = vld [vmem:[%s9325_s1 + $0xb00] sm:$0xff] }
 0x157   :  { %4801 = vmatpush.bf16.msra.mxu1 %v7512_v7  ;;  %v7542_v7 = vld [vmem:[%s9325_s1 + $0xb40] sm:$0xff] }
 0x158   :  { %4814 = vmatpush.bf16.msra.mxu2 %v7520_v9  ;;  %v7558_v9 = vld [vmem:[%s9325_s1 + $0xbc0] sm:$0xff] }
 0x159   :  { %4827 = vmatpush.bf16.msra.mxu3 %v7528_v10  ;;  %v7573_v10 = vld [vmem:[%s9325_s1 + $0xc38] sm:$0xff] }
 0x15a   :  { %4789 = vmatpush.bf16.msra.mxu0 %v7503_v11  ;;  %v7581_v11 = vld [vmem:[%s9325_s1 + $0xc78] sm:$0xff] }
 0x15b   :  { %4802 = vmatpush.bf16.msra.mxu1 %v7511_v12  ;;  %v7589_v12 = vld [vmem:[%s9325_s1 + $0xcb8] sm:$0xff] }
 0x15c   :  { %4815 = vmatpush.bf16.msra.mxu2 %v7519_v13  ;;  %v7597_v13 = vld [vmem:[%s9325_s1 + $0xcf8] sm:$0xff] }
 0x15d   :  { %4828 = vmatpush.bf16.msra.mxu3 %v7527_v14  ;;  %v7572_v14 = vld [vmem:[%s9325_s1 + $0xc30] sm:$0xff] }
 0x15e   :  { %4790 = vmatpush.bf16.msra.mxu0 %v7502_v17  ;;  %v4584_v37 = vpop.f32.mrf.mxu0  ;;  %v7596_v17 = vld [vmem:[%s9325_s1 + $0xcf0] sm:$0xff] }
 0x15f   :  { %4803 = vmatpush.bf16.msra.mxu1 %v7510_v18  ;;  %v4585_v38 = vadd.f32 %v4584_v37, %v4572_v5  ;;  %v4597_v41 = vpop.f32.mrf.mxu1  ;;  %v21_v5 = vld [vmem:[%s9324_s0 + $0x30] sm:$0xff]  ;;  %v7571_v18 = vld [vmem:[%s9325_s1 + $0xc28] sm:$0xff] }
 0x160   :  { %4816 = vmatpush.bf16.msra.mxu2 %v7518_v19  ;;  %1108 = vst [vmem:[#allocation1] ss:$9 sm:$0xff] %v21_v5  ;;  %v7579_v19 = vld [vmem:[%s9325_s1 + $0xc68] sm:$0xff] }
 0x161   :  { %4829 = vmatpush.bf16.msra.mxu3 %v7526_v20  ;;  %4791 = vmatmul.bf16.vlgmr.msra.gmra.mxu0 %v1099_v25  ;;  %v4598_v44 = vadd.f32 %v4597_v41, %v4585_v38  ;;  %v7587_v20 = vld [vmem:[%s9325_s1 + $0xca8] sm:$0xff]  ;;  %v7578_v25 = vld [vmem:[%s9325_s1 + $0xc60] sm:$0xff] }
 0x162   :  { %4835 = vmatpush.bf16.msrb.mxu0 %v7541_v21  ;;  %4804 = vmatmul.bf16.vlgmr.msra.gmra.mxu1 %v1100_v27  ;;  %v7595_v21 = vld [vmem:[%s9325_s1 + $0xce8] sm:$0xff]  ;;  %v7586_v27 = vld [vmem:[%s9325_s1 + $0xca0] sm:$0xff] }
 0x163   :  { %4848 = vmatpush.bf16.msrb.mxu1 %v7549_v22  ;;  %4817 = vmatmul.bf16.vlgmr.msra.gmra.mxu2 %v1101_v26  ;;  %v7627_v5 = vld [vmem:[%s9325_s1 + $0xde8] sm:$0xff] }
 0x164   :  { %4861 = vmatpush.bf16.msrb.mxu2 %v7557_v23  ;;  %4830 = vmatmul.bf16.vlgmr.msra.gmra.mxu3 %v1102_v28  ;;  %v7594_v28 = vld [vmem:[%s9325_s1 + $0xce0] sm:$0xff] }
 0x165   :  { %4874 = vmatpush.bf16.msrb.mxu3 %v7565_v24  ;;  %v7570_v24 = vld [vmem:[%s9325_s1 + $0xc20] sm:$0xff] }
 0x166   :  { %4836 = vmatpush.bf16.msrb.mxu0 %v7540_v29  ;;  %v4610_v49 = vpop.f32.mrf.mxu2  ;;  %v4586_v52 = vpop.f32.mrf.mxu0 }
 0x167   :  { %4849 = vmatpush.bf16.msrb.mxu1 %v7548_v30  ;;  %v4611_v50 = vadd.f32 %v4610_v49, %v4598_v44  ;;  %v4623_v51 = vpop.f32.mrf.mxu3  ;;  %v4599_v56 = vpop.f32.mrf.mxu1  ;;  %v7569_v30 = vld [vmem:[%s9325_s1 + $0xc18] sm:$0xff]  ;;  %v7567_v44 = vld [vmem:[%s9325_s1 + $0xc08] sm:$0xff]  ;;  %v7582_v52 = vld [vmem:[%s9325_s1 + $0xc80] sm:$0xff] }
 0x168   :  { %4862 = vmatpush.bf16.msrb.mxu2 %v7556_v31  ;;  %v7577_v31 = vld [vmem:[%s9325_s1 + $0xc58] sm:$0xff] }
 0x169   :  { %4875 = vmatpush.bf16.msrb.mxu3 %v7564_v32  ;;  %v8886_v53 = vadd.f32 %v4623_v51, %v4611_v50  ;;  %v7585_v32 = vld [vmem:[%s9325_s1 + $0xc98] sm:$0xff]  ;;  %v7566_v50 = vld [vmem:[%s9325_s1 + $0xc00] sm:$0xff] }
 0x16a   :  { %4837 = vmatpush.bf16.msrb.mxu0 %v7539_v33  ;;  %v7593_v33 = vld [vmem:[%s9325_s1 + $0xcd8] sm:$0xff]  ;;  %v7574_v51 = vld [vmem:[%s9325_s1 + $0xc40] sm:$0xff] }
 0x16b   :  { %4850 = vmatpush.bf16.msrb.mxu1 %v7547_v34  ;;  %v7621_v56 = vld [vmem:[%s9325_s1 + $0xdb8] sm:$0xff] }
 0x16c   :  { %4863 = vmatpush.bf16.msrb.mxu2 %v7555_v35 }
 0x16d   :  { %4876 = vmatpush.bf16.msrb.mxu3 %v7563_v36 }
 0x16e   :  { %4838 = vmatpush.bf16.msrb.mxu0 %v7538_v39  ;;  %v4612_v1 = vpop.f32.mrf.mxu2  ;;  %v7568_v39 = vld [vmem:[%s9325_s1 + $0xc10] sm:$0xff] }
 0x16f   :  { %4851 = vmatpush.bf16.msrb.mxu1 %v7546_v40  ;;  %v4625_v4 = vpop.f32.mrf.mxu3  ;;  %v7576_v40 = vld [vmem:[%s9325_s1 + $0xc50] sm:$0xff] }
 0x170   :  { %4864 = vmatpush.bf16.msrb.mxu2 %v7554_v42  ;;  %v7584_v42 = vld [vmem:[%s9325_s1 + $0xc90] sm:$0xff]  ;;  %v7619_v4 = vld [vmem:[%s9325_s1 + $0xda8] sm:$0xff] }
 0x171   :  { %4877 = vmatpush.bf16.msrb.mxu3 %v7562_v43  ;;  %v7592_v43 = vld [vmem:[%s9325_s1 + $0xcd0] sm:$0xff] }
 0x172   :  { %4839 = vmatpush.bf16.msrb.mxu0 %v7537_v45  ;;  %v7575_v45 = vld [vmem:[%s9325_s1 + $0xc48] sm:$0xff]  ;;  %v7628_v1 = vld [vmem:[%s9325_s1 + $0xdf0] sm:$0xff] }
 0x173   :  { %4852 = vmatpush.bf16.msrb.mxu1 %v7545_v46  ;;  %v7583_v46 = vld [vmem:[%s9325_s1 + $0xc88] sm:$0xff] }
 0x174   :  { %4865 = vmatpush.bf16.msrb.mxu2 %v7553_v47  ;;  %v7591_v47 = vld [vmem:[%s9325_s1 + $0xcc8] sm:$0xff] }
 0x175   :  { %4878 = vmatpush.bf16.msrb.mxu3 %v7561_v48 }
 0x176   :  { %4840 = vmatpush.bf16.msrb.mxu0 %v7536_v54  ;;  %v7605_v54 = vld [vmem:[%s9325_s1 + $0xd38] sm:$0xff] }
 0x177   :  { %4853 = vmatpush.bf16.msrb.mxu1 %v7544_v55  ;;  %v7613_v55 = vld [vmem:[%s9325_s1 + $0xd78] sm:$0xff] }
 0x178   :  { %4866 = vmatpush.bf16.msrb.mxu2 %v7552_v57  ;;  %v7629_v57 = vld [vmem:[%s9325_s1 + $0xdf8] sm:$0xff] }
 0x179   :  { %4879 = vmatpush.bf16.msrb.mxu3 %v7560_v58  ;;  %v1109_v58 = vld [vmem:[#allocation1] sm:$0xff] }
 0x17a   :  { %4841 = vmatpush.bf16.msrb.mxu0 %v7535_v59  ;;  %v1111_v59 = vld [vmem:[#allocation1 + $0x12] sm:$0xff] }
 0x17b   :  { %4854 = vmatpush.bf16.msrb.mxu1 %v7543_v60  ;;  %v1110_v60 = vld [vmem:[#allocation1 + $0x9] sm:$0xff] }
 0x17c   :  { %4867 = vmatpush.bf16.msrb.mxu2 %v7551_v61  ;;  %v1112_v61 = vld [vmem:[#allocation1 + $0x1b] sm:$0xff] }
 0x17d   :  { %4880 = vmatpush.bf16.msrb.mxu3 %v7559_v62  ;;  %v7604_v62 = vld [vmem:[%s9325_s1 + $0xd30] sm:$0xff] }
 0x17e   :  { %4842 = vmatpush.bf16.msrb.mxu0 %v7534_v6  ;;  %v4636_v22 = vpop.f32.mrf.mxu0 }
 0x17f   :  { %4855 = vmatpush.bf16.msrb.mxu1 %v7542_v7  ;;  %v4637_v23 = vadd.f32 %v4636_v22, %v8886_v53  ;;  %v4649_v26 = vpop.f32.mrf.mxu1  ;;  %v7590_v53 = vld [vmem:[%s9325_s1 + $0xcc0] sm:$0xff] }
 0x180   :  { %4868 = vmatpush.bf16.msrb.mxu2 %v7550_v8  ;;  %v7602_v8 = vld [vmem:[%s9325_s1 + $0xd20] sm:$0xff] }
 0x181   :  { %4881 = vmatpush.bf16.msrb.mxu3 %v7558_v9  ;;  %4843 = vmatmul.bf16.vlgmr.msrb.gmra.mxu0 %v1103_v63  ;;  %v4650_v29 = vadd.f32 %v4649_v26, %v4637_v23  ;;  %v7612_v63 = vld [vmem:[%s9325_s1 + $0xd70] sm:$0xff]  ;;  %v7610_v9 = vld [vmem:[%s9325_s1 + $0xd60] sm:$0xff] }
 0x182   :  { %4887 = vmatpush.bf16.msra.mxu0 %v7573_v10  ;;  %4856 = vmatmul.bf16.vlgmr.msrb.gmra.mxu1 %v1104_v2  ;;  %v7603_v2 = vld [vmem:[%s9325_s1 + $0xd28] sm:$0xff]  ;;  %v7600_v23 = vld [vmem:[%s9325_s1 + $0xd10] sm:$0xff] }
 0x183   :  { %4900 = vmatpush.bf16.msra.mxu1 %v7581_v11  ;;  %4869 = vmatmul.bf16.vlgmr.msrb.gmra.mxu2 %v1105_v0  ;;  %v7620_v0 = vld [vmem:[%s9325_s1 + $0xdb0] sm:$0xff]  ;;  %v7618_v11 = vld [vmem:[%s9325_s1 + $0xda0] sm:$0xff] }
 0x184   :  { %4913 = vmatpush.bf16.msra.mxu2 %v7589_v12  ;;  %4882 = vmatmul.bf16.vlgmr.msrb.gmra.mxu3 %v1106_v3  ;;  %v7611_v3 = vld [vmem:[%s9325_s1 + $0xd68] sm:$0xff]  ;;  %v7626_v12 = vld [vmem:[%s9325_s1 + $0xde0] sm:$0xff]  ;;  %v7616_v26 = vld [vmem:[%s9325_s1 + $0xd90] sm:$0xff] }
 0x185   :  { %4926 = vmatpush.bf16.msra.mxu3 %v7597_v13 }
 0x186   :  { %4888 = vmatpush.bf16.msra.mxu0 %v7572_v14  ;;  %v4662_v34 = vpop.f32.mrf.mxu2  ;;  %v4638_v37 = vpop.f32.mrf.mxu0  ;;  %v7601_v14 = vld [vmem:[%s9325_s1 + $0xd18] sm:$0xff] }
 0x187   :  { %4901 = vmatpush.bf16.msra.mxu1 %v7580_v15  ;;  %v4663_v35 = vadd.f32 %v4662_v34, %v4650_v29  ;;  %v4675_v36 = vpop.f32.mrf.mxu3  ;;  %v4651_v41 = vpop.f32.mrf.mxu1  ;;  %v7609_v15 = vld [vmem:[%s9325_s1 + $0xd58] sm:$0xff]  ;;  %v7607_v29 = vld [vmem:[%s9325_s1 + $0xd48] sm:$0xff] }
 0x188   :  { %4914 = vmatpush.bf16.msra.mxu2 %v7588_v16  ;;  %v7617_v16 = vld [vmem:[%s9325_s1 + $0xd98] sm:$0xff]  ;;  %v7614_v41 = vld [vmem:[%s9325_s1 + $0xd80] sm:$0xff] }
 0x189   :  { %4927 = vmatpush.bf16.msra.mxu3 %v7596_v17  ;;  %v4676_v38 = vadd.f32 %v4675_v36, %v4663_v35  ;;  %v7625_v17 = vld [vmem:[%s9325_s1 + $0xdd8] sm:$0xff]  ;;  %v1114_v35 = vld [vmem:[#allocation1 + $0x2d] sm:$0xff] }
 0x18a   :  { %4889 = vmatpush.bf16.msra.mxu0 %v7571_v18  ;;  %v1116_v36 = vld [vmem:[#allocation1 + $0x3f] sm:$0xff] }
 0x18b   :  { %4902 = vmatpush.bf16.msra.mxu1 %v7579_v19 }
 0x18c   :  { %4915 = vmatpush.bf16.msra.mxu2 %v7587_v20 }
 0x18d   :  { %4928 = vmatpush.bf16.msra.mxu3 %v7595_v21 }
 0x18e   :  { %4890 = vmatpush.bf16.msra.mxu0 %v7570_v24  ;;  %v4664_v48 = vpop.f32.mrf.mxu2  ;;  %v7608_v24 = vld [vmem:[%s9325_s1 + $0xd50] sm:$0xff] }
 0x18f   :  { %4903 = vmatpush.bf16.msra.mxu1 %v7578_v25  ;;  %v4677_v49 = vpop.f32.mrf.mxu3  ;;  %v7644_v48 = vld [vmem:[%s9325_s1 + $0xe70] sm:$0xff] }
 0x190   :  { %4916 = vmatpush.bf16.msra.mxu2 %v7586_v27  ;;  %v7624_v27 = vld [vmem:[%s9325_s1 + $0xdd0] sm:$0xff] }
 0x191   :  { %4929 = vmatpush.bf16.msra.mxu3 %v7594_v28  ;;  %v7599_v28 = vld [vmem:[%s9325_s1 + $0xd08] sm:$0xff]  ;;  %v7652_v49 = vld [vmem:[%s9325_s1 + $0xeb0] sm:$0xff] }
 0x192   :  { %4891 = vmatpush.bf16.msra.mxu0 %v7569_v30  ;;  %v7615_v30 = vld [vmem:[%s9325_s1 + $0xd88] sm:$0xff] }
 0x193   :  { %4904 = vmatpush.bf16.msra.mxu1 %v7577_v31  ;;  %v7623_v31 = vld [vmem:[%s9325_s1 + $0xdc8] sm:$0xff] }
 0x194   :  { %4917 = vmatpush.bf16.msra.mxu2 %v7585_v32  ;;  %v1113_v32 = vld [vmem:[#allocation1 + $0x24] sm:$0xff] }
 0x195   :  { %4930 = vmatpush.bf16.msra.mxu3 %v7593_v33  ;;  %v1115_v33 = vld [vmem:[#allocation1 + $0x36] sm:$0xff] }
 0x196   :  { %4892 = vmatpush.bf16.msra.mxu0 %v7568_v39  ;;  %v7598_v39 = vld [vmem:[%s9325_s1 + $0xd00] sm:$0xff] }
 0x197   :  { %4905 = vmatpush.bf16.msra.mxu1 %v7576_v40  ;;  %v7606_v40 = vld [vmem:[%s9325_s1 + $0xd40] sm:$0xff] }
 0x198   :  { %4918 = vmatpush.bf16.msra.mxu2 %v7584_v42  ;;  %v7622_v42 = vld [vmem:[%s9325_s1 + $0xdc0] sm:$0xff] }
 0x199   :  { %4931 = vmatpush.bf16.msra.mxu3 %v7592_v43  ;;  %v7637_v43 = vld [vmem:[%s9325_s1 + $0xe38] sm:$0xff] }
 0x19a   :  { %4893 = vmatpush.bf16.msra.mxu0 %v7567_v44  ;;  %v7645_v44 = vld [vmem:[%s9325_s1 + $0xe78] sm:$0xff] }
 0x19b   :  { %4906 = vmatpush.bf16.msra.mxu1 %v7575_v45  ;;  %v7653_v45 = vld [vmem:[%s9325_s1 + $0xeb8] sm:$0xff] }
 0x19c   :  { %4919 = vmatpush.bf16.msra.mxu2 %v7583_v46  ;;  %v7661_v46 = vld [vmem:[%s9325_s1 + $0xef8] sm:$0xff] }
 0x19d   :  { %4932 = vmatpush.bf16.msra.mxu3 %v7591_v47  ;;  %v7636_v47 = vld [vmem:[%s9325_s1 + $0xe30] sm:$0xff] }
 0x19e   :  { %4894 = vmatpush.bf16.msra.mxu0 %v7566_v50  ;;  %v4688_v6 = vpop.f32.mrf.mxu0  ;;  %v7660_v50 = vld [vmem:[%s9325_s1 + $0xef0] sm:$0xff] }
 0x19f   :  { %4907 = vmatpush.bf16.msra.mxu1 %v7574_v51  ;;  %v4689_v7 = vadd.f32 %v4688_v6, %v4676_v38  ;;  %v4701_v10 = vpop.f32.mrf.mxu1  ;;  %v22_v38 = vld [vmem:[%s9324_s0 + $0x38] sm:$0xff]  ;;  %v7635_v51 = vld [vmem:[%s9325_s1 + $0xe28] sm:$0xff] }
 0x1a0   :  { %4920 = vmatpush.bf16.msra.mxu2 %v7582_v52  ;;  %1118 = vst [vmem:[#allocation1] ss:$9 sm:$0xff] %v22_v38  ;;  %v7643_v52 = vld [vmem:[%s9325_s1 + $0xe68] sm:$0xff] }
 0x1a1   :  { %4933 = vmatpush.bf16.msra.mxu3 %v7590_v53  ;;  %4895 = vmatmul.bf16.vlgmr.msra.gmra.mxu0 %v1109_v58  ;;  %v4702_v13 = vadd.f32 %v4701_v10, %v4689_v7  ;;  %v7651_v53 = vld [vmem:[%s9325_s1 + $0xea8] sm:$0xff]  ;;  %v7642_v58 = vld [vmem:[%s9325_s1 + $0xe60] sm:$0xff] }
 0x1a2   :  { %4939 = vmatpush.bf16.msrb.mxu0 %v7605_v54  ;;  %4908 = vmatmul.bf16.vlgmr.msra.gmra.mxu1 %v1110_v60  ;;  %v7659_v54 = vld [vmem:[%s9325_s1 + $0xee8] sm:$0xff]  ;;  %v7650_v60 = vld [vmem:[%s9325_s1 + $0xea0] sm:$0xff] }
 0x1a3   :  { %4952 = vmatpush.bf16.msrb.mxu1 %v7613_v55  ;;  %4921 = vmatmul.bf16.vlgmr.msra.gmra.mxu2 %v1111_v59  ;;  %v7691_v38 = vld [vmem:[%s9325_s1 + $0xfe8] sm:$0xff] }
 0x1a4   :  { %4965 = vmatpush.bf16.msrb.mxu2 %v7621_v56  ;;  %4934 = vmatmul.bf16.vlgmr.msra.gmra.mxu3 %v1112_v61  ;;  %v7658_v61 = vld [vmem:[%s9325_s1 + $0xee0] sm:$0xff] }
 0x1a5   :  { %4978 = vmatpush.bf16.msrb.mxu3 %v7629_v57  ;;  %v7634_v57 = vld [vmem:[%s9325_s1 + $0xe20] sm:$0xff] }
 0x1a6   :  { %4940 = vmatpush.bf16.msrb.mxu0 %v7604_v62  ;;  %v4714_v18 = vpop.f32.mrf.mxu2  ;;  %v4690_v21 = vpop.f32.mrf.mxu0 }
 0x1a7   :  { %4953 = vmatpush.bf16.msrb.mxu1 %v7612_v63  ;;  %v4715_v19 = vadd.f32 %v4714_v18, %v4702_v13  ;;  %v4727_v20 = vpop.f32.mrf.mxu3  ;;  %v4703_v25 = vpop.f32.mrf.mxu1  ;;  %v7633_v63 = vld [vmem:[%s9325_s1 + $0xe18] sm:$0xff]  ;;  %v7631_v13 = vld [vmem:[%s9325_s1 + $0xe08] sm:$0xff]  ;;  %v7646_v21 = vld [vmem:[%s9325_s1 + $0xe80] sm:$0xff] }
 0x1a8   :  { %4966 = vmatpush.bf16.msrb.mxu2 %v7620_v0  ;;  %v7641_v0 = vld [vmem:[%s9325_s1 + $0xe58] sm:$0xff] }
 0x1a9   :  { %4979 = vmatpush.bf16.msrb.mxu3 %v7628_v1  ;;  %v9084_v22 = vadd.f32 %v4727_v20, %v4715_v19  ;;  %v7649_v1 = vld [vmem:[%s9325_s1 + $0xe98] sm:$0xff]  ;;  %v7630_v19 = vld [vmem:[%s9325_s1 + $0xe00] sm:$0xff] }
 0x1aa   :  { %4941 = vmatpush.bf16.msrb.mxu0 %v7603_v2  ;;  %v7657_v2 = vld [vmem:[%s9325_s1 + $0xed8] sm:$0xff]  ;;  %v7638_v20 = vld [vmem:[%s9325_s1 + $0xe40] sm:$0xff] }
 0x1ab   :  { %4954 = vmatpush.bf16.msrb.mxu1 %v7611_v3  ;;  %v7685_v25 = vld [vmem:[%s9325_s1 + $0xfb8] sm:$0xff] }
 0x1ac   :  { %4967 = vmatpush.bf16.msrb.mxu2 %v7619_v4 }
 0x1ad   :  { %4980 = vmatpush.bf16.msrb.mxu3 %v7627_v5 }
 0x1ae   :  { %4942 = vmatpush.bf16.msrb.mxu0 %v7602_v8  ;;  %v4716_v34 = vpop.f32.mrf.mxu2  ;;  %v7632_v8 = vld [vmem:[%s9325_s1 + $0xe10] sm:$0xff] }
 0x1af   :  { %4955 = vmatpush.bf16.msrb.mxu1 %v7610_v9  ;;  %v4729_v37 = vpop.f32.mrf.mxu3  ;;  %v7640_v9 = vld [vmem:[%s9325_s1 + $0xe50] sm:$0xff] }
 0x1b0   :  { %4968 = vmatpush.bf16.msrb.mxu2 %v7618_v11  ;;  %v7648_v11 = vld [vmem:[%s9325_s1 + $0xe90] sm:$0xff]  ;;  %v7683_v37 = vld [vmem:[%s9325_s1 + $0xfa8] sm:$0xff] }
 0x1b1   :  { %4981 = vmatpush.bf16.msrb.mxu3 %v7626_v12  ;;  %v7656_v12 = vld [vmem:[%s9325_s1 + $0xed0] sm:$0xff] }
 0x1b2   :  { %4943 = vmatpush.bf16.msrb.mxu0 %v7601_v14  ;;  %v7639_v14 = vld [vmem:[%s9325_s1 + $0xe48] sm:$0xff]  ;;  %v7692_v34 = vld [vmem:[%s9325_s1 + $0xff0] sm:$0xff] }
 0x1b3   :  { %4956 = vmatpush.bf16.msrb.mxu1 %v7609_v15  ;;  %v7647_v15 = vld [vmem:[%s9325_s1 + $0xe88] sm:$0xff] }
 0x1b4   :  { %4969 = vmatpush.bf16.msrb.mxu2 %v7617_v16  ;;  %v7655_v16 = vld [vmem:[%s9325_s1 + $0xec8] sm:$0xff] }
 0x1b5   :  { %4982 = vmatpush.bf16.msrb.mxu3 %v7625_v17 }
 0x1b6   :  { %4944 = vmatpush.bf16.msrb.mxu0 %v7600_v23  ;;  %v7669_v23 = vld [vmem:[%s9325_s1 + $0xf38] sm:$0xff] }
 0x1b7   :  { %4957 = vmatpush.bf16.msrb.mxu1 %v7608_v24  ;;  %v7677_v24 = vld [vmem:[%s9325_s1 + $0xf78] sm:$0xff] }
 0x1b8   :  { %4970 = vmatpush.bf16.msrb.mxu2 %v7616_v26  ;;  %v7693_v26 = vld [vmem:[%s9325_s1 + $0xff8] sm:$0xff] }
 0x1b9   :  { %4983 = vmatpush.bf16.msrb.mxu3 %v7624_v27  ;;  %v1119_v27 = vld [vmem:[#allocation1] sm:$0xff] }
 0x1ba   :  { %4945 = vmatpush.bf16.msrb.mxu0 %v7599_v28  ;;  %v1121_v28 = vld [vmem:[#allocation1 + $0x12] sm:$0xff] }
 0x1bb   :  { %4958 = vmatpush.bf16.msrb.mxu1 %v7607_v29  ;;  %v1120_v29 = vld [vmem:[#allocation1 + $0x9] sm:$0xff] }
 0x1bc   :  { %4971 = vmatpush.bf16.msrb.mxu2 %v7615_v30  ;;  %v1122_v30 = vld [vmem:[#allocation1 + $0x1b] sm:$0xff] }
 0x1bd   :  { %4984 = vmatpush.bf16.msrb.mxu3 %v7623_v31  ;;  %v7668_v31 = vld [vmem:[%s9325_s1 + $0xf30] sm:$0xff] }
 0x1be   :  { %4946 = vmatpush.bf16.msrb.mxu0 %v7598_v39  ;;  %v4740_v55 = vpop.f32.mrf.mxu0 }
 0x1bf   :  { %4959 = vmatpush.bf16.msrb.mxu1 %v7606_v40  ;;  %v4741_v56 = vadd.f32 %v4740_v55, %v9084_v22  ;;  %v4753_v59 = vpop.f32.mrf.mxu1  ;;  %v7654_v22 = vld [vmem:[%s9325_s1 + $0xec0] sm:$0xff] }
 0x1c0   :  { %4972 = vmatpush.bf16.msrb.mxu2 %v7614_v41  ;;  %v7666_v41 = vld [vmem:[%s9325_s1 + $0xf20] sm:$0xff] }
 0x1c1   :  { %4985 = vmatpush.bf16.msrb.mxu3 %v7622_v42  ;;  %4947 = vmatmul.bf16.vlgmr.msrb.gmra.mxu0 %v1113_v32  ;;  %v4754_v62 = vadd.f32 %v4753_v59, %v4741_v56  ;;  %v7676_v32 = vld [vmem:[%s9325_s1 + $0xf70] sm:$0xff]  ;;  %v7674_v42 = vld [vmem:[%s9325_s1 + $0xf60] sm:$0xff] }
 0x1c2   :  { %4991 = vmatpush.bf16.msra.mxu0 %v7637_v43  ;;  %4960 = vmatmul.bf16.vlgmr.msrb.gmra.mxu1 %v1114_v35  ;;  %v7667_v35 = vld [vmem:[%s9325_s1 + $0xf28] sm:$0xff]  ;;  %v7664_v56 = vld [vmem:[%s9325_s1 + $0xf10] sm:$0xff] }
 0x1c3   :  { %5004 = vmatpush.bf16.msra.mxu1 %v7645_v44  ;;  %4973 = vmatmul.bf16.vlgmr.msrb.gmra.mxu2 %v1115_v33  ;;  %v7684_v33 = vld [vmem:[%s9325_s1 + $0xfb0] sm:$0xff]  ;;  %v7682_v44 = vld [vmem:[%s9325_s1 + $0xfa0] sm:$0xff] }
 0x1c4   :  { %5017 = vmatpush.bf16.msra.mxu2 %v7653_v45  ;;  %4986 = vmatmul.bf16.vlgmr.msrb.gmra.mxu3 %v1116_v36  ;;  %v7675_v36 = vld [vmem:[%s9325_s1 + $0xf68] sm:$0xff]  ;;  %v7690_v45 = vld [vmem:[%s9325_s1 + $0xfe0] sm:$0xff]  ;;  %v7680_v59 = vld [vmem:[%s9325_s1 + $0xf90] sm:$0xff] }
 0x1c5   :  { %5030 = vmatpush.bf16.msra.mxu3 %v7661_v46 }
 0x1c6   :  { %4992 = vmatpush.bf16.msra.mxu0 %v7636_v47  ;;  %v4766_v3 = vpop.f32.mrf.mxu2  ;;  %v4742_v6 = vpop.f32.mrf.mxu0  ;;  %v7665_v47 = vld [vmem:[%s9325_s1 + $0xf18] sm:$0xff] }
 0x1c7   :  { %5005 = vmatpush.bf16.msra.mxu1 %v7644_v48  ;;  %v4767_v4 = vadd.f32 %v4766_v3, %v4754_v62  ;;  %v4779_v5 = vpop.f32.mrf.mxu3  ;;  %v4755_v10 = vpop.f32.mrf.mxu1  ;;  %v7673_v48 = vld [vmem:[%s9325_s1 + $0xf58] sm:$0xff]  ;;  %v7671_v62 = vld [vmem:[%s9325_s1 + $0xf48] sm:$0xff]  ;;  %v7662_v3 = vld [vmem:[%s9325_s1 + $0xf00] sm:$0xff] }
 0x1c8   :  { %5018 = vmatpush.bf16.msra.mxu2 %v7652_v49  ;;  %v7681_v49 = vld [vmem:[%s9325_s1 + $0xf98] sm:$0xff]  ;;  %v7686_v6 = vld [vmem:[%s9325_s1 + $0xfc0] sm:$0xff] }
 0x1c9   :  { %5031 = vmatpush.bf16.msra.mxu3 %v7660_v50  ;;  %v4780_v7 = vadd.f32 %v4779_v5, %v4767_v4  ;;  %v7689_v50 = vld [vmem:[%s9325_s1 + $0xfd8] sm:$0xff]  ;;  %v7670_v4 = vld [vmem:[%s9325_s1 + $0xf40] sm:$0xff] }
 0x1ca   :  { %4993 = vmatpush.bf16.msra.mxu0 %v7635_v51  ;;  %v7678_v5 = vld [vmem:[%s9325_s1 + $0xf80] sm:$0xff] }
 0x1cb   :  { %5006 = vmatpush.bf16.msra.mxu1 %v7643_v52  ;;  %v1126_v10 = vld [vmem:[#allocation1 + $0x3f] sm:$0xff] }
 0x1cc   :  { %5019 = vmatpush.bf16.msra.mxu2 %v7651_v53 }
 0x1cd   :  { %5032 = vmatpush.bf16.msra.mxu3 %v7659_v54 }
 0x1ce   :  { %4994 = vmatpush.bf16.msra.mxu0 %v7634_v57  ;;  %v4768_v17 = vpop.f32.mrf.mxu2  ;;  %v7672_v57 = vld [vmem:[%s9325_s1 + $0xf50] sm:$0xff] }
 0x1cf   :  { %5007 = vmatpush.bf16.msra.mxu1 %v7642_v58  ;;  %v4781_v18 = vpop.f32.mrf.mxu3 }
 0x1d0   :  { %5020 = vmatpush.bf16.msra.mxu2 %v7650_v60  ;;  %v7688_v60 = vld [vmem:[%s9325_s1 + $0xfd0] sm:$0xff] }
 0x1d1   :  { %5033 = vmatpush.bf16.msra.mxu3 %v7658_v61  ;;  %v7663_v61 = vld [vmem:[%s9325_s1 + $0xf08] sm:$0xff] }
 0x1d2   :  { %4995 = vmatpush.bf16.msra.mxu0 %v7633_v63  ;;  %v7679_v63 = vld [vmem:[%s9325_s1 + $0xf88] sm:$0xff] }
 0x1d3   :  { %5008 = vmatpush.bf16.msra.mxu1 %v7641_v0  ;;  %v7687_v0 = vld [vmem:[%s9325_s1 + $0xfc8] sm:$0xff] }
 0x1d4   :  { %5021 = vmatpush.bf16.msra.mxu2 %v7649_v1 }
 0x1d5   :  { %5034 = vmatpush.bf16.msra.mxu3 %v7657_v2 }
 0x1d6   :  { %4996 = vmatpush.bf16.msra.mxu0 %v7632_v8  ;;  %v1124_v8 = vld [vmem:[#allocation1 + $0x2d] sm:$0xff] }
 0x1d7   :  { %5009 = vmatpush.bf16.msra.mxu1 %v7640_v9  ;;  %v1125_v9 = vld [vmem:[#allocation1 + $0x36] sm:$0xff] }
 0x1d8   :  { %5022 = vmatpush.bf16.msra.mxu2 %v7648_v11 }
 0x1d9   :  { %5035 = vmatpush.bf16.msra.mxu3 %v7656_v12 }
 0x1da   :  { %4997 = vmatpush.bf16.msra.mxu0 %v7631_v13 }
 0x1db   :  { %5010 = vmatpush.bf16.msra.mxu1 %v7639_v14 }
 0x1dc   :  { %5023 = vmatpush.bf16.msra.mxu2 %v7647_v15 }
 0x1dd   :  { %5036 = vmatpush.bf16.msra.mxu3 %v7655_v16 }
 0x1de   :  { %4998 = vmatpush.bf16.msra.mxu0 %v7630_v19  ;;  %v4792_v39 = vpop.f32.mrf.mxu0 }
 0x1df   :  { %5011 = vmatpush.bf16.msra.mxu1 %v7638_v20  ;;  %v4793_v40 = vadd.f32 %v4792_v39, %v4780_v7  ;;  %v4805_v43 = vpop.f32.mrf.mxu1  ;;  %v1123_v7 = vld [vmem:[#allocation1 + $0x24] sm:$0xff] }
 0x1e0   :  { %5024 = vmatpush.bf16.msra.mxu2 %v7646_v21 }
 0x1e1   :  { %5037 = vmatpush.bf16.msra.mxu3 %v7654_v22  ;;  %4999 = vmatmul.bf16.vlgmr.msra.gmra.mxu0 %v1119_v27  ;;  %v4806_v46 = vadd.f32 %v4805_v43, %v4793_v40 }
 0x1e2   :  { %5043 = vmatpush.bf16.msrb.mxu0 %v7669_v23  ;;  %5012 = vmatmul.bf16.vlgmr.msra.gmra.mxu1 %v1120_v29 }
 0x1e3   :  { %5056 = vmatpush.bf16.msrb.mxu1 %v7677_v24  ;;  %5025 = vmatmul.bf16.vlgmr.msra.gmra.mxu2 %v1121_v28 }
 0x1e4   :  { %5069 = vmatpush.bf16.msrb.mxu2 %v7685_v25  ;;  %5038 = vmatmul.bf16.vlgmr.msra.gmra.mxu3 %v1122_v30 }
 0x1e5   :  { %5082 = vmatpush.bf16.msrb.mxu3 %v7693_v26 }
 0x1e6   :  { %5044 = vmatpush.bf16.msrb.mxu0 %v7668_v31  ;;  %v4818_v51 = vpop.f32.mrf.mxu2  ;;  %v4794_v54 = vpop.f32.mrf.mxu0 }
 0x1e7   :  { %5057 = vmatpush.bf16.msrb.mxu1 %v7676_v32  ;;  %v4819_v52 = vadd.f32 %v4818_v51, %v4806_v46  ;;  %v4831_v53 = vpop.f32.mrf.mxu3  ;;  %v4807_v58 = vpop.f32.mrf.mxu1 }
 0x1e8   :  { %5070 = vmatpush.bf16.msrb.mxu2 %v7684_v33 }
 0x1e9   :  { %5083 = vmatpush.bf16.msrb.mxu3 %v7692_v34  ;;  %v4832_v55 = vadd.f32 %v4831_v53, %v4819_v52 }
 0x1ea   :  { %5045 = vmatpush.bf16.msrb.mxu0 %v7667_v35 }
 0x1eb   :  { %5058 = vmatpush.bf16.msrb.mxu1 %v7675_v36 }
 0x1ec   :  { %5071 = vmatpush.bf16.msrb.mxu2 %v7683_v37 }
 0x1ed   :  { %5084 = vmatpush.bf16.msrb.mxu3 %v7691_v38 }
 0x1ee   :  { %5046 = vmatpush.bf16.msrb.mxu0 %v7666_v41  ;;  %v4820_v1 = vpop.f32.mrf.mxu2 }
 0x1ef   :  { %5059 = vmatpush.bf16.msrb.mxu1 %v7674_v42  ;;  %v4833_v2 = vpop.f32.mrf.mxu3 }
 0x1f0   :  { %5072 = vmatpush.bf16.msrb.mxu2 %v7682_v44  ;;  %v7695_v2 = vld [vmem:[%s9326_s2] ss:$0 sm:$0xff] }
 0x1f1   :  { %5085 = vmatpush.bf16.msrb.mxu3 %v7690_v45 }
 0x1f2   :  { %5047 = vmatpush.bf16.msrb.mxu0 %v7665_v47 }
 0x1f3   :  { %5060 = vmatpush.bf16.msrb.mxu1 %v7673_v48 }
 0x1f4   :  { %5073 = vmatpush.bf16.msrb.mxu2 %v7681_v49 }
 0x1f5   :  { %5086 = vmatpush.bf16.msrb.mxu3 %v7689_v50 }
 0x1f6   :  { %5048 = vmatpush.bf16.msrb.mxu0 %v7664_v56 }
 0x1f7   :  { %5061 = vmatpush.bf16.msrb.mxu1 %v7672_v57 }
 0x1f8   :  { %5074 = vmatpush.bf16.msrb.mxu2 %v7680_v59 }
 0x1f9   :  { %5087 = vmatpush.bf16.msrb.mxu3 %v7688_v60 }
 0x1fa   :  { %5049 = vmatpush.bf16.msrb.mxu0 %v7663_v61 }
 0x1fb   :  { %5062 = vmatpush.bf16.msrb.mxu1 %v7671_v62 }
 0x1fc   :  { %5075 = vmatpush.bf16.msrb.mxu2 %v7679_v63 }
 0x1fd   :  { %5088 = vmatpush.bf16.msrb.mxu3 %v7687_v0 }
 0x1fe   :  { %5050 = vmatpush.bf16.msrb.mxu0 %v7662_v3  ;;  %v4844_v11 = vpop.f32.mrf.mxu0 }
 0x1ff   :  { %5063 = vmatpush.bf16.msrb.mxu1 %v7670_v4  ;;  %v4845_v12 = vadd.f32 %v4844_v11, %v4832_v55  ;;  %v4857_v13 = vpop.f32.mrf.mxu1 }
 0x200   :  { %5076 = vmatpush.bf16.msrb.mxu2 %v7678_v5 }
 0x201   :  { %5089 = vmatpush.bf16.msrb.mxu3 %v7686_v6  ;;  %5051 = vmatmul.bf16.vlgmr.msrb.gmra.mxu0 %v1123_v7  ;;  %v4858_v14 = vadd.f32 %v4857_v13, %v4845_v12 }
 0x202   :  { %5064 = vmatmul.bf16.vlgmr.msrb.gmra.mxu1 %v1124_v8 }
 0x203   :  { %5077 = vmatmul.bf16.vlgmr.msrb.gmra.mxu2 %v1125_v9 }
 0x204   :  { %5090 = vmatmul.bf16.vlgmr.msrb.gmra.mxu3 %v1126_v10 }
 0x206   :  { %v4870_v15 = vpop.f32.mrf.mxu2  ;;  %v4846_v18 = vpop.f32.mrf.mxu0 }
 0x207   :  { %v4871_v16 = vadd.f32 %v4870_v15, %v4858_v14  ;;  %v4883_v17 = vpop.f32.mrf.mxu3  ;;  %v4859_v20 = vpop.f32.mrf.mxu1 }
 0x209   :  { %v4884_v19 = vadd.f32 %v4883_v17, %v4871_v16 }
 0x20e   :  { %v4872_v21 = vpop.f32.mrf.mxu2 }
 0x20f   :  { %v4885_v22 = vpop.f32.mrf.mxu3 }
 0x21e   :  { %v4896_v23 = vpop.f32.mrf.mxu0 }
 0x21f   :  { %v4897_v24 = vadd.f32 %v4896_v23, %v4884_v19  ;;  %v4909_v25 = vpop.f32.mrf.mxu1 }
 0x221   :  { %v4910_v26 = vadd.f32 %v4909_v25, %v4897_v24 }
 0x226   :  { %v4922_v27 = vpop.f32.mrf.mxu2  ;;  %v4898_v30 = vpop.f32.mrf.mxu0 }
 0x227   :  { %v4923_v28 = vadd.f32 %v4922_v27, %v4910_v26  ;;  %v4935_v29 = vpop.f32.mrf.mxu3  ;;  %v4911_v32 = vpop.f32.mrf.mxu1 }
 0x229   :  { %v4936_v31 = vadd.f32 %v4935_v29, %v4923_v28 }
 0x22e   :  { %v4924_v33 = vpop.f32.mrf.mxu2 }
 0x22f   :  { %v4937_v34 = vpop.f32.mrf.mxu3 }
 0x23e   :  { %v4948_v35 = vpop.f32.mrf.mxu0 }
 0x23f   :  { %v4961_v36 = vpop.f32.mrf.mxu1  ;;  %v4949_v46 = vadd.f32 %v4948_v35, %v4936_v31 }
 0x241   :  { %v4962_v50 = vadd.f32 %v4961_v36, %v4949_v46 }
 0x246   :  { %v4974_v37 = vpop.f32.mrf.mxu2  ;;  %v4950_v39 = vpop.f32.mrf.mxu0 }
 0x247   :  { %v4987_v38 = vpop.f32.mrf.mxu3  ;;  %v4963_v40 = vpop.f32.mrf.mxu1  ;;  %v4975_v51 = vadd.f32 %v4974_v37, %v4962_v50 }
 0x249   :  { %v4988_v54 = vadd.f32 %v4987_v38, %v4975_v51 }
 0x24e   :  { %v4976_v41 = vpop.f32.mrf.mxu2 }
 0x24f   :  { %v4989_v42 = vpop.f32.mrf.mxu3 }
 0x25e   :  { %v5000_v43 = vpop.f32.mrf.mxu0 }
 0x25f   :  { %v5013_v44 = vpop.f32.mrf.mxu1  ;;  %v5001_v55 = vadd.f32 %v5000_v43, %v4988_v54 }
 0x261   :  { %v5014_v56 = vadd.f32 %v5013_v44, %v5001_v55 }
 0x266   :  { %v5026_v45 = vpop.f32.mrf.mxu2  ;;  %v5002_v48 = vpop.f32.mrf.mxu0 }
 0x267   :  { %v5039_v47 = vpop.f32.mrf.mxu3  ;;  %v5015_v49 = vpop.f32.mrf.mxu1  ;;  %v5027_v57 = vadd.f32 %v5026_v45, %v5014_v56 }
 0x269   :  { %v5040_v58 = vadd.f32 %v5039_v47, %v5027_v57 }
 0x26e   :  { %v5028_v52 = vpop.f32.mrf.mxu2 }
 0x26f   :  { %v5041_v53 = vpop.f32.mrf.mxu3 }
 0x27e   :  { %v5052_v59 = vpop.f32.mrf.mxu0 }
 0x27f   :  { %v5065_v60 = vpop.f32.mrf.mxu1  ;;  %v5053_v61 = vadd.f32 %v5052_v59, %v5040_v58 }
 0x281   :  { %v5066_v62 = vadd.f32 %v5065_v60, %v5053_v61 }
 0x286   :  { %v5078_v63 = vpop.f32.mrf.mxu2  ;;  %v5054_v3 = vpop.f32.mrf.mxu0 }
 0x287   :  { %v5091_v0 = vpop.f32.mrf.mxu3  ;;  %v5079_v1 = vadd.f32 %v5078_v63, %v5066_v62  ;;  %v5067_v4 = vpop.f32.mrf.mxu1 }
 0x289   :  { %v5092_v5 = vadd.f32 %v5091_v0, %v5079_v1 }
 0x28b   :  { %v5103_v6 = vadd.f32 %v7695_v2, %v5092_v5 }
 0x28d   :  { %5104 = vst [vmem:[#allocation2] sm:$0x3] %v5103_v6 }
 0x28e   :  { %v5080_v7 = vpop.f32.mrf.mxu2 }
 0x28f   :  { %v5093_v8 = vpop.f32.mrf.mxu3 }
 0x294   :  { %v5115_v9 = vld [vmem:[#allocation2] sm:$0x3] }
 0x295   :  { %v5116_v10 = vmax.f32 %v5115_v9, 0.0 }
 0x297   :  { %5117 = vst [vmem:[#allocation2] sm:$0x3] %v5116_v10 }
 0x298   :  { %5128 = dma.vmem_to_hbm [thread:$0]  %s5124_s23, 32, %s5126_s26, [#allocation3]  }
 0x299   :  { %7720 = dma.done.wait [#allocation3], 32  }
 0x29a   :  { %7721 = vsyncadd [#allocation3], 4294967264 }
 0x29b   :  { %5133 = vsyncpa [#allocation3], 1 }

</bundles_post_ra>
